<compile_context>
chip_gen: v7x
topology: tpu7x:2x2x1
jax: 0.10.0
libtpu: 0.0.40
codegen_flags: <defaults>
</compile_context>

<pallas_src>
import functools
import math

import jax
import jax.numpy as jnp
from jax.experimental import pallas as pl
from jax.experimental.pallas import tpu as pltpu

# MXU operand dtype (accumulation stays f32).  Set to jnp.float32 for
# bit-exact f32 matmul numerics.
_MXU_DTYPE = jnp.bfloat16
_LANES = 128


def _round_up(v, m):
    return -(-v // m) * m


@functools.lru_cache(maxsize=1)
def _vmem_limit_bytes():
    """Generation-aware VMEM ceiling (v7x: 64 MiB/TC; v5e/v6e: 128 MiB)."""
    try:
        cap = int(pltpu.get_tpu_info().vmem_capacity_bytes)
    except Exception:
        cap = 64 * 1024 * 1024          # conservative fallback (v7x per-TC)
    return max(32 * 1024 * 1024, (cap * 3) // 4)


def _swish(y):
    # sigmoid = 1/(1+exp(-y)); exp + approx reciprocal both run on the EUP
    # slot, keeping VALU slots free in the full-tensor activation passes.
    return y * pl.reciprocal(1.0 + jnp.exp(-y), approx=True)


# ----------------------------------------------------------------------------
# Fully fused MBConv kernel: pw1 -> depthwise -> SE -> pw2 (+ residual)
# ----------------------------------------------------------------------------

def _mbconv_kernel(has_pw1, skip, k, s, H, W, Ho, Wo, pt, wl, c_shift, inv_hw,
                   *refs):
    if has_pw1:
        (x_ref, pw1_w_ref, pw1_b_ref, dw_w_ref, dw_b_ref,
         se_w1_ref, se_b1_ref, se_w2_ref, se_b2_ref,
         pw2_w_ref, pw2_b_ref, o_ref, mid_ref) = refs
    else:
        (x_ref, dw_w_ref, dw_b_ref,
         se_w1_ref, se_b1_ref, se_w2_ref, se_b2_ref,
         pw2_w_ref, pw2_b_ref, o_ref, mid_ref) = refs

    Hp, Wpa, mid_p = mid_ref.shape
    pb = Hp - pt - H            # bottom halo rows
    pr = Wpa - wl - W           # right halo cols
    zdt = mid_ref.dtype

    # Zero only the halo strips (interior fully overwritten below).  Scratch is
    # re-initialized every grid step -> safe under megacore "parallel" sharding.
    if pt:
        mid_ref[:pt, :, :] = jnp.zeros((pt, Wpa, mid_p), zdt)
    if pb:
        mid_ref[pt + H:, :, :] = jnp.zeros((pb, Wpa, mid_p), zdt)
    if wl:
        mid_ref[:, :wl, :] = jnp.zeros((Hp, wl, mid_p), zdt)
    if pr:
        mid_ref[:, wl + W:, :] = jnp.zeros((Hp, pr, mid_p), zdt)

    x = x_ref[0]                               # (H, W, Cin)
    cin = x.shape[-1]
    x2d = x.reshape(H * W, cin)                # leading-dim merge (W % 8 == 0)

    # ---- pointwise1: single (H*W, Cin) @ (Cin, mid_p) MXU matmul ----
    if has_pw1:
        y1 = jnp.dot(x2d.astype(pw1_w_ref.dtype), pw1_w_ref[...],
                     preferred_element_type=jnp.float32)
        y1 = _swish(y1 + pw1_b_ref[...])
    else:
        y1 = x2d.astype(jnp.float32)
        if mid_p > cin:   # keep padded lanes finite/zero so SE pooling is clean
            y1 = jnp.concatenate(
                [y1, jnp.zeros((H * W, mid_p - cin), jnp.float32)], axis=-1)

    # Interior store starts at a sublane-aligned column (wl % 8 == 0).
    mid_ref[pt:pt + H, wl:wl + W, :] = y1.reshape(H, W, mid_p).astype(zdt)

    # ---- depthwise kxk conv (BN scale pre-folded into dw taps) ----
    w = dw_w_ref[...]                          # (k*k, mid_p) f32
    acc = None
    for ky in range(k):
        for kx in range(k):
            c0 = c_shift + kx                  # read-side absorbs odd offset
            if s == 1:
                win = mid_ref[ky:ky + Ho, c0:c0 + Wo, :]
            else:
                # TODO(synk): de-interleave even/odd columns for stride>1 so
                # tap reads stay contiguous on the sublane axis (v6e/v7x XLU).
                win = mid_ref[pl.ds(ky, Ho, s), pl.ds(c0, Wo, s), :]
            t = ky * k + kx
            term = win * w[t:t + 1, :]
            acc = (term + dw_b_ref[...]) if acc is None else (acc + term)
    y = _swish(acc)                            # (Ho, Wo, mid_p) f32

    # ---- Squeeze-Excite: gate computed and applied here (stays in VMEM) ----
    pooled = jnp.sum(y, axis=0)
    pooled = jnp.sum(pooled, axis=0, keepdims=True) * inv_hw      # (1, mid_p)
    h1 = jnp.dot(pooled, se_w1_ref[...],
                 preferred_element_type=jnp.float32) + se_b1_ref[...]
    h1 = h1 * jax.nn.sigmoid(h1)
    g = jax.nn.sigmoid(jnp.dot(h1, se_w2_ref[...],
                               preferred_element_type=jnp.float32)
                       + se_b2_ref[...])                          # (1, mid_p)

    # ---- pointwise2 (1x1 project) + folded BN + fused residual add ----
    act = (y * g).astype(pw2_w_ref.dtype).reshape(Ho * Wo, mid_p)
    out = jnp.dot(act, pw2_w_ref[...], preferred_element_type=jnp.float32)
    out = out + pw2_b_ref[...]
    if skip:                                   # stride==1, Cin==Cout enforced
        out = out + x2d.astype(jnp.float32)
    o_ref[0] = out.astype(o_ref.dtype)


def fused_mbconv(x, p, *, expan, kernelsize, stride, skip):
    """One fused MBConv on an NHWC tensor; one grid step per batch element."""
    N, H, W, Cin = x.shape
    k, s = kernelsize, stride
    mid_p = p["dw_w"].shape[1]                 # lane-padded expanded channels
    cout = p["pw2_w"].shape[1]
    Ho = -(-H // s)
    Wo = -(-W // s)
    # TF-"same" padding (SameConv-style depthwise conv).
    pad_h = max((Ho - 1) * s + k - H, 0)
    pad_w = max((Wo - 1) * s + k - W, 0)
    pt, plft = pad_h // 2, pad_w // 2
    pb, pr = pad_h - pt, pad_w - plft
    wl = _round_up(plft, 8) if plft else 0     # sublane-aligned left halo
    c_shift = wl - plft
    Hp, Wpa = pt + H + pb, wl + W + pr
    inv_hw = 1.0 / float(Ho * Wo)
    has_pw1 = expan != 1

    kern = functools.partial(_mbconv_kernel, has_pw1, skip, k, s, H, W, Ho, Wo,
                             pt, wl, c_shift, inv_hw)

    in_specs = [pl.BlockSpec((1, H, W, Cin), lambda n: (n, 0, 0, 0))]
    args = [x]
    names = (["pw1_w", "pw1_b"] if has_pw1 else []) + [
        "dw_w", "dw_b", "se_w1", "se_b1", "se_w2", "se_b2", "pw2_w", "pw2_b"]
    for name in names:
        a = p[name]
        in_specs.append(pl.BlockSpec(a.shape, lambda n: (0, 0)))
        args.append(a)

    out = pl.pallas_call(
        kern,
        out_shape=jax.ShapeDtypeStruct((N, Ho * Wo, cout), x.dtype),
        grid=(N,),
        in_specs=in_specs,
        out_specs=pl.BlockSpec((1, Ho * Wo, cout), lambda n: (n, 0, 0)),
        scratch_shapes=[pltpu.VMEM((Hp, Wpa, mid_p), _MXU_DTYPE)],
        compiler_params=pltpu.CompilerParams(
            dimension_semantics=("parallel",),
            vmem_limit_bytes=_vmem_limit_bytes()),
    )(*args)
    return out.reshape(N, Ho, Wo, cout)


# ----------------------------------------------------------------------------
# Parameter init (deterministic; eval-mode BN folded into weight/bias;
# channel dims zero-padded to a multiple of 128 lanes; MXU weights pre-cast)
# ----------------------------------------------------------------------------

def _bn_fold(c, eps=1e-5):
    gamma = jnp.ones((c,), jnp.float32)
    beta = jnp.zeros((c,), jnp.float32)
    mean = jnp.zeros((c,), jnp.float32)
    var = jnp.ones((c,), jnp.float32)
    scale = gamma / jnp.sqrt(var + eps)
    bias = beta - mean * scale
    return scale, bias


def _pad_last(a, to):
    pad = to - a.shape[-1]
    return a if pad == 0 else jnp.pad(a, [(0, 0)] * (a.ndim - 1) + [(0, pad)])


def _pad_rows(a, to):
    pad = to - a.shape[0]
    return a if pad == 0 else jnp.pad(a, [(0, pad)] + [(0, 0)] * (a.ndim - 1))


def init_mbconv(key, cin, cout, expan, kernelsize, se_ratio):
    mid = expan * cin
    mid_p = _round_up(mid, _LANES)             # lane-dense expanded channels
    cse = max(1, int(cin / se_ratio))
    ks = jax.random.split(key, 5)
    p = {}
    if expan != 1:
        w = jax.random.normal(ks[0], (cin, mid), jnp.float32) / math.sqrt(cin)
        s, b = _bn_fold(mid)
        p["pw1_w"] = _pad_last(w * s[None, :], mid_p).astype(_MXU_DTYPE)
        p["pw1_b"] = _pad_last(b[None, :], mid_p)
    w = jax.random.normal(ks[1], (kernelsize * kernelsize, mid),
                          jnp.float32) / float(kernelsize)
    s, b = _bn_fold(mid)
    p["dw_w"] = _pad_last(w * s[None, :], mid_p)          # BN folded into taps
    p["dw_b"] = _pad_last(b[None, :], mid_p)
    p["se_w1"] = _pad_rows(
        jax.random.normal(ks[2], (mid, cse), jnp.float32) / math.sqrt(mid), mid_p)
    p["se_b1"] = jnp.zeros((1, cse), jnp.float32)
    p["se_w2"] = _pad_last(
        jax.random.normal(ks[3], (cse, mid), jnp.float32) / math.sqrt(cse), mid_p)
    p["se_b2"] = jnp.zeros((1, mid_p), jnp.float32)
    w = jax.random.normal(ks[4], (mid, cout), jnp.float32) / math.sqrt(mid)
    s, b = _bn_fold(cout)
    p["pw2_w"] = _pad_rows(w * s[None, :], mid_p).astype(_MXU_DTYPE)
    p["pw2_b"] = b[None, :]
    return p


# ----------------------------------------------------------------------------
# MBblock: repeat MBConv layers (stride only on the first, like the reference)
# ----------------------------------------------------------------------------

class MBblockPallas:
    def __init__(self, key, inchannels, outchannels, expan, kernelsize, stride,
                 se_ratio, repeat, is_skip):
        self.params, self.cfgs = [], []
        keys = jax.random.split(key, repeat)
        cin, s = inchannels, stride
        for r in range(repeat):
            skip = bool(is_skip) and (cin == outchannels) and (s == 1)
            self.params.append(init_mbconv(keys[r], cin, outchannels, expan,
                                           kernelsize, se_ratio))
            self.cfgs.append(dict(expan=expan, kernelsize=kernelsize,
                                  stride=s, skip=skip))
            cin, s = outchannels, 1

    def __call__(self, x_nchw):
        # TODO(synk): keep NHWC end-to-end when embedded in a full network.
        x = jnp.transpose(x_nchw, (0, 2, 3, 1))   # NCHW -> NHWC
        for p, cfg in zip(self.params, self.cfgs):
            x = fused_mbconv(x, p, **cfg)
        return jnp.transpose(x, (0, 3, 1, 2))     # NHWC -> NCHW


# ----------------------------------------------------------------------------

if __name__ == "__main__":
    key = jax.random.PRNGKey(0)
    kx, kp = jax.random.split(key)

    # Small shapes consistent with the module: N=2, C=8, H=W=16 (NCHW like PyTorch).
    x = jax.random.normal(kx, (2, 8, 16, 16), jnp.float32)

    block = MBblockPallas(kp, inchannels=8, outchannels=8, expan=3,
                          kernelsize=3, stride=1, se_ratio=4, repeat=2,
                          is_skip=True)
    y = block(x)
    jax.block_until_ready(y)
    assert y.shape == (2, 8, 16, 16), y.shape
    assert bool(jnp.all(jnp.isfinite(y)))
    print("KERNEL_OK")
</pallas_src>

<mosaic_0001>
module attributes {stable_mosaic.version = 11 : i64} {
  func.func @_mbconv_kernel(%arg0: i32, %arg1: memref<1x16x16x8xf32, #tpu.memory_space<vmem>>, %arg2: memref<8x128xbf16, #tpu.memory_space<vmem>>, %arg3: memref<1x128xf32, #tpu.memory_space<vmem>>, %arg4: memref<9x128xf32, #tpu.memory_space<vmem>>, %arg5: memref<1x128xf32, #tpu.memory_space<vmem>>, %arg6: memref<128x2xf32, #tpu.memory_space<vmem>>, %arg7: memref<1x2xf32, #tpu.memory_space<vmem>>, %arg8: memref<2x128xf32, #tpu.memory_space<vmem>>, %arg9: memref<1x128xf32, #tpu.memory_space<vmem>>, %arg10: memref<128x8xbf16, #tpu.memory_space<vmem>>, %arg11: memref<1x8xf32, #tpu.memory_space<vmem>>, %arg12: memref<1x256x8xf32, #tpu.memory_space<vmem>>, %arg13: memref<18x25x128xbf16, #tpu.memory_space<vmem>>) attributes {dimension_semantics = [#tpu.dimension_semantics<parallel>], iteration_bounds = array<i64: 2>, scalar_prefetch = 0 : i64, scratch_operands = 1 : i64, tpu.core_type = #tpu.core_type<tc>, window_params = [{transform_indices = @transform_0, window_bounds = array<i64: 1, 16, 16, 8>}, {pipeline_mode = #tpu.pipeline_mode<synchronous>, transform_indices = @transform_1, window_bounds = array<i64: 8, 128>}, {pipeline_mode = #tpu.pipeline_mode<synchronous>, transform_indices = @transform_2, window_bounds = array<i64: 1, 128>}, {pipeline_mode = #tpu.pipeline_mode<synchronous>, transform_indices = @transform_3, window_bounds = array<i64: 9, 128>}, {pipeline_mode = #tpu.pipeline_mode<synchronous>, transform_indices = @transform_4, window_bounds = array<i64: 1, 128>}, {pipeline_mode = #tpu.pipeline_mode<synchronous>, transform_indices = @transform_5, window_bounds = array<i64: 128, 2>}, {pipeline_mode = #tpu.pipeline_mode<synchronous>, transform_indices = @transform_6, window_bounds = array<i64: 1, 2>}, {pipeline_mode = #tpu.pipeline_mode<synchronous>, transform_indices = @transform_7, window_bounds = array<i64: 2, 128>}, {pipeline_mode = #tpu.pipeline_mode<synchronous>, transform_indices = @transform_8, window_bounds = array<i64: 1, 128>}, {pipeline_mode = #tpu.pipeline_mode<synchronous>, transform_indices = @transform_9, window_bounds = array<i64: 128, 8>}, {pipeline_mode = #tpu.pipeline_mode<synchronous>, transform_indices = @transform_10, window_bounds = array<i64: 1, 8>}, {transform_indices = @transform_11, window_bounds = array<i64: 1, 256, 8>}]} {
    %cst = arith.constant 0.000000e+00 : bf16
    %0 = vector.broadcast %cst : bf16 to vector<1x25x128xbf16>
    %c0 = arith.constant 0 : index
    %c0_0 = arith.constant 0 : index
    %c0_1 = arith.constant 0 : index
    %1 = vector.load %arg13[%c0, %c0_0, %c0_1] : memref<18x25x128xbf16, #tpu.memory_space<vmem>>, vector<1x25x128xbf16>
    tpu.vector_store %arg13[%c0, %c0_0, %c0_1], %0 {strides = array<i32>} : memref<18x25x128xbf16, #tpu.memory_space<vmem>>, vector<1x25x128xbf16>,
    %cst_2 = arith.constant 0.000000e+00 : bf16
    %2 = vector.broadcast %cst_2 : bf16 to vector<1x25x128xbf16>
    %c17 = arith.constant 17 : index
    %c0_3 = arith.constant 0 : index
    %c0_4 = arith.constant 0 : index
    %3 = vector.load %arg13[%c17, %c0_3, %c0_4] : memref<18x25x128xbf16, #tpu.memory_space<vmem>>, vector<1x25x128xbf16>
    tpu.vector_store %arg13[%c17, %c0_3, %c0_4], %2 {strides = array<i32>} : memref<18x25x128xbf16, #tpu.memory_space<vmem>>, vector<1x25x128xbf16>,
    %cst_5 = arith.constant 0.000000e+00 : bf16
    %4 = vector.broadcast %cst_5 : bf16 to vector<18x8x128xbf16>
    %c0_6 = arith.constant 0 : index
    %c0_7 = arith.constant 0 : index
    %c0_8 = arith.constant 0 : index
    %5 = vector.load %arg13[%c0_6, %c0_7, %c0_8] : memref<18x25x128xbf16, #tpu.memory_space<vmem>>, vector<18x8x128xbf16>
    tpu.vector_store %arg13[%c0_6, %c0_7, %c0_8], %4 {strides = array<i32>} : memref<18x25x128xbf16, #tpu.memory_space<vmem>>, vector<18x8x128xbf16>,
    %cst_9 = arith.constant 0.000000e+00 : bf16
    %6 = vector.broadcast %cst_9 : bf16 to vector<18x1x128xbf16>
    %c0_10 = arith.constant 0 : index
    %c24 = arith.constant 24 : index
    %c0_11 = arith.constant 0 : index
    %7 = vector.load %arg13[%c0_10, %c24, %c0_11] : memref<18x25x128xbf16, #tpu.memory_space<vmem>>, vector<18x1x128xbf16>
    tpu.vector_store %arg13[%c0_10, %c24, %c0_11], %6 {strides = array<i32>} : memref<18x25x128xbf16, #tpu.memory_space<vmem>>, vector<18x1x128xbf16>,
    %c0_12 = arith.constant 0 : index
    %c0_13 = arith.constant 0 : index
    %c0_14 = arith.constant 0 : index
    %c0_15 = arith.constant 0 : index
    %8 = vector.load %arg1[%c0_12, %c0_13, %c0_14, %c0_15] : memref<1x16x16x8xf32, #tpu.memory_space<vmem>>, vector<1x16x16x8xf32>
    %9 = vector.shape_cast %8 : vector<1x16x16x8xf32> to vector<16x16x8xf32>
    %10 = vector.shape_cast %9 : vector<16x16x8xf32> to vector<256x8xf32>
    %11 = arith.truncf %10 : vector<256x8xf32> to vector<256x8xbf16>
    %c0_16 = arith.constant 0 : index
    %c0_17 = arith.constant 0 : index
    %12 = vector.load %arg2[%c0_16, %c0_17] : memref<8x128xbf16, #tpu.memory_space<vmem>>, vector<8x128xbf16>
    %cst_18 = arith.constant dense<0.000000e+00> : vector<256x128xf32>
    %13 = tpu.matmul %11, %12, %cst_18 {dimension_numbers = #tpu.dot_dimension_numbers<[1], [0], [0], [1], [0, 0, 1, 1], [], []>} : vector<256x8xbf16>, vector<8x128xbf16>, vector<256x128xf32> -> vector<256x128xf32>
    %c0_19 = arith.constant 0 : index
    %c0_20 = arith.constant 0 : index
    %14 = vector.load %arg3[%c0_19, %c0_20] : memref<1x128xf32, #tpu.memory_space<vmem>>, vector<1x128xf32>
    %15 = vector.broadcast %14 : vector<1x128xf32> to vector<256x128xf32>
    %16 = arith.addf %13, %15 : vector<256x128xf32>
    %cst_21 = arith.constant 0.000000e+00 : f32
    %17 = vector.broadcast %cst_21 : f32 to vector<256x128xf32>
    %18 = arith.subf %17, %16 : vector<256x128xf32>
    %19 = math.exp %18 : vector<256x128xf32>
    %cst_22 = arith.constant 1.000000e+00 : f32
    %20 = vector.broadcast %cst_22 : f32 to vector<256x128xf32>
    %21 = arith.addf %20, %19 : vector<256x128xf32>
    %22 = tpu.reciprocal %21 {approx = true} : vector<256x128xf32> -> vector<256x128xf32>
    %23 = arith.mulf %16, %22 : vector<256x128xf32>
    %24 = vector.shape_cast %23 : vector<256x128xf32> to vector<16x16x128xf32>
    %25 = arith.truncf %24 : vector<16x16x128xf32> to vector<16x16x128xbf16>
    %c1 = arith.constant 1 : index
    %c8 = arith.constant 8 : index
    %c0_23 = arith.constant 0 : index
    %26 = vector.load %arg13[%c1, %c8, %c0_23] : memref<18x25x128xbf16, #tpu.memory_space<vmem>>, vector<16x16x128xbf16>
    tpu.vector_store %arg13[%c1, %c8, %c0_23], %25 {strides = array<i32>} : memref<18x25x128xbf16, #tpu.memory_space<vmem>>, vector<16x16x128xbf16>,
    %c0_24 = arith.constant 0 : index
    %c0_25 = arith.constant 0 : index
    %27 = vector.load %arg4[%c0_24, %c0_25] : memref<9x128xf32, #tpu.memory_space<vmem>>, vector<9x128xf32>
    %c0_26 = arith.constant 0 : index
    %c7 = arith.constant 7 : index
    %c0_27 = arith.constant 0 : index
    %28 = vector.load %arg13[%c0_26, %c7, %c0_27] : memref<18x25x128xbf16, #tpu.memory_space<vmem>>, vector<16x16x128xbf16>
    %29 = vector.extract_strided_slice %27 {offsets = [0, 0], sizes = [1, 128], strides = [1, 1]} : vector<9x128xf32> to vector<1x128xf32>
    %30 = arith.extf %28 : vector<16x16x128xbf16> to vector<16x16x128xf32>
    %31 = vector.shape_cast %29 : vector<1x128xf32> to vector<1x1x128xf32>
    %32 = vector.broadcast %31 : vector<1x1x128xf32> to vector<16x16x128xf32>
    %33 = arith.mulf %30, %32 : vector<16x16x128xf32>
    %c0_28 = arith.constant 0 : index
    %c0_29 = arith.constant 0 : index
    %34 = vector.load %arg5[%c0_28, %c0_29] : memref<1x128xf32, #tpu.memory_space<vmem>>, vector<1x128xf32>
    %35 = vector.shape_cast %34 : vector<1x128xf32> to vector<1x1x128xf32>
    %36 = vector.broadcast %35 : vector<1x1x128xf32> to vector<16x16x128xf32>
    %37 = arith.addf %33, %36 : vector<16x16x128xf32>
    %c0_30 = arith.constant 0 : index
    %c8_31 = arith.constant 8 : index
    %c0_32 = arith.constant 0 : index
    %38 = vector.load %arg13[%c0_30, %c8_31, %c0_32] : memref<18x25x128xbf16, #tpu.memory_space<vmem>>, vector<16x16x128xbf16>
    %39 = vector.extract_strided_slice %27 {offsets = [1, 0], sizes = [1, 128], strides = [1, 1]} : vector<9x128xf32> to vector<1x128xf32>
    %40 = arith.extf %38 : vector<16x16x128xbf16> to vector<16x16x128xf32>
    %41 = vector.shape_cast %39 : vector<1x128xf32> to vector<1x1x128xf32>
    %42 = vector.broadcast %41 : vector<1x1x128xf32> to vector<16x16x128xf32>
    %43 = arith.mulf %40, %42 : vector<16x16x128xf32>
    %44 = arith.addf %37, %43 : vector<16x16x128xf32>
    %c0_33 = arith.constant 0 : index
    %c9 = arith.constant 9 : index
    %c0_34 = arith.constant 0 : index
    %45 = vector.load %arg13[%c0_33, %c9, %c0_34] : memref<18x25x128xbf16, #tpu.memory_space<vmem>>, vector<16x16x128xbf16>
    %46 = vector.extract_strided_slice %27 {offsets = [2, 0], sizes = [1, 128], strides = [1, 1]} : vector<9x128xf32> to vector<1x128xf32>
    %47 = arith.extf %45 : vector<16x16x128xbf16> to vector<16x16x128xf32>
    %48 = vector.shape_cast %46 : vector<1x128xf32> to vector<1x1x128xf32>
    %49 = vector.broadcast %48 : vector<1x1x128xf32> to vector<16x16x128xf32>
    %50 = arith.mulf %47, %49 : vector<16x16x128xf32>
    %51 = arith.addf %44, %50 : vector<16x16x128xf32>
    %c1_35 = arith.constant 1 : index
    %c7_36 = arith.constant 7 : index
    %c0_37 = arith.constant 0 : index
    %52 = vector.load %arg13[%c1_35, %c7_36, %c0_37] : memref<18x25x128xbf16, #tpu.memory_space<vmem>>, vector<16x16x128xbf16>
    %53 = vector.extract_strided_slice %27 {offsets = [3, 0], sizes = [1, 128], strides = [1, 1]} : vector<9x128xf32> to vector<1x128xf32>
    %54 = arith.extf %52 : vector<16x16x128xbf16> to vector<16x16x128xf32>
    %55 = vector.shape_cast %53 : vector<1x128xf32> to vector<1x1x128xf32>
    %56 = vector.broadcast %55 : vector<1x1x128xf32> to vector<16x16x128xf32>
    %57 = arith.mulf %54, %56 : vector<16x16x128xf32>
    %58 = arith.addf %51, %57 : vector<16x16x128xf32>
    %c1_38 = arith.constant 1 : index
    %c8_39 = arith.constant 8 : index
    %c0_40 = arith.constant 0 : index
    %59 = vector.load %arg13[%c1_38, %c8_39, %c0_40] : memref<18x25x128xbf16, #tpu.memory_space<vmem>>, vector<16x16x128xbf16>
    %60 = vector.extract_strided_slice %27 {offsets = [4, 0], sizes = [1, 128], strides = [1, 1]} : vector<9x128xf32> to vector<1x128xf32>
    %61 = arith.extf %59 : vector<16x16x128xbf16> to vector<16x16x128xf32>
    %62 = vector.shape_cast %60 : vector<1x128xf32> to vector<1x1x128xf32>
    %63 = vector.broadcast %62 : vector<1x1x128xf32> to vector<16x16x128xf32>
    %64 = arith.mulf %61, %63 : vector<16x16x128xf32>
    %65 = arith.addf %58, %64 : vector<16x16x128xf32>
    %c1_41 = arith.constant 1 : index
    %c9_42 = arith.constant 9 : index
    %c0_43 = arith.constant 0 : index
    %66 = vector.load %arg13[%c1_41, %c9_42, %c0_43] : memref<18x25x128xbf16, #tpu.memory_space<vmem>>, vector<16x16x128xbf16>
    %67 = vector.extract_strided_slice %27 {offsets = [5, 0], sizes = [1, 128], strides = [1, 1]} : vector<9x128xf32> to vector<1x128xf32>
    %68 = arith.extf %66 : vector<16x16x128xbf16> to vector<16x16x128xf32>
    %69 = vector.shape_cast %67 : vector<1x128xf32> to vector<1x1x128xf32>
    %70 = vector.broadcast %69 : vector<1x1x128xf32> to vector<16x16x128xf32>
    %71 = arith.mulf %68, %70 : vector<16x16x128xf32>
    %72 = arith.addf %65, %71 : vector<16x16x128xf32>
    %c2 = arith.constant 2 : index
    %c7_44 = arith.constant 7 : index
    %c0_45 = arith.constant 0 : index
    %73 = vector.load %arg13[%c2, %c7_44, %c0_45] : memref<18x25x128xbf16, #tpu.memory_space<vmem>>, vector<16x16x128xbf16>
    %74 = vector.extract_strided_slice %27 {offsets = [6, 0], sizes = [1, 128], strides = [1, 1]} : vector<9x128xf32> to vector<1x128xf32>
    %75 = arith.extf %73 : vector<16x16x128xbf16> to vector<16x16x128xf32>
    %76 = vector.shape_cast %74 : vector<1x128xf32> to vector<1x1x128xf32>
    %77 = vector.broadcast %76 : vector<1x1x128xf32> to vector<16x16x128xf32>
    %78 = arith.mulf %75, %77 : vector<16x16x128xf32>
    %79 = arith.addf %72, %78 : vector<16x16x128xf32>
    %c2_46 = arith.constant 2 : index
    %c8_47 = arith.constant 8 : index
    %c0_48 = arith.constant 0 : index
    %80 = vector.load %arg13[%c2_46, %c8_47, %c0_48] : memref<18x25x128xbf16, #tpu.memory_space<vmem>>, vector<16x16x128xbf16>
    %81 = vector.extract_strided_slice %27 {offsets = [7, 0], sizes = [1, 128], strides = [1, 1]} : vector<9x128xf32> to vector<1x128xf32>
    %82 = arith.extf %80 : vector<16x16x128xbf16> to vector<16x16x128xf32>
    %83 = vector.shape_cast %81 : vector<1x128xf32> to vector<1x1x128xf32>
    %84 = vector.broadcast %83 : vector<1x1x128xf32> to vector<16x16x128xf32>
    %85 = arith.mulf %82, %84 : vector<16x16x128xf32>
    %86 = arith.addf %79, %85 : vector<16x16x128xf32>
    %c2_49 = arith.constant 2 : index
    %c9_50 = arith.constant 9 : index
    %c0_51 = arith.constant 0 : index
    %87 = vector.load %arg13[%c2_49, %c9_50, %c0_51] : memref<18x25x128xbf16, #tpu.memory_space<vmem>>, vector<16x16x128xbf16>
    %88 = vector.extract_strided_slice %27 {offsets = [8, 0], sizes = [1, 128], strides = [1, 1]} : vector<9x128xf32> to vector<1x128xf32>
    %89 = arith.extf %87 : vector<16x16x128xbf16> to vector<16x16x128xf32>
    %90 = vector.shape_cast %88 : vector<1x128xf32> to vector<1x1x128xf32>
    %91 = vector.broadcast %90 : vector<1x1x128xf32> to vector<16x16x128xf32>
    %92 = arith.mulf %89, %91 : vector<16x16x128xf32>
    %93 = arith.addf %86, %92 : vector<16x16x128xf32>
    %cst_52 = arith.constant 0.000000e+00 : f32
    %94 = vector.broadcast %cst_52 : f32 to vector<16x16x128xf32>
    %95 = arith.subf %94, %93 : vector<16x16x128xf32>
    %96 = math.exp %95 : vector<16x16x128xf32>
    %cst_53 = arith.constant 1.000000e+00 : f32
    %97 = vector.broadcast %cst_53 : f32 to vector<16x16x128xf32>
    %98 = arith.addf %97, %96 : vector<16x16x128xf32>
    %99 = tpu.reciprocal %98 {approx = true} : vector<16x16x128xf32> -> vector<16x16x128xf32>
    %100 = arith.mulf %93, %99 : vector<16x16x128xf32>
    %cst_54 = arith.constant dense<0.000000e+00> : vector<16x128xf32>
    %101 = vector.multi_reduction <add>, %100, %cst_54 [0] : vector<16x16x128xf32> to vector<16x128xf32>
    %cst_55 = arith.constant dense<0.000000e+00> : vector<128xf32>
    %102 = vector.multi_reduction <add>, %101, %cst_55 [0] : vector<16x128xf32> to vector<128xf32>
    %103 = vector.shape_cast %102 : vector<128xf32> to vector<1x128xf32>
    %cst_56 = arith.constant 3.906250e-03 : f32
    %104 = vector.broadcast %cst_56 : f32 to vector<1x128xf32>
    %105 = arith.mulf %103, %104 : vector<1x128xf32>
    %c0_57 = arith.constant 0 : index
    %c0_58 = arith.constant 0 : index
    %106 = vector.load %arg6[%c0_57, %c0_58] : memref<128x2xf32, #tpu.memory_space<vmem>>, vector<128x2xf32>
    %cst_59 = arith.constant dense<0.000000e+00> : vector<1x2xf32>
    %107 = tpu.matmul %105, %106, %cst_59 {dimension_numbers = #tpu.dot_dimension_numbers<[1], [0], [0], [1], [0, 0, 1, 1], [], []>} : vector<1x128xf32>, vector<128x2xf32>, vector<1x2xf32> -> vector<1x2xf32>
    %c0_60 = arith.constant 0 : index
    %c0_61 = arith.constant 0 : index
    %108 = vector.load %arg7[%c0_60, %c0_61] : memref<1x2xf32, #tpu.memory_space<vmem>>, vector<1x2xf32>
    %109 = arith.addf %107, %108 : vector<1x2xf32>
    %110 = arith.negf %109 : vector<1x2xf32>
    %111 = math.exp %110 : vector<1x2xf32>
    %cst_62 = arith.constant 1.000000e+00 : f32
    %112 = vector.broadcast %cst_62 : f32 to vector<1x2xf32>
    %113 = arith.addf %112, %111 : vector<1x2xf32>
    %114 = arith.divf %112, %113 : vector<1x2xf32>
    %115 = arith.mulf %109, %114 : vector<1x2xf32>
    %c0_63 = arith.constant 0 : index
    %c0_64 = arith.constant 0 : index
    %116 = vector.load %arg8[%c0_63, %c0_64] : memref<2x128xf32, #tpu.memory_space<vmem>>, vector<2x128xf32>
    %cst_65 = arith.constant dense<0.000000e+00> : vector<1x128xf32>
    %117 = tpu.matmul %115, %116, %cst_65 {dimension_numbers = #tpu.dot_dimension_numbers<[1], [0], [0], [1], [0, 0, 1, 1], [], []>} : vector<1x2xf32>, vector<2x128xf32>, vector<1x128xf32> -> vector<1x128xf32>
    %c0_66 = arith.constant 0 : index
    %c0_67 = arith.constant 0 : index
    %118 = vector.load %arg9[%c0_66, %c0_67] : memref<1x128xf32, #tpu.memory_space<vmem>>, vector<1x128xf32>
    %119 = arith.addf %117, %118 : vector<1x128xf32>
    %120 = arith.negf %119 : vector<1x128xf32>
    %121 = math.exp %120 : vector<1x128xf32>
    %cst_68 = arith.constant 1.000000e+00 : f32
    %122 = vector.broadcast %cst_68 : f32 to vector<1x128xf32>
    %123 = arith.addf %122, %121 : vector<1x128xf32>
    %124 = arith.divf %122, %123 : vector<1x128xf32>
    %125 = vector.shape_cast %124 : vector<1x128xf32> to vector<1x1x128xf32>
    %126 = vector.broadcast %125 : vector<1x1x128xf32> to vector<16x16x128xf32>
    %127 = arith.mulf %100, %126 : vector<16x16x128xf32>
    %128 = arith.truncf %127 : vector<16x16x128xf32> to vector<16x16x128xbf16>
    %129 = vector.shape_cast %128 : vector<16x16x128xbf16> to vector<256x128xbf16>
    %c0_69 = arith.constant 0 : index
    %c0_70 = arith.constant 0 : index
    %130 = vector.load %arg10[%c0_69, %c0_70] : memref<128x8xbf16, #tpu.memory_space<vmem>>, vector<128x8xbf16>
    %cst_71 = arith.constant dense<0.000000e+00> : vector<256x8xf32>
    %131 = tpu.matmul %129, %130, %cst_71 {dimension_numbers = #tpu.dot_dimension_numbers<[1], [0], [0], [1], [0, 0, 1, 1], [], []>} : vector<256x128xbf16>, vector<128x8xbf16>, vector<256x8xf32> -> vector<256x8xf32>
    %c0_72 = arith.constant 0 : index
    %c0_73 = arith.constant 0 : index
    %132 = vector.load %arg11[%c0_72, %c0_73] : memref<1x8xf32, #tpu.memory_space<vmem>>, vector<1x8xf32>
    %133 = vector.broadcast %132 : vector<1x8xf32> to vector<256x8xf32>
    %134 = arith.addf %131, %133 : vector<256x8xf32>
    %135 = arith.addf %134, %10 : vector<256x8xf32>
    %c0_74 = arith.constant 0 : index
    %c0_75 = arith.constant 0 : index
    %c0_76 = arith.constant 0 : index
    %136 = vector.load %arg12[%c0_74, %c0_75, %c0_76] : memref<1x256x8xf32, #tpu.memory_space<vmem>>, vector<1x256x8xf32>
    %137 = vector.shape_cast %136 : vector<1x256x8xf32> to vector<256x8xf32>
    %138 = vector.shape_cast %135 : vector<256x8xf32> to vector<1x256x8xf32>
    tpu.vector_store %arg12[%c0_74, %c0_75, %c0_76], %138 {strides = array<i32>} : memref<1x256x8xf32, #tpu.memory_space<vmem>>, vector<1x256x8xf32>,
    return
  }
  func.func @transform_0(%arg0: i32) -> (i32, i32, i32, i32) {
    %c0_i32 = arith.constant 0 : i32
    %c0_i32_0 = arith.constant 0 : i32
    %c0_i32_1 = arith.constant 0 : i32
    %c0_i32_2 = arith.constant 0 : i32
    return %arg0, %c0_i32, %c0_i32_0, %c0_i32_1 : i32, i32, i32, i32
  }
  func.func @transform_1(%arg0: i32) -> (i32, i32) {
    %c0_i32 = arith.constant 0 : i32
    %c0_i32_0 = arith.constant 0 : i32
    %c0_i32_1 = arith.constant 0 : i32
    return %c0_i32, %c0_i32_0 : i32, i32
  }
  func.func @transform_2(%arg0: i32) -> (i32, i32) {
    %c0_i32 = arith.constant 0 : i32
    %c0_i32_0 = arith.constant 0 : i32
    %c0_i32_1 = arith.constant 0 : i32
    return %c0_i32, %c0_i32_0 : i32, i32
  }
  func.func @transform_3(%arg0: i32) -> (i32, i32) {
    %c0_i32 = arith.constant 0 : i32
    %c0_i32_0 = arith.constant 0 : i32
    %c0_i32_1 = arith.constant 0 : i32
    return %c0_i32, %c0_i32_0 : i32, i32
  }
  func.func @transform_4(%arg0: i32) -> (i32, i32) {
    %c0_i32 = arith.constant 0 : i32
    %c0_i32_0 = arith.constant 0 : i32
    %c0_i32_1 = arith.constant 0 : i32
    return %c0_i32, %c0_i32_0 : i32, i32
  }
  func.func @transform_5(%arg0: i32) -> (i32, i32) {
    %c0_i32 = arith.constant 0 : i32
    %c0_i32_0 = arith.constant 0 : i32
    %c0_i32_1 = arith.constant 0 : i32
    return %c0_i32, %c0_i32_0 : i32, i32
  }
  func.func @transform_6(%arg0: i32) -> (i32, i32) {
    %c0_i32 = arith.constant 0 : i32
    %c0_i32_0 = arith.constant 0 : i32
    %c0_i32_1 = arith.constant 0 : i32
    return %c0_i32, %c0_i32_0 : i32, i32
  }
  func.func @transform_7(%arg0: i32) -> (i32, i32) {
    %c0_i32 = arith.constant 0 : i32
    %c0_i32_0 = arith.constant 0 : i32
    %c0_i32_1 = arith.constant 0 : i32
    return %c0_i32, %c0_i32_0 : i32, i32
  }
  func.func @transform_8(%arg0: i32) -> (i32, i32) {
    %c0_i32 = arith.constant 0 : i32
    %c0_i32_0 = arith.constant 0 : i32
    %c0_i32_1 = arith.constant 0 : i32
    return %c0_i32, %c0_i32_0 : i32, i32
  }
  func.func @transform_9(%arg0: i32) -> (i32, i32) {
    %c0_i32 = arith.constant 0 : i32
    %c0_i32_0 = arith.constant 0 : i32
    %c0_i32_1 = arith.constant 0 : i32
    return %c0_i32, %c0_i32_0 : i32, i32
  }
  func.func @transform_10(%arg0: i32) -> (i32, i32) {
    %c0_i32 = arith.constant 0 : i32
    %c0_i32_0 = arith.constant 0 : i32
    %c0_i32_1 = arith.constant 0 : i32
    return %c0_i32, %c0_i32_0 : i32, i32
  }
  func.func @transform_11(%arg0: i32) -> (i32, i32, i32) {
    %c0_i32 = arith.constant 0 : i32
    %c0_i32_0 = arith.constant 0 : i32
    %c0_i32_1 = arith.constant 0 : i32
    return %arg0, %c0_i32, %c0_i32_0 : i32, i32, i32
  }
}

</mosaic_0001>

<bundles_post_ra>
// kernel: tpu_custom_call.1
= control target key start
LH: loop header
LB: loop body
LE: loop exit
PB: predicated region body
PF: predicated region fallthrough
CT: control target
= control target key end

     0   :  { %s5323_s17 = smov 0   ;;  %s9365_s0 = inlined_call_operand.vmem [shape: f32[2,16,16,8], index: 0, kind: input, shape index: {}]   ;;  %s9366_s1 = inlined_call_operand.vmem [shape: bf16[8,128], index: 1, kind: input, shape index: {}]   ;;  %s9367_s2 = inlined_call_operand.vmem [shape: f32[1,128], index: 2, kind: input, shape index: {}]   ;;  %s9368_s3 = inlined_call_operand.vmem [shape: f32[9,128], index: 3, kind: input, shape index: {}]   ;;  %s9369_s4 = inlined_call_operand.vmem [shape: f32[1,128], index: 4, kind: input, shape index: {}]   ;;  %s9370_s5 = inlined_call_operand.vmem [shape: f32[128,2], index: 5, kind: input, shape index: {}]   ;;  %s9371_s6 = inlined_call_operand.vmem [shape: f32[1,2], index: 6, kind: input, shape index: {}]   ;;  %s9372_s7 = inlined_call_operand.vmem [shape: f32[2,128], index: 7, kind: input, shape index: {}]   ;;  %s9373_s8 = inlined_call_operand.vmem [shape: f32[1,128], index: 8, kind: input, shape index: {}]   ;;  %s9374_s9 = inlined_call_operand.vmem [shape: bf16[128,8], index: 9, kind: input, shape index: {}]   ;;  %s9375_s10 = inlined_call_operand.vmem [shape: f32[1,8], index: 10, kind: input, shape index: {}]   ;;  %s9376_s11 = inlined_call_operand.vmem [shape: f32[2,256,8], index: 11, kind: output, shape index: {}]  }
   0x1 LB: > { %s4548_s18 = sadd.s32 4294967295, %s5257_s17   ;;  %p4552_p0 = scmp.ge.s32.totalorder %s5257_s17, 1  ;;  %s5257_s17 = sphi %s5323_s17, %s21_s17  }
   0x2   : > { %p337_p1 = scmp.lt.s32.totalorder %s5257_s17, 3 }
   0x4   : > { %p338_p2 = pnand %p4552_p0, %p337_p1 }
   0x6   : > { %341 = sbr.rel (%p338_p2) target bundleno = 1597 (0x63d), region = 64 }
   0xd   : > { %v524_v0 = vld [vmem:[%s9366_s1] sm:$0xf]  ;;  %vm581_vm0 = vcmask 1043456   ;;  %p5336_p3 = scmp.lt.s32.totalorder %s4548_s18, 1  ;;  %v5259_v2 = vmov 0   ;;  %vm532_vm1 = vcmask 64512   ;;  %v1197_v55 = vlaneseq }
   0xe   : > { %4863 = vmatprep.subr.msk.bf16.mxu1 %vm581_vm0, %v524_v0  ;;  %v583_v1 = vsel %vm581_vm0, %v524_v0, 0  ;;  %406 = vst [vmem:[#allocation2 + $0x20] sm:$0xf] %v5259_v2  ;;  %388 = vst [vmem:[#allocation2] sm:$0xf] %v5259_v2  ;;  %vm1372_vm2 = vcmask 1046528  }
   0xf   : > { %389 = vst [vmem:[#allocation2 + $0x4] sm:$0xf] %v5259_v2  ;;  %390 = vst [vmem:[#allocation2 + $0x8] sm:$0xf] %v5259_v2  ;;  %4718 = vmatpush3.bf16.msra.mxu1 %v583_v1  ;;  %s10469_s18 = smov (!%p5336_p3, %s4548_s18), 1  ;;  %v5422_v1 = vshrl.u32 %v1197_v55, 7 }
  0x10   : > { %398 = vst [vmem:[#allocation2 + $0x110] sm:$0xf] %v5259_v2  ;;  %399 = vst [vmem:[#allocation2 + $0x114] sm:$0xf] %v5259_v2  ;;  %s4623_s22 = sshll.u32 %s10469_s18, 8  ;;  %vm1649_vm3 = vcmask 1045504  }
  0x11   : > { %400 = vst [vmem:[#allocation2 + $0x118] sm:$0xf] %v5259_v2  ;;  %405 = vst [vmem:[#allocation2 + $0x10] sm:$0xf] %v5259_v2  ;;  %s5352_s25 = scalar_lea.vmem %s9365_s0, %s4623_s22  ;;  %v5405_v51 = vld [vmem:[%s9367_s2] ss:$0 sm:$0xff]  ;;  %s9233_s12 = scalar_lea.vmem %s9376_s11, %s4623_s22 }
  0x12   : > { %407 = vst [vmem:[#allocation2 + $0x30] sm:$0xf] %v5259_v2  ;;  %408 = vst [vmem:[#allocation2 + $0x40] sm:$0xf] %v5259_v2  ;;  %v476_v3 = vld [vmem:[%s5352_s25] sm:$0xff]  ;;  %v477_v4 = vld [vmem:[%s5352_s25 + $0x8] sm:$0xff] }
  0x13   : > { %409 = vst [vmem:[#allocation2 + $0x50] sm:$0xf] %v5259_v2  ;;  %410 = vst [vmem:[#allocation2 + $0x60] sm:$0xf] %v5259_v2  ;;  %v478_v5 = vld [vmem:[%s5352_s25 + $0x10] sm:$0xff]  ;;  %v508_v6 = vpack.c.bf16 %v477_v4, %v476_v3  ;;  %v479_v7 = vld [vmem:[%s5352_s25 + $0x18] sm:$0xff] }
  0x14   : > { %411 = vst [vmem:[#allocation2 + $0x70] sm:$0xf] %v5259_v2  ;;  %412 = vst [vmem:[#allocation2 + $0x80] sm:$0xf] %v5259_v2  ;;  %v480_v8 = vld [vmem:[%s5352_s25 + $0x20] sm:$0xff]  ;;  %v481_v9 = vld [vmem:[%s5352_s25 + $0x28] sm:$0xff]  ;;  %v509_v10 = vpack.c.bf16 %v479_v7, %v478_v5 }
  0x15   : > { %413 = vst [vmem:[#allocation2 + $0x90] sm:$0xf] %v5259_v2  ;;  %414 = vst [vmem:[#allocation2 + $0xa0] sm:$0xf] %v5259_v2  ;;  %v510_v11 = vpack.c.bf16 %v481_v9, %v480_v8  ;;  %4719 = vmatprep.mubr.msk.bf16.mxu1 %vm532_vm1, %v508_v6  ;;  %v482_v12 = vld [vmem:[%s5352_s25 + $0x30] sm:$0xff]  ;;  %v483_v13 = vld [vmem:[%s5352_s25 + $0x38] sm:$0xff] }
  0x16   : > { %415 = vst [vmem:[#allocation2 + $0xb0] sm:$0xf] %v5259_v2  ;;  %416 = vst [vmem:[#allocation2 + $0xc0] sm:$0xf] %v5259_v2  ;;  %4720 = vmatmul.mubr.msk.bf16.vlgmr.msra.gmra.mrb[0].mxu1 %vm532_vm1, %v509_v10  ;;  %v484_v14 = vld [vmem:[%s5352_s25 + $0x40] sm:$0xff]  ;;  %v485_v15 = vld [vmem:[%s5352_s25 + $0x48] sm:$0xff]  ;;  %v511_v16 = vpack.c.bf16 %v483_v13, %v482_v12 }
  0x17   : > { %417 = vst [vmem:[#allocation2 + $0xd0] sm:$0xf] %v5259_v2  ;;  %418 = vst [vmem:[#allocation2 + $0xe0] sm:$0xf] %v5259_v2  ;;  %4723 = vmatprep.mubr.msk.bf16.mxu1 %vm532_vm1, %v510_v11  ;;  %v512_v17 = vpack.c.bf16 %v485_v15, %v484_v14  ;;  %v486_v18 = vld [vmem:[%s5352_s25 + $0x50] sm:$0xff]  ;;  %v487_v19 = vld [vmem:[%s5352_s25 + $0x58] sm:$0xff] }
  0x18   : > { %419 = vst [vmem:[#allocation2 + $0xf0] sm:$0xf] %v5259_v2  ;;  %420 = vst [vmem:[#allocation2 + $0x100] sm:$0xf] %v5259_v2  ;;  %v488_v20 = vld [vmem:[%s5352_s25 + $0x60] sm:$0xff]  ;;  %v489_v21 = vld [vmem:[%s5352_s25 + $0x68] sm:$0xff]  ;;  %v513_v22 = vpack.c.bf16 %v487_v19, %v486_v18 }
  0x19   : > { %404 = vst [vmem:[#allocation2] sm:$0xf] %v5259_v2  ;;  %421 = vst [vmem:[#allocation2 + $0x110] sm:$0xf] %v5259_v2  ;;  %v514_v23 = vpack.c.bf16 %v489_v21, %v488_v20  ;;  %v490_v24 = vld [vmem:[%s5352_s25 + $0x70] sm:$0xff]  ;;  %v491_v25 = vld [vmem:[%s5352_s25 + $0x78] sm:$0xff] }
  0x1a   : > { %v492_v26 = vld [vmem:[%s5352_s25 + $0x80] sm:$0xff]  ;;  %v493_v27 = vld [vmem:[%s5352_s25 + $0x88] sm:$0xff]  ;;  %v515_v28 = vpack.c.bf16 %v491_v25, %v490_v24  ;;  %v494_v30 = vld [vmem:[%s5352_s25 + $0x90] sm:$0xff]  ;;  %9607 = vst [vmem:[#allocation3_spill] sm:$0xff] %v5422_v1  ;;  %v1306_v9 = vsub.s32 1, %v5422_v1  ;;  %v9377_v19 = vsub.s32 0, %v5422_v1 }
  0x1b   : > { %v516_v29 = vpack.c.bf16 %v493_v27, %v492_v26  ;;  %v495_v31 = vld [vmem:[%s5352_s25 + $0x98] sm:$0xff]  ;;  %v496_v32 = vld [vmem:[%s5352_s25 + $0xa0] sm:$0xff]  ;;  %v497_v33 = vld [vmem:[%s5352_s25 + $0xa8] sm:$0xff]  ;;  %vm391_vm4 = vcmask 1040384   ;;  %vm5261_vm5 = vmmov 0   ;;  %vm3547_vm8 = vcmask 1047559  }
  0x1c   : > { %v517_v34 = vpack.c.bf16 %v495_v31, %v494_v30  ;;  %v518_v35 = vpack.c.bf16 %v497_v33, %v496_v32  ;;  %v498_v36 = vld [vmem:[%s5352_s25 + $0xb0] sm:$0xff]  ;;  %v499_v37 = vld [vmem:[%s5352_s25 + $0xb8] sm:$0xff]  ;;  %v500_v38 = vld [vmem:[%s5352_s25 + $0xc0] sm:$0xff]  ;;  %vm392_vm6 = vsmask.f32 256  ;;  %vm3744_vm9 = vcmask 1041408  }
  0x1d   : > { %v501_v39 = vld [vmem:[%s5352_s25 + $0xc8] sm:$0xff]  ;;  %v519_v40 = vpack.c.bf16 %v499_v37, %v498_v36  ;;  %v502_v42 = vld [vmem:[%s5352_s25 + $0xd0] sm:$0xff]  ;;  %v503_v43 = vld [vmem:[%s5352_s25 + $0xd8] sm:$0xff]  ;;  %vm3740_vm10 = vcmask 15360   ;;  %vm3908_vm11 = vsmask.f32 4352 }
  0x1e   : > { %4724 = vmatmul.mubr.msk.bf16.gmra.mrb[4].mxu1 %vm532_vm1, %v511_v16  ;;  %v520_v41 = vpack.c.bf16 %v501_v39, %v500_v38  ;;  %v504_v44 = vld [vmem:[%s5352_s25 + $0xe0] sm:$0xff]  ;;  %v505_v45 = vld [vmem:[%s5352_s25 + $0xe8] sm:$0xff]  ;;  %v521_v46 = vpack.c.bf16 %v503_v43, %v502_v42  ;;  %v506_v48 = vld [vmem:[%s5352_s25 + $0xf0] sm:$0xff]  ;;  %v1551_v38 = vsub.s32 2, %v5422_v1  ;;  %v1924_v39 = vsub.s32 3, %v5422_v1 }
  0x1f   : > { %4727 = vmatprep.mubr.msk.bf16.mxu1 %vm532_vm1, %v512_v17  ;;  %v522_v47 = vpack.c.bf16 %v505_v45, %v504_v44  ;;  %v507_v49 = vld [vmem:[%s5352_s25 + $0xf8] sm:$0xff]  ;;  %v5435_v12 = vld [vmem:[%s9368_s3] sm:$0xff]  ;;  %v2024_v42 = vsub.s32 4, %v5422_v1  ;;  %vm7296_vm7 = vmand %vm391_vm4, %vm392_vm6 }
  0x20   : > { %v523_v50 = vpack.c.bf16 %v507_v49, %v506_v48  ;;  %v1102_v16 = vld [vmem:[#allocation2 + $0x4] sm:$0xff]   ;;  %v1107_v32 = vld [vmem:[#allocation2 + $0x20] sm:$0x8]  ;;  %v5456_v33 = vrot.slane %v5435_v12, %v9377_v19  ;;  %v2268_v49 = vsub.s32 5, %v5422_v1 }
  0x21   : > { %v1150_v26 = vunpack.c.l.bf16 %v1102_v16  ;;  %v1151_v27 = vunpack.c.h.bf16 %v1102_v16  ;;  %v1155_v48 = vunpack.c.l.bf16 %v1107_v32 }
  0x26   : > { %4728 = vmatmul.mubr.msk.bf16.gmra.mrb[8].mxu1 %vm532_vm1, %v513_v22  ;;  %v5448_v22 = vrot.slane %v5435_v12, %v1306_v9 }
  0x27   : > { %4731 = vmatprep.mubr.msk.bf16.mxu1 %vm532_vm1, %v514_v23  ;;  %v1101_v23 = vld [vmem:[#allocation2] sm:$0x8] }
  0x28   : > { %v1308_v44 = vmul.f32 %v5448_v22, %v1150_v26  ;;  %v5467_v45 = vmul.f32 %v5448_v22, %v1151_v27 }
  0x2e   : > { %4732 = vmatmul.mubr.msk.bf16.gmra.mrb[12].mxu1 %vm532_vm1, %v515_v28 }
  0x2f   : > { %4735 = vmatprep.mubr.msk.bf16.mxu1 %vm532_vm1, %v516_v29 }
  0x36   : > { %4736 = vmatmul.mubr.msk.bf16.gmra.mrb[16].mxu1 %vm532_vm1, %v517_v34  ;;  %v1149_v34 = vunpack.c.l.bf16 %v1101_v23  ;;  %v1826_v23 = vld [vmem:[#allocation2 + $0x10] sm:$0x8] }
  0x37   : > { %4739 = vmatprep.mubr.msk.bf16.mxu1 %vm532_vm1, %v518_v35 }
  0x3e   : > { %4740 = vmatmul.mubr.msk.bf16.gmra.mrb[20].mxu1 %vm532_vm1, %v519_v40 }
  0x3f   : > { %4743 = vmatprep.mubr.msk.bf16.mxu1 %vm532_vm1, %v520_v41 }
  0x46   : > { %4744 = vmatmul.mubr.msk.bf16.gmra.mrb[24].mxu1 %vm532_vm1, %v521_v46 }
  0x47   : > { %4747 = vmatprep.mubr.msk.bf16.mxu1 %vm532_vm1, %v522_v47 }
  0x4e   : > { %4748 = vmatmul.mubr.msk.bf16.gmra.mrb[28].mxu1 %vm532_vm1, %v523_v50 }
  0xe9   : > { %v4721_v52 = vpop.f32.mrb[0].mxu1 }
  0xea   : > { %v5408_v53 = vadd.f32 %v4721_v52, %v5405_v51  ;;  %v619_v54 = vpop.f32.mrb[1].mxu1  ;;  %v2641_v52 = vsub.s32 6, %v5422_v1 }
  0xeb   : > { %v5411_v56 = vadd.f32 %v5405_v51, %v619_v54  ;;  %v4722_v57 = vpop.f32.mrb[2].mxu1  ;;  %v1201_v54 = vmul.f32 %v5456_v33, %v1149_v34 }
  0xec   : > { %v748_v58 = vsub.f32 0.0, %v5408_v53  ;;  %v5415_v59 = vadd.f32 %v4722_v57, %v5405_v51  ;;  %v622_v60 = vpop.f32.mrb[3].mxu1  ;;  %v5477_v57 = vld [vmem:[%s9369_s4] ss:$0 sm:$0xff]  ;;  %v5500_v9 = vrot.slane %v5435_v12, %v2641_v52 }
  0xed   : > { %v746_v61 = vsub.f32 0.0, %v5411_v56  ;;  %v5419_v62 = vadd.f32 %v5405_v51, %v622_v60  ;;  %v1202_v60 = vmul.f32 %v5456_v33, %v1150_v26 }
  0xee   : > { %v782_v63 = vmul.f32 1.442695, %v748_v58  ;;  %v749_v0 = vsub.f32 0.0, %v5415_v59  ;;  %v5480_v58 = vrot.slane %v5435_v12, %v1551_v38  ;;  %9609 = vst [vmem:[#allocation5_spill] sm:$0xff] %v5500_v9 }
  0xef   : > { %v778_v2 = vmul.f32 1.442695, %v746_v61  ;;  %v747_v3 = vsub.f32 0.0, %v5419_v62  ;;  %v2741_v61 = vsub.s32 7, %v5422_v1 }
  0xf0   : > { %4884 = vpow2.f32 %v782_v63  ;;  %v784_v4 = vmul.f32 1.442695, %v749_v0  ;;  %v1203_v63 = vmul.f32 %v5456_v33, %v1151_v27  ;;  %v5486_v0 = vmul.f32 %v5456_v33, %v1155_v48 }
  0xf1   : > { %4886 = vpow2.f32 %v778_v2  ;;  %v780_v5 = vmul.f32 1.442695, %v747_v3  ;;  %v4725_v6 = vpop.f32.mrb[4].mxu1  ;;  %v5489_v2 = vrot.slane %v5435_v12, %v1924_v39  ;;  %v5492_v3 = vrot.slane %v5435_v12, %v2024_v42 }
  0xf2   : > { %4888 = vpow2.f32 %v784_v4  ;;  %v5426_v7 = vadd.f32 %v4725_v6, %v5405_v51  ;;  %v635_v8 = vpop.f32.mrb[5].mxu1  ;;  %v5495_v4 = vrot.slane %v5435_v12, %v2268_v49  ;;  %v5512_v32 = vmul.f32 %v5480_v58, %v1151_v27 }
  0xf3   : > { %4890 = vpow2.f32 %v780_v5  ;;  %v5430_v10 = vadd.f32 %v5405_v51, %v635_v8  ;;  %v4726_v11 = vpop.f32.mrb[6].mxu1  ;;  %v1104_v5 = vld [vmem:[#allocation2 + $0x10] sm:$0x8] }
  0xf4   : > { %v752_v13 = vsub.f32 0.0, %v5426_v7  ;;  %v5439_v14 = vadd.f32 %v4726_v11, %v5405_v51  ;;  %v638_v15 = vpop.f32.mrb[7].mxu1  ;;  %9608 = vst [vmem:[#allocation4_spill] sm:$0xff] %v5495_v4  ;;  %v1256_v11 = vadd.f32 %v5477_v57, %v1201_v54  ;;  %9610 = vst [vmem:[#allocation6_spill] sm:$0xff] %v5512_v32 }
  0xf5   : > { %v750_v17 = vsub.f32 0.0, %v5430_v10  ;;  %v5443_v18 = vadd.f32 %v5405_v51, %v638_v15  ;;  %v1374_v15 = vrot.slane %v5467_v45, 1 }
  0xf6   : > { %v790_v20 = vmul.f32 1.442695, %v752_v13  ;;  %v753_v21 = vsub.f32 0.0, %v5439_v14  ;;  %v1373_v13 = vrot.slane %v1308_v44, 1 }
  0xf7   : > { %v786_v24 = vmul.f32 1.442695, %v750_v17  ;;  %v751_v25 = vsub.f32 0.0, %v5443_v18 }
  0xf8   : > { %4892 = vpow2.f32 %v790_v20  ;;  %v792_v28 = vmul.f32 1.442695, %v753_v21  ;;  %v1257_v20 = vadd.f32 %v5477_v57, %v1202_v60  ;;  %v1553_v21 = vmul.f32 %v5480_v58, %v1150_v26  ;;  %v1829_v60 = vld [vmem:[#allocation2 + $0x20] sm:$0x8] }
  0xf9   : > { %4894 = vpow2.f32 %v786_v24  ;;  %v788_v29 = vmul.f32 1.442695, %v751_v25  ;;  %v5451_v30 = vpop.f32.mrb[8].mxu1  ;;  %v1375_v39 = vsel %vm1372_vm2, %v1373_v13, %v1374_v15 }
  0xfa   : > { %v4885_v31 = vpop.eup %4884  ;;  %4896 = vpow2.f32 %v792_v28  ;;  %v5458_v35 = vpop.f32.mrb[9].mxu1  ;;  %v5518_v26 = vadd.f32 %v5451_v30, %v5405_v51  ;;  %v1650_v44 = vrot.slane %v1553_v21, 2 }
  0xfb   : > { %v4887_v36 = vpop.eup %4886  ;;  %v844_v37 = vadd.f32 1.0, %v4885_v31  ;;  %4898 = vpow2.f32 %v788_v29  ;;  %v5462_v40 = vpop.f32.mrb[10].mxu1  ;;  %v1152_v29 = vunpack.c.l.bf16 %v1104_v5  ;;  %v1258_v31 = vadd.f32 %v5477_v57, %v1203_v63 }
  0xfc   : > { %v4889_v41 = vpop.eup %4888  ;;  %v842_v43 = vadd.f32 1.0, %v4887_v36  ;;  %v5469_v46 = vpop.f32.mrb[11].mxu1  ;;  %v756_v63 = vsub.f32 0.0, %v5518_v26  ;;  %v5534_v5 = vadd.f32 %v5462_v40, %v5405_v51 }
  0xfd   : > { %v4891_v47 = vpop.eup %4890  ;;  %4900 = vrcp.f32 %v844_v37  ;;  %v845_v50 = vadd.f32 1.0, %v4889_v41  ;;  %v1874_v41 = vunpack.c.l.bf16 %v1826_v23  ;;  %v1204_v30 = vmul.f32 %v5456_v33, %v1152_v29  ;;  %v2543_v29 = vld [vmem:[#allocation2 + $0x20] sm:$0x8] }
  0xfe   : > { %4902 = vrcp.f32 %v842_v43  ;;  %v843_v55 = vadd.f32 1.0, %v4891_v47  ;;  %v1469_v43 = vadd.f32 %v1373_v13, %v1256_v11  ;;  %v5525_v47 = vadd.f32 %v5405_v51, %v5458_v35 }
  0xff   : > { %4904 = vrcp.f32 %v845_v50  ;;  %v9378_v50 = vrot.slane %v5512_v32, 2  ;;  %v1926_v11 = vmul.f32 %v5489_v2, %v1874_v41  ;;  %v798_v41 = vmul.f32 1.442695, %v756_v63 }
 0x100   : > { %4906 = vrcp.f32 %v843_v55  ;;  %v1470_v55 = vadd.f32 %v1375_v39, %v1257_v20  ;;  %v1778_v23 = vadd.f32 %v1650_v44, %v1469_v43  ;;  %v1110_v39 = vld [vmem:[#allocation2 + $0x30] sm:$0x8]  ;;  %v5570_v43 = vadd.f32 %v1374_v15, %v1258_v31 }
 0x101   : > { %v5497_v6 = vpop.f32.mrb[12].mxu1  ;;  %v1158_v45 = vunpack.c.l.bf16 %v1110_v39 }
 0x102   : > { %v4893_v8 = vpop.eup %4892  ;;  %v5504_v16 = vpop.f32.mrb[13].mxu1  ;;  %9613 = vst [vmem:[#allocation9_spill] sm:$0xff] %v5570_v43 }
 0x103   : > { %v4895_v17 = vpop.eup %4894  ;;  %v848_v24 = vadd.f32 1.0, %v4893_v8  ;;  %v5508_v25 = vpop.f32.mrb[14].mxu1 }
 0x104   : > { %v4897_v28 = vpop.eup %4896  ;;  %v846_v34 = vadd.f32 1.0, %v4895_v17  ;;  %v5514_v36 = vpop.f32.mrb[15].mxu1  ;;  %v1113_v17 = vld [vmem:[#allocation2 + $0x40] sm:$0x8] }
 0x105   : > { %v4899_v37 = vpop.eup %4898  ;;  %4908 = vrcp.f32 %v848_v24  ;;  %v849_v38 = vadd.f32 1.0, %v4897_v28  ;;  %v754_v24 = vsub.f32 0.0, %v5525_v47  ;;  %v5551_v28 = vrot.slane %v5435_v12, %v2741_v61 }
 0x106   : > { %4910 = vrcp.f32 %v846_v34  ;;  %v847_v42 = vadd.f32 1.0, %v4899_v37  ;;  %v5556_v37 = vld [vmem:[#allocation2 + $0x30] sm:$0x8]  ;;  %v5563_v12 = vadd.f32 %v5477_v57, %v5486_v0  ;;  %v5566_v61 = vadd.f32 %v5477_v57, %v1204_v30 }
 0x107   : > { %v4901_v27 = vpop.eup %4900  ;;  %4912 = vrcp.f32 %v849_v38  ;;  %9612 = vst [vmem:[#allocation8_spill] sm:$0xff] %v5551_v28  ;;  %v1880_v15 = vunpack.c.l.bf16 %v5556_v37 }
 0x108   : > { %v4903_v48 = vpop.eup %4902  ;;  %v908_v49 = vmul.f32 %v4901_v27, %v5408_v53  ;;  %4914 = vrcp.f32 %v847_v42  ;;  %v757_v42 = vsub.f32 0.0, %v5534_v5 }
 0x109   : > { %v4905_v52 = vpop.eup %4904  ;;  %v906_v54 = vmul.f32 %v4903_v48, %v5411_v56  ;;  %v5536_v35 = vpop.f32.mrb[16].mxu1  ;;  %v5542_v56 = vadd.f32 %v5405_v51, %v5469_v46  ;;  %v1877_v46 = vunpack.c.l.bf16 %v1829_v60  ;;  %v794_v60 = vmul.f32 1.442695, %v754_v24 }
 0x10a   : > { %v4907_v8 = vpop.eup %4906  ;;  %v4627_v53 = vpack.c.bf16 %v908_v49, %v908_v49  ;;  %v909_v13 = vmul.f32 %v4905_v52, %v5415_v59  ;;  %v5544_v20 = vpop.f32.mrb[17].mxu1  ;;  %v1652_v59 = vsel %vm1649_vm3, %v1650_v44, %v9378_v50  ;;  %v5575_v52 = vadd.f32 %v1926_v11, %v1778_v23 }
 0x10b   : > { %9611 = vst [vmem:[#allocation7_spill] sm:$0xff] %v5542_v56  ;;  %v4625_v21 = vpack.c.bf16 %v906_v54, %v906_v54  ;;  %v907_v40 = vmul.f32 %v4907_v8, %v5419_v62  ;;  %v1161_v62 = vunpack.c.l.bf16 %v1113_v17  ;;  %v5559_v27 = vpop.f32.mrb[18].mxu1  ;;  %v755_v44 = vsub.f32 0.0, %v5542_v56 }
 0x10c   : > { %1069 = vst [vmem:[#allocation2 + $0x24] sm:$0xf] %v4627_v53  ;;  %v4628_v34 = vpack.c.bf16 %v909_v13, %v909_v13  ;;  %v5573_v49 = vadd.f32 %v1652_v59, %v1470_v55  ;;  %v2591_v54 = vunpack.c.l.bf16 %v2543_v29  ;;  %v5578_v63 = vmul.f32 %v5489_v2, %v1877_v46  ;;  %v1119_v53 = vld [vmem:[#allocation2 + $0x60] sm:$0x8]  ;;  %v1116_v46 = vld [vmem:[#allocation2 + $0x50] sm:$0x8] }
 0x10d   : > { %1067 = vst [vmem:[#allocation2 + $0x14] sm:$0xf] %v4625_v21  ;;  %v4626_v38 = vpack.c.bf16 %v907_v40, %v907_v40  ;;  %v1213_v8 = vmul.f32 %v5456_v33, %v1161_v62  ;;  %4916 = vpow2.f32 %v798_v41  ;;  %v800_v11 = vmul.f32 1.442695, %v757_v42  ;;  %v1835_v21 = vld [vmem:[#allocation2 + $0x40] sm:$0x8] }
 0x10e   : > { %1070 = vst [vmem:[#allocation2 + $0x28] sm:$0xf] %v4628_v34  ;;  %v796_v40 = vmul.f32 1.442695, %v755_v44  ;;  %4918 = vpow2.f32 %v794_v60  ;;  %v5595_v29 = vmul.f32 %v5500_v9, %v2591_v54  ;;  %v2546_v34 = vld [vmem:[#allocation2 + $0x30] sm:$0x8]  ;;  %v5600_v41 = vadd.f32 %v5508_v25, %v5405_v51 }
 0x10f   : > { %v4909_v48 = vpop.eup %4908  ;;  %1068 = vst [vmem:[#allocation2 + $0x18] sm:$0xf] %v4626_v38  ;;  %v1167_v38 = vunpack.c.l.bf16 %v1119_v53  ;;  %v2549_v62 = vld [vmem:[#allocation2 + $0x40] sm:$0x8]  ;;  %4920 = vpow2.f32 %v800_v11  ;;  %v1164_v42 = vunpack.c.l.bf16 %v1116_v46  ;;  %v5605_v54 = vadd.f32 %v5405_v51, %v5514_v36  ;;  %v2552_v36 = vld [vmem:[#allocation2 + $0x50] sm:$0x8] }
 0x110   : > { %v4911_v0 = vpop.eup %4910  ;;  %v912_v30 = vmul.f32 %v4909_v48, %v5426_v7  ;;  %v5587_v7 = vadd.f32 %v5497_v6, %v5405_v51  ;;  %v1883_v6 = vunpack.c.l.bf16 %v1835_v21  ;;  %9616 = vst [vmem:[#allocation12_spill] sm:$0xff] %v5600_v41  ;;  %4922 = vpow2.f32 %v796_v40  ;;  %v1125_v48 = vld [vmem:[#allocation2 + $0x80] sm:$0x8] }
 0x111   : > { %v4913_v31 = vpop.eup %4912  ;;  %v910_v55 = vmul.f32 %v4911_v0, %v5430_v10  ;;  %v5592_v10 = vadd.f32 %v5405_v51, %v5504_v16  ;;  %9617 = vst [vmem:[#allocation13_spill] sm:$0xff] %v5605_v54  ;;  %v5608_v60 = vadd.f32 %v5477_v57, %v1213_v8  ;;  %v5611_v0 = vmul.f32 %v5489_v2, %v1880_v15  ;;  %v1841_v25 = vld [vmem:[#allocation2 + $0x60] sm:$0x8] }
 0x112   : > { %v4915_v13 = vpop.eup %4914  ;;  %v4631_v17 = vpack.c.bf16 %v912_v30, %v912_v30  ;;  %v913_v23 = vmul.f32 %v4913_v31, %v5439_v14  ;;  %9614 = vst [vmem:[#allocation10_spill] sm:$0xff] %v5587_v7  ;;  %v1210_v14 = vmul.f32 %v5456_v33, %v1158_v45  ;;  %v760_v44 = vsub.f32 0.0, %v5587_v7 }
 0x113   : > { %v4629_v24 = vpack.c.bf16 %v910_v55, %v910_v55  ;;  %v911_v59 = vmul.f32 %v4915_v13, %v5443_v18  ;;  %9615 = vst [vmem:[#allocation11_spill] sm:$0xff] %v5592_v10  ;;  %v1838_v18 = vld [vmem:[#allocation2 + $0x50] sm:$0x8]  ;;  %v2594_v30 = vunpack.c.l.bf16 %v2546_v34  ;;  %v758_v45 = vsub.f32 0.0, %v5592_v10  ;;  %v2555_v13 = vld [vmem:[#allocation2 + $0x60] sm:$0x8] }
 0x114   : > { %1073 = vst [vmem:[#allocation2 + $0x44] sm:$0xf] %v4631_v17  ;;  %v4632_v37 = vpack.c.bf16 %v913_v23, %v913_v23  ;;  %v1827_v16 = vld [vmem:[#allocation2 + $0x14] sm:$0xf]  ;;  %v5615_v31 = vadd.f32 %v5477_v57, %v1210_v14  ;;  %v2597_v55 = vunpack.c.l.bf16 %v2549_v62  ;;  %v1219_v53 = vmul.f32 %v5456_v33, %v1167_v38  ;;  %v1108_v19 = vld [vmem:[#allocation2 + $0x24] sm:$0xf] }
 0x115   : > { %1071 = vst [vmem:[#allocation2 + $0x34] sm:$0xf] %v4629_v24  ;;  %v4630_v39 = vpack.c.bf16 %v911_v59, %v911_v59  ;;  %v1886_v11 = vunpack.c.l.bf16 %v1838_v18  ;;  %v5618_v17 = vunpack.c.l.bf16 %v1827_v16  ;;  %v5621_v8 = vmul.f32 %v5489_v2, %v1883_v6 }
 0x116   : > { %1074 = vst [vmem:[#allocation2 + $0x48] sm:$0xf] %v4632_v37  ;;  %v1173_v15 = vunpack.c.l.bf16 %v1125_v48  ;;  %v761_v21 = vsub.f32 0.0, %v5600_v41  ;;  %v1216_v23 = vmul.f32 %v5456_v33, %v1164_v42  ;;  %v1889_v40 = vunpack.c.l.bf16 %v1841_v25  ;;  %v1122_v48 = vld [vmem:[#allocation2 + $0x70] sm:$0x8] }
 0x117   : > { %1072 = vst [vmem:[#allocation2 + $0x38] sm:$0xf] %v4630_v39  ;;  %9618 = vst [vmem:[#allocation14_spill] sm:$0xff] %v5621_v8  ;;  %v806_v24 = vmul.f32 1.442695, %v760_v44  ;;  %v759_v59 = vsub.f32 0.0, %v5605_v54  ;;  %v4917_v46 = vpop.eup %4916  ;;  %v5627_v14 = vmul.f32 %v5500_v9, %v2594_v30  ;;  %v2600_v34 = vunpack.c.l.bf16 %v2552_v36 }
 0x118   : > { %v2603_v37 = vunpack.c.l.bf16 %v2555_v13  ;;  %v802_v38 = vmul.f32 1.442695, %v758_v45  ;;  %v5630_v62 = vmul.f32 %v5500_v9, %v2597_v55  ;;  %v5633_v6 = vadd.f32 %v5477_v57, %v1219_v53  ;;  %v4919_v16 = vpop.eup %4918  ;;  %v1828_v43 = vld [vmem:[#allocation2 + $0x18] sm:$0xf] }
 0x119   : > { %v5636_v39 = vmul.f32 %v5489_v2, %v1886_v11  ;;  %v5640_v18 = vadd.f32 %v5536_v35, %v5405_v51  ;;  %v5644_v42 = vmul.f32 %v5492_v3, %v5618_v17  ;;  %v1225_v44 = vmul.f32 %v5456_v33, %v1173_v15  ;;  %v4921_v53 = vpop.eup %4920  ;;  %v1105_v11 = vld [vmem:[#allocation2 + $0x14] sm:$0xf] }
 0x11a   : > { %9619 = vst [vmem:[#allocation15_spill] sm:$0xff] %v5633_v6  ;;  %v808_v30 = vmul.f32 1.442695, %v761_v21  ;;  %v5649_v25 = vadd.f32 %v5405_v51, %v5544_v20  ;;  %v5652_v45 = vadd.f32 %v5477_v57, %v1216_v23  ;;  %v5655_v55 = vmul.f32 %v5489_v2, %v1889_v40  ;;  %v1844_v20 = vld [vmem:[#allocation2 + $0x70] sm:$0x8]  ;;  %v5663_v21 = vpop.f32.mrb[19].mxu1  ;;  %v4923_v23 = vpop.eup %4922 }
 0x11b   : > { %9620 = vst [vmem:[#allocation16_spill] sm:$0xff] %v5636_v39  ;;  %9621 = vst [vmem:[#allocation17_spill] sm:$0xff] %v5640_v18  ;;  %4924 = vpow2.f32 %v806_v24  ;;  %v804_v35 = vmul.f32 1.442695, %v759_v59  ;;  %v852_v36 = vadd.f32 1.0, %v4917_v46  ;;  %v5658_v13 = vmul.f32 %v5500_v9, %v2600_v34  ;;  %v5797_v39 = vpop.f32.mrb[20].mxu1 }
 0x11c   : > { %9622 = vst [vmem:[#allocation18_spill] sm:$0xff] %v5649_v25  ;;  %9623 = vst [vmem:[#allocation19_spill] sm:$0xff] %v5652_v45  ;;  %v5661_v15 = vmul.f32 %v5500_v9, %v2603_v37  ;;  %4926 = vpow2.f32 %v802_v38  ;;  %v850_v50 = vadd.f32 1.0, %v4919_v16  ;;  %v1170_v40 = vunpack.c.l.bf16 %v1122_v48  ;;  %v1830_v38 = vld [vmem:[#allocation2 + $0x24] sm:$0xf] }
 0x11d   : > { %9624 = vst [vmem:[#allocation20_spill] sm:$0xff] %v5655_v55  ;;  %9625 = vst [vmem:[#allocation21_spill] sm:$0xff] %v5658_v13  ;;  %v764_v24 = vsub.f32 0.0, %v5640_v18  ;;  %v5668_v59 = vadd.f32 %v5559_v27, %v5405_v51  ;;  %v5672_v34 = vadd.f32 %v5477_v57, %v1225_v44  ;;  %4928 = vpow2.f32 %v808_v30  ;;  %v2544_v18 = vld [vmem:[#allocation2 + $0x24] sm:$0xf] }
 0x11e   : > { %9626 = vst [vmem:[#allocation22_spill] sm:$0xff] %v5661_v15  ;;  %9627 = vst [vmem:[#allocation23_spill] sm:$0xff] %v5663_v21  ;;  %v762_v37 = vsub.f32 0.0, %v5649_v25  ;;  %v5675_v1 = vunpack.c.l.bf16 %v1105_v11  ;;  %v853_v16 = vadd.f32 1.0, %v4921_v53  ;;  %v1892_v48 = vunpack.c.l.bf16 %v1844_v20  ;;  %v1833_v55 = vld [vmem:[#allocation2 + $0x34] sm:$0xf] }
 0x11f   : > { %9628 = vst [vmem:[#allocation24_spill] sm:$0xff] %v5668_v59  ;;  %9629 = vst [vmem:[#allocation25_spill] sm:$0xff] %v5672_v34  ;;  %4930 = vpow2.f32 %v804_v35  ;;  %v1156_v32 = vunpack.c.l.bf16 %v1108_v19  ;;  %v5679_v51 = vmul.f32 %v5495_v4, %v5618_v17  ;;  %v851_v27 = vadd.f32 1.0, %v4923_v23  ;;  %v1831_v34 = vld [vmem:[#allocation2 + $0x28] sm:$0xf] }
 0x120   : > { %4932 = vrcp.f32 %v852_v36  ;;  %v1222_v44 = vmul.f32 %v5456_v33, %v1170_v40  ;;  %v814_v30 = vmul.f32 1.442695, %v764_v24  ;;  %v765_v46 = vsub.f32 0.0, %v5668_v59  ;;  %9648 = vst [vmem:[#allocation38_spill] sm:$0xff] %v5797_v39 }
 0x121   : > { %4934 = vrcp.f32 %v850_v50  ;;  %v1878_v11 = vunpack.c.l.bf16 %v1830_v38  ;;  %v9630_v53 = vrot.slane %v5644_v42, 1  ;;  %v5686_v35 = vunpack.c.l.bf16 %v1828_v43  ;;  %v5700_v43 = vld [vmem:[#allocation2 + $0x80] sm:$0x8] }
 0x122   : > { %v810_v19 = vmul.f32 1.442695, %v762_v37  ;;  %v2592_v25 = vunpack.c.l.bf16 %v2544_v18  ;;  %v5690_v21 = vmul.f32 %v5448_v22, %v5675_v1  ;;  %4936 = vrcp.f32 %v853_v16  ;;  %9632 = vst [vmem:[#allocation27_spill] sm:$0xff] %v5700_v43  ;;  %v5717_v16 = vld [vmem:[%s9368_s3 + $0x8] ss:$0 sm:$0xff] }
 0x123   : > { %v2186_v20 = vadd.f32 %v9630_v53, %v5575_v52  ;;  %v5693_v50 = vmul.f32 %v5489_v2, %v1892_v48  ;;  %v1208_v36 = vmul.f32 %v5456_v33, %v1156_v32  ;;  %v5697_v23 = vmul.f32 %v5448_v22, %v1156_v32 }
 0x124   : > { %v9384_v40 = vrot.slane %v5679_v51, 2  ;;  %4938 = vrcp.f32 %v851_v27  ;;  %v5705_v18 = vmul.f32 %v5480_v58, %v1156_v32  ;;  %v5708_v24 = vadd.f32 %v5477_v57, %v1222_v44  ;;  %v1109_v27 = vld [vmem:[#allocation2 + $0x28] sm:$0xf] }
 0x125   : > { %9631 = vst [vmem:[#allocation26_spill] sm:$0xff] %v5693_v50  ;;  %v5702_v52 = vpop.eup %4924  ;;  %4940 = vpow2.f32 %v814_v30  ;;  %v5710_v37 = vmul.f32 1.442695, %v765_v46  ;;  %v5720_v48 = vmul.f32 %v5492_v3, %v1878_v11  ;;  %v5726_v44 = vmul.f32 %v5492_v3, %v5686_v35 }
 0x126   : > { %9633 = vst [vmem:[#allocation28_spill] sm:$0xff] %v5702_v52  ;;  %9634 = vst [vmem:[#allocation29_spill] sm:$0xff] %v5708_v24  ;;  %v5712_v38 = vpop.eup %4926  ;;  %v2494_v32 = vadd.f32 %v9384_v40, %v2186_v20  ;;  %4942 = vpow2.f32 %v810_v19  ;;  %v5729_v46 = vmul.f32 %v5495_v4, %v1878_v11  ;;  %v5732_v30 = vmul.f32 %v5551_v28, %v2592_v25  ;;  %v1106_v40 = vld [vmem:[#allocation2 + $0x18] sm:$0xf] }
 0x127   : > { %9635 = vst [vmem:[#allocation30_spill] sm:$0xff] %v5710_v37  ;;  %9636 = vst [vmem:[#allocation31_spill] sm:$0xff] %v5712_v38  ;;  %v5736_v24 = vpop.eup %4928  ;;  %v5739_v20 = vadd.f32 %v5477_v57, %v1208_v36  ;;  %v5743_v37 = vmul.f32 %v5489_v2, %v1878_v11  ;;  %v5746_v19 = vmul.f32 %v5500_v9, %v2592_v25  ;;  %v1157_v54 = vunpack.c.l.bf16 %v1109_v27 }
 0x128   : > { %9637 = vst [vmem:[#allocation32_spill] sm:$0xff] %v5726_v44  ;;  %9638 = vst [vmem:[#allocation33_spill] sm:$0xff] %v5736_v24  ;;  %v5752_v59 = vmul.f32 %v5717_v16, %v2592_v25  ;;  %v5756_v36 = vmul.f32 %v5480_v58, %v5675_v1  ;;  %v1927_v10 = vmul.f32 %v5489_v2, %v5618_v17  ;;  %v2545_v24 = vld [vmem:[#allocation2 + $0x28] sm:$0xf]  ;;  %v9640_v27 = vrot.slane %v5690_v21, 1 }
 0x129   : > { %v5748_v50 = vpop.eup %4930  ;;  %v1879_v6 = vunpack.c.l.bf16 %v1831_v34  ;;  %v9641_v11 = vrot.slane %v5697_v23, 1  ;;  %v5779_v53 = vmul.f32 %v5495_v4, %v5686_v35  ;;  %v1313_v34 = vmul.f32 %v5448_v22, %v1157_v54 }
 0x12a   : > { %9639 = vst [vmem:[#allocation34_spill] sm:$0xff] %v5748_v50  ;;  %v5758_v41 = vpop.eup %4932  ;;  %v2691_v50 = vadd.f32 %v5595_v29, %v2494_v32  ;;  %v1472_v45 = vadd.f32 %v9640_v27, %v5566_v61  ;;  %v1205_v29 = vmul.f32 %v5456_v33, %v5675_v1  ;;  %v1154_v32 = vunpack.c.l.bf16 %v1106_v40 }
 0x12b   : > { %v5765_v25 = vpop.eup %4934  ;;  %v1475_v17 = vadd.f32 %v9641_v11, %v5563_v12  ;;  %9642 = vst [vmem:[#allocation35_spill] sm:$0xff] %v5779_v53  ;;  %v2593_v27 = vunpack.c.l.bf16 %v2545_v24  ;;  %v1975_v12 = vadd.f32 %v1927_v10, %v5573_v49  ;;  %v9645_v1 = vrot.slane %v5732_v30, 1 }
 0x12c   : > { %v5781_v7 = vpop.eup %4936  ;;  %v1209_v11 = vmul.f32 %v5456_v33, %v1157_v54  ;;  %v9646_v43 = vrot.slane %v5726_v44, 1  ;;  %v9647_v13 = vrot.slane %v5644_v42, 1  ;;  %v9650_v24 = vrot.slane %v5756_v36, 2 }
 0x12d   : > { %9643 = vst [vmem:[#allocation36_spill] sm:$0xff] %v5781_v7  ;;  %v2903_v40 = vadd.f32 %v9645_v1, %v2691_v50  ;;  %v5804_v49 = vmul.f32 %v5480_v58, %v1157_v54  ;;  %v5807_v10 = vmul.f32 %v5492_v3, %v1879_v6  ;;  %v1114_v50 = vld [vmem:[#allocation2 + $0x44] sm:$0xf]  ;;  %v5809_v1 = vunpack.c.l.bf16 %v1833_v55 }
 0x12e   : > { %v5786_v15 = vpop.eup %4938  ;;  %v2092_v38 = vsel %vm1372_vm2, %v9647_v13, %v9646_v43  ;;  %v1781_v52 = vadd.f32 %v9650_v24, %v1472_v45  ;;  %v1260_v42 = vadd.f32 %v5477_v57, %v1205_v29  ;;  %v5815_v13 = vmul.f32 %v5495_v4, %v1879_v6  ;;  %v5835_v45 = vpop.f32.mrb[21].mxu1  ;;  %v1836_v7 = vld [vmem:[#allocation2 + $0x44] sm:$0xf] }
 0x12f   : > { %9644 = vst [vmem:[#allocation37_spill] sm:$0xff] %v5786_v15  ;;  %v5799_v61 = vpop.eup %4940  ;;  %9651 = vst [vmem:[#allocation40_spill] sm:$0xff] %v5804_v49  ;;  %v1311_v43 = vmul.f32 %v5448_v22, %v1154_v32  ;;  %v9655_v54 = vrot.slane %v5705_v18, 2  ;;  %v1380_v39 = vrot.slane %v1313_v34, 1  ;;  %v2187_v55 = vadd.f32 %v2092_v38, %v1975_v12 }
 0x130   : > { %9649 = vst [vmem:[#allocation39_spill] sm:$0xff] %v5799_v61  ;;  %9652 = vst [vmem:[#allocation41_spill] sm:$0xff] %v5807_v10  ;;  %v5811_v44 = vpop.eup %4942  ;;  %v5822_v61 = vmul.f32 %v5551_v28, %v2593_v27  ;;  %v9657_v8 = vrot.slane %v5752_v59, 2  ;;  %v5829_v29 = vmul.f32 %v5489_v2, %v1879_v6  ;;  %v1162_v15 = vunpack.c.l.bf16 %v1114_v50 }
 0x131   : > { %9653 = vst [vmem:[#allocation42_spill] sm:$0xff] %v5811_v44  ;;  %9654 = vst [vmem:[#allocation43_spill] sm:$0xff] %v5815_v13  ;;  %v1784_v24 = vadd.f32 %v9655_v54, %v1475_v17  ;;  %v5833_v56 = vmul.f32 %v5492_v3, %v5809_v1  ;;  %v1977_v17 = vadd.f32 %v5578_v63, %v1781_v52  ;;  %v9662_v50 = vrot.slane %v5779_v53, 2 }
 0x132   : > { %9656 = vst [vmem:[#allocation44_spill] sm:$0xff] %v5822_v61  ;;  %v5826_v44 = vadd.f32 %v9657_v8, %v2903_v40  ;;  %9659 = vst [vmem:[#allocation46_spill] sm:$0xff] %v5829_v29  ;;  %v1264_v34 = vadd.f32 %v5477_v57, %v1209_v11  ;;  %v5843_v6 = vmul.f32 %v5717_v16, %v2593_v27  ;;  %v1377_v40 = vrot.slane %v1311_v43, 1 }
 0x133   : > { %9660 = vst [vmem:[#allocation47_spill] sm:$0xff] %v5835_v45  ;;  %v9663_v54 = vrot.slane %v5679_v51, 2  ;;  %v9664_v63 = vrot.slane %v5697_v23, 1  ;;  %v1206_v38 = vmul.f32 %v5456_v33, %v1154_v32  ;;  %v5857_v45 = vmul.f32 %v5480_v58, %v1154_v32 }
 0x134   : > { %9658 = vst [vmem:[#allocation45_spill] sm:$0xff] %v5826_v44  ;;  %9661 = vst [vmem:[#allocation48_spill] sm:$0xff] %v5843_v6  ;;  %v3259_v8 = vsub.f32 0.0, %v5826_v44  ;;  %v5860_v43 = vmul.f32 %v5448_v22, %v1162_v15  ;;  %v9666_v23 = vrot.slane %v5720_v48, 1  ;;  %v9668_v11 = vrot.slane %v5807_v10, 1  ;;  %v5886_v48 = vpop.f32.mrb[22].mxu1 }
 0x135   : > { %v2368_v29 = vsel %vm1649_vm3, %v9663_v54, %v9662_v50  ;;  %v1381_v52 = vsel %vm1372_vm2, %v9664_v63, %v1380_v39  ;;  %9665 = vst [vmem:[#allocation49_spill] sm:$0xff] %v5857_v45  ;;  %v2547_v50 = vld [vmem:[#allocation2 + $0x34] sm:$0xf]  ;;  %v5865_v63 = vadd.f32 %v1380_v39, %v1264_v34  ;;  %v5875_v32 = vmul.f32 %v5500_v9, %v2593_v27 }
 0x136   : > { %v2495_v12 = vadd.f32 %v2368_v29, %v2187_v55  ;;  %v2189_v54 = vadd.f32 %v9666_v23, %v1977_v17  ;;  %v9669_v55 = vmov %v9666_v23  ;;  %v9671_v51 = vrot.slane %v5690_v21, 1 }
 0x137   : > { %9667 = vst [vmem:[#allocation50_spill] sm:$0xff] %v5865_v63  ;;  %v5872_v29 = vsel %vm1372_vm2, %v9669_v55, %v9668_v11  ;;  %9670 = vst [vmem:[#allocation51_spill] sm:$0xff] %v5875_v32  ;;  %v1980_v39 = vadd.f32 %v5611_v0, %v1784_v24  ;;  %v5884_v17 = vmul.f32 %v5495_v4, %v5809_v1  ;;  %v9672_v34 = vrot.slane %v5822_v61, 1 }
 0x138   : > { %v1378_v53 = vsel %vm1372_vm2, %v9671_v51, %v1377_v40  ;;  %v9673_v27 = vrot.slane %v5732_v30, 1  ;;  %v1261_v23 = vadd.f32 %v5477_v57, %v1206_v38  ;;  %v2692_v21 = vadd.f32 %v5746_v19, %v2495_v12  ;;  %v2550_v51 = vld [vmem:[#allocation2 + $0x44] sm:$0xf] }
 0x139   : > { %v5895_v55 = vunpack.c.l.bf16 %v2547_v50  ;;  %v3307_v0 = vmul.f32 1.442695, %v3259_v8  ;;  %v9396_v24 = vrot.slane %v5857_v45, 2  ;;  %v9674_v32 = vrot.slane %v5833_v56, 1 }
 0x13a   : > { %v2809_v11 = vsel %vm1372_vm2, %v9673_v27, %v9672_v34  ;;  %v1473_v61 = vadd.f32 %v1378_v53, %v1260_v42  ;;  %v5903_v30 = vmul.f32 %v5489_v2, %v5686_v35  ;;  %v1884_v34 = vunpack.c.l.bf16 %v1836_v7  ;;  %v1111_v27 = vld [vmem:[#allocation2 + $0x34] sm:$0xf] }
 0x13b   : > { %v2192_v10 = vadd.f32 %v9674_v32, %v1980_v39  ;;  %v9676_v38 = vrot.slane %v5729_v46, 2  ;;  %v1214_v12 = vmul.f32 %v5456_v33, %v1162_v15  ;;  %v5909_v8 = vmul.f32 %v5480_v58, %v1162_v15 }
 0x13c   : > { %9675 = vst [vmem:[#allocation52_spill] sm:$0xff] %v5903_v30  ;;  %v2598_v50 = vunpack.c.l.bf16 %v2550_v51  ;;  %v9398_v44 = vrot.slane %v5884_v17, 2  ;;  %v9677_v32 = vrot.slane %v5843_v6, 2  ;;  %v9678_v53 = vrot.slane %v5752_v59, 2  ;;  %v2551_v30 = vld [vmem:[#allocation2 + $0x48] sm:$0xf] }
 0x13d   : > { %v2497_v19 = vadd.f32 %v9676_v38, %v2189_v54  ;;  %v5917_v42 = vadd.f32 %v1377_v40, %v1261_v23  ;;  %v2904_v7 = vadd.f32 %v2809_v11, %v2692_v21  ;;  %v5921_v54 = vmul.f32 %v5551_v28, %v5895_v55 }
 0x13e   : > { %v3085_v35 = vsel %vm1649_vm3, %v9678_v53, %v9677_v32  ;;  %4944 = vpow2.f32 %v3307_v0  ;;  %v9680_v15 = vrot.slane %v5756_v36, 2  ;;  %v9681_v51 = vrot.slane %v5860_v43, 1 }
 0x13f   : > { %9679 = vst [vmem:[#allocation53_spill] sm:$0xff] %v5917_v42  ;;  %v2500_v40 = vadd.f32 %v9398_v44, %v2192_v10  ;;  %v5934_v11 = vmul.f32 %v5492_v3, %v1884_v34  ;;  %v5937_v23 = vmul.f32 %v5495_v4, %v1884_v34  ;;  %v1159_v21 = vunpack.c.l.bf16 %v1111_v27 }
 0x140   : > { %v1657_v39 = vsel %vm1649_vm3, %v9680_v15, %v9396_v24  ;;  %v1481_v59 = vadd.f32 %v9681_v51, %v5608_v60  ;;  %v2694_v0 = vadd.f32 %v5627_v14, %v2497_v19  ;;  %v5941_v36 = vadd.f32 %v5477_v57, %v1214_v12 }
 0x141   : > { %v1782_v38 = vadd.f32 %v1657_v39, %v1473_v61  ;;  %v9397_v32 = vrot.slane %v5909_v8, 2  ;;  %v5945_v60 = vmul.f32 %v5551_v28, %v2598_v50  ;;  %v5947_v53 = vadd.f32 %v3085_v35, %v2904_v7  ;;  %v1834_v7 = vld [vmem:[#allocation2 + $0x38] sm:$0xf] }
 0x142   : > { %v5950_v10 = vmul.f32 %v5489_v2, %v1884_v34  ;;  %v9399_v15 = vrot.slane %v5921_v54, 1  ;;  %v5955_v27 = vmul.f32 %v5717_v16, %v5895_v55  ;;  %v1476_v61 = vadd.f32 %v1381_v52, %v5739_v20  ;;  %v1112_v20 = vld [vmem:[#allocation2 + $0x38] sm:$0xf] }
 0x143   : > { %9682 = vst [vmem:[#allocation54_spill] sm:$0xff] %v5947_v53  ;;  %v5959_v14 = vadd.f32 %v9397_v32, %v1481_v59  ;;  %v9683_v19 = vrot.slane %v5804_v49, 2  ;;  %v9684_v12 = vrot.slane %v5705_v18, 2  ;;  %v2697_v34 = vadd.f32 %v5630_v62, %v2500_v40 }
 0x144   : > { %v5971_v24 = vmul.f32 %v5448_v22, %v1159_v21  ;;  %v2906_v59 = vadd.f32 %v9399_v15, %v2694_v0  ;;  %v9401_v52 = vrot.slane %v5945_v60, 1  ;;  %v5977_v18 = vmul.f32 %v5717_v16, %v2598_v50  ;;  %v2548_v0 = vld [vmem:[#allocation2 + $0x38] sm:$0xf] }
 0x145   : > { %v1662_v35 = vsel %vm1649_vm3, %v9684_v12, %v9683_v19  ;;  %v1211_v19 = vmul.f32 %v5456_v33, %v1159_v21  ;;  %v1978_v62 = vadd.f32 %v5743_v37, %v1782_v38  ;;  %v3260_v40 = vsub.f32 0.0, %v5947_v53 }
 0x146   : > { %v5983_v12 = vmul.f32 %v5480_v58, %v1159_v21  ;;  %v9402_v32 = vrot.slane %v5955_v27, 2  ;;  %v5986_v51 = vunpack.c.l.bf16 %v1834_v7  ;;  %v1785_v39 = vadd.f32 %v1662_v35, %v1476_v61 }
 0x147   : > { %v2909_v44 = vadd.f32 %v9401_v52, %v2697_v34  ;;  %v5990_v15 = vunpack.c.l.bf16 %v1112_v20  ;;  %v916_v6 = vmul.f32 %v5758_v41, %v5518_v26  ;;  %v1382_v37 = vrot.slane %v5971_v24, 1  ;;  %v6010_v24 = vpop.f32.mrb[23].mxu1  ;;  %v1115_v20 = vld [vmem:[#allocation2 + $0x48] sm:$0xf] }
 0x148   : > { %v1933_v21 = vmul.f32 %v5489_v2, %v5809_v1  ;;  %v5999_v38 = vadd.f32 %v9402_v32, %v2906_v59  ;;  %v914_v61 = vmul.f32 %v5765_v25, %v5525_v47  ;;  %v4945_v35 = vpop.eup %4944  ;;  %v6004_v34 = vmul.f32 %v5500_v9, %v2598_v50  ;;  %9685 = vst [vmem:[#allocation55_spill] sm:$0xff] %v6010_v24  ;;  %v1837_v50 = vld [vmem:[#allocation2 + $0x48] sm:$0xf] }
 0x149   : > { %v9403_v7 = vrot.slane %v5977_v18, 2  ;;  %v2190_v26 = vadd.f32 %v5872_v29, %v1978_v62  ;;  %v6008_v41 = vunpack.c.l.bf16 %v2548_v0  ;;  %v3309_v1 = vmul.f32 1.442695, %v3260_v40 }
 0x14a   : > { %v6014_v59 = vmul.f32 %v5492_v3, %v5986_v51  ;;  %v4635_v52 = vpack.c.bf16 %v916_v6, %v916_v6  ;;  %v4633_v47 = vpack.c.bf16 %v914_v61, %v914_v61  ;;  %v1266_v25 = vadd.f32 %v5477_v57, %v1211_v19 }
 0x14b   : > { %v6020_v32 = vadd.f32 %v9403_v7, %v2909_v44  ;;  %v6024_v29 = vmul.f32 %v5448_v22, %v5990_v15  ;;  %v1478_v62 = vadd.f32 %v1382_v37, %v5615_v31  ;;  %v1981_v40 = vadd.f32 %v1933_v21, %v1785_v39  ;;  %v9691_v39 = vld [vmem:[#allocation36_spill] sm:$0xff] }
 0x14c   : > { %9686 = vst [vmem:[#allocation56_spill] sm:$0xff] %v6014_v59  ;;  %v9688_v0 = vrot.slane %v5815_v13, 2  ;;  %v9689_v6 = vrot.slane %v5729_v46, 2  ;;  %v3262_v19 = vsub.f32 0.0, %v5999_v38  ;;  %1077 = vst [vmem:[#allocation2 + $0x64] sm:$0xf] %v4635_v52  ;;  %v1163_v53 = vunpack.c.l.bf16 %v1115_v20 }
 0x14d   : > { %9687 = vst [vmem:[#allocation57_spill] sm:$0xff] %v6020_v32  ;;  %1075 = vst [vmem:[#allocation2 + $0x54] sm:$0xf] %v4633_v47  ;;  %v3403_v44 = vadd.f32 1.0, %v4945_v35  ;;  %v6035_v63 = vmul.f32 %v5551_v28, %v6008_v41  ;;  %4946 = vpow2.f32 %v3309_v1  ;;  %v2647_v31 = vmul.f32 %v5500_v9, %v5895_v55  ;;  %v9693_v20 = vld [vmem:[#allocation37_spill] sm:$0xff] }
 0x14e   : > { %v2373_v61 = vsel %vm1649_vm3, %v9689_v6, %v9688_v0  ;;  %v917_v21 = vmul.f32 %v9691_v39, %v5534_v5  ;;  %v3265_v52 = vsub.f32 0.0, %v6020_v32  ;;  %v1885_v47 = vunpack.c.l.bf16 %v1837_v50 }
 0x14f   : > { %v2498_v7 = vadd.f32 %v2373_v61, %v2190_v26  ;;  %9690 = vst [vmem:[#allocation58_spill] sm:$0xff] %v6035_v63  ;;  %v9692_v26 = vld [vmem:[#allocation7_spill] sm:$0xff]  ;;  %v3313_v6 = vmul.f32 1.442695, %v3262_v19  ;;  %v2599_v61 = vunpack.c.l.bf16 %v2551_v30  ;;  %v6048_v1 = vmul.f32 %v5495_v4, %v5986_v51 }
 0x150   : > { %v915_v0 = vmul.f32 %v9693_v20, %v9692_v26  ;;  %v4636_v55 = vpack.c.bf16 %v917_v21, %v917_v21  ;;  %v6052_v46 = vmul.f32 %v5480_v58, %v5990_v15  ;;  %v6057_v50 = vmul.f32 %v5717_v16, %v6008_v41 }
 0x151   : > { %9694 = vst [vmem:[#allocation36_spill] sm:$0xff] %v6048_v1  ;;  %4948 = vrcp.f32 %v3403_v44  ;;  %v9697_v19 = vrot.slane %v5983_v12, 2  ;;  %v2695_v26 = vadd.f32 %v2647_v31, %v2498_v7  ;;  %v9698_v20 = vrot.slane %v6014_v59, 1 }
 0x152   : > { %9695 = vst [vmem:[#allocation7_spill] sm:$0xff] %v6052_v46  ;;  %9696 = vst [vmem:[#allocation37_spill] sm:$0xff] %v6057_v50  ;;  %v4634_v39 = vpack.c.bf16 %v915_v0, %v915_v0  ;;  %v9699_v21 = vrot.slane %v5833_v56, 1  ;;  %v3319_v32 = vmul.f32 1.442695, %v3265_v52  ;;  %v1215_v5 = vmul.f32 %v5456_v33, %v1163_v53 }
 0x153   : > { %v1787_v30 = vadd.f32 %v9697_v19, %v1478_v62  ;;  %1078 = vst [vmem:[#allocation2 + $0x68] sm:$0xf] %v4636_v55  ;;  %v1317_v13 = vmul.f32 %v5448_v22, %v1163_v53  ;;  %v9700_v42 = vrot.slane %v6024_v29, 1  ;;  %4950 = vpow2.f32 %v3313_v6  ;;  %v9706_v6 = vld [vmem:[#allocation14_spill] sm:$0xff] }
 0x154   : > { %v2098_v35 = vsel %vm1372_vm2, %v9699_v21, %v9698_v20  ;;  %1076 = vst [vmem:[#allocation2 + $0x58] sm:$0xf] %v4634_v39  ;;  %v6072_v7 = vmul.f32 %v5492_v3, %v1885_v47  ;;  %v6075_v62 = vmul.f32 %v5551_v28, %v2599_v61  ;;  %v9411_v31 = vrot.slane %v6052_v46, 2 }
 0x155   : > { %v1384_v44 = vsel %vm1372_vm2, %v1382_v37, %v9700_v42  ;;  %v2193_v52 = vadd.f32 %v2098_v35, %v1981_v40  ;;  %v9703_v0 = vrot.slane %v6035_v63, 1  ;;  %v9704_v55 = vrot.slane %v5921_v54, 1  ;;  %v6085_v37 = vpop.f32.mrb[24].mxu1 }
 0x156   : > { %9701 = vst [vmem:[#allocation59_spill] sm:$0xff] %v6072_v7  ;;  %9702 = vst [vmem:[#allocation60_spill] sm:$0xff] %v6075_v62  ;;  %v1983_v39 = vadd.f32 %v9706_v6, %v1787_v30  ;;  %v6089_v20 = vmul.f32 %v5480_v58, %v1163_v53  ;;  %v1479_v21 = vadd.f32 %v1384_v44, %v1266_v25  ;;  %v6091_v59 = vpop.f32.mrb[25].mxu1  ;;  %4952 = vpow2.f32 %v3319_v32 }
 0x157   : > { %v2812_v19 = vsel %vm1372_vm2, %v9704_v55, %v9703_v0  ;;  %9705 = vst [vmem:[#allocation61_spill] sm:$0xff] %v6085_v37  ;;  %9708 = vst [vmem:[#allocation62_spill] sm:$0xff] %v6091_v59  ;;  %v1386_v40 = vrot.slane %v1317_v13, 1  ;;  %v6094_v35 = vmul.f32 %v5717_v16, %v2599_v61  ;;  %v1212_v54 = vmul.f32 %v5456_v33, %v5990_v15  ;;  %v1839_v0 = vld [vmem:[#allocation2 + $0x54] sm:$0xf]  ;;  %v4947_v55 = vpop.eup %4946  ;;  %v9772_v59 = vld [vmem:[#allocation34_spill] sm:$0xff] }
 0x158   : > { %9707 = vst [vmem:[#allocation14_spill] sm:$0xff] %v6089_v20  ;;  %v2907_v56 = vadd.f32 %v2812_v19, %v2695_v26  ;;  %v1270_v42 = vadd.f32 %v5477_v57, %v1215_v5  ;;  %v6101_v53 = vmul.f32 %v5495_v4, %v1885_v47  ;;  %v9711_v25 = vrot.slane %v6048_v1, 2 }
 0x159   : > { %9709 = vst [vmem:[#allocation63_spill] sm:$0xff] %v6094_v35  ;;  %v9712_v32 = vrot.slane %v5884_v17, 2  ;;  %v9713_v15 = vrot.slane %v5983_v12, 2  ;;  %v9714_v19 = vrot.slane %v6057_v50, 2  ;;  %v9715_v6 = vrot.slane %v5955_v27, 2 }
 0x15a   : > { %9710 = vst [vmem:[#allocation64_spill] sm:$0xff] %v6101_v53  ;;  %v9716_v63 = vrot.slane %v5934_v11, 1  ;;  %v9718_v26 = vrot.slane %v5860_v43, 1  ;;  %v1267_v27 = vadd.f32 %v5477_v57, %v1212_v54  ;;  %v2553_v43 = vld [vmem:[#allocation2 + $0x54] sm:$0xf] }
 0x15b   : > { %v2378_v13 = vsel %vm1649_vm3, %v9712_v32, %v9711_v25  ;;  %v1667_v44 = vsel %vm1649_vm3, %v9713_v15, %v9411_v31  ;;  %v3090_v30 = vsel %vm1649_vm3, %v9715_v6, %v9714_v19  ;;  %v6123_v32 = vunpack.c.l.bf16 %v1839_v0  ;;  %v6131_v15 = vpop.eup %4948  ;;  %v1117_v31 = vld [vmem:[#allocation2 + $0x54] sm:$0xf]  ;;  %v1840_v49 = vld [vmem:[#allocation2 + $0x58] sm:$0xf] }
 0x15c   : > { %v2501_v5 = vadd.f32 %v2378_v13, %v2193_v52  ;;  %v2195_v17 = vadd.f32 %v9716_v63, %v1983_v39  ;;  %v1788_v1 = vadd.f32 %v1667_v44, %v1479_v21  ;;  %v6121_v25 = vadd.f32 %v3090_v30, %v2907_v56  ;;  %9719 = vst [vmem:[#allocation66_spill] sm:$0xff] %v6131_v15  ;;  %v6141_v39 = vpop.f32.mrb[26].mxu1  ;;  %v9728_v44 = vld [vmem:[#allocation28_spill] sm:$0xff] }
 0x15d   : > { %v1387_v12 = vsel %vm1372_vm2, %v9718_v26, %v1386_v40  ;;  %v9410_v13 = vrot.slane %v6094_v35, 2  ;;  %v3404_v19 = vadd.f32 1.0, %v4947_v55  ;;  %v6133_v6 = vadd.f32 %v1386_v40, %v1270_v42  ;;  %9723 = vst [vmem:[#allocation70_spill] sm:$0xff] %v6141_v39  ;;  %v4951_v55 = vpop.eup %4950  ;;  %v2554_v35 = vld [vmem:[#allocation2 + $0x58] sm:$0xf] }
 0x15e   : > { %9717 = vst [vmem:[#allocation65_spill] sm:$0xff] %v6121_v25  ;;  %v6136_v63 = vmul.f32 %v5489_v2, %v1885_v47  ;;  %v6139_v56 = vmul.f32 %v5500_v9, %v2599_v61  ;;  %v9724_v21 = vrot.slane %v6072_v7, 1  ;;  %v9725_v0 = vrot.slane %v5934_v11, 1 }
 0x15f   : > { %9720 = vst [vmem:[#allocation67_spill] sm:$0xff] %v6133_v6  ;;  %v9726_v42 = vrot.slane %v6075_v62, 1  ;;  %v9727_v40 = vrot.slane %v5945_v60, 1  ;;  %v2698_v61 = vadd.f32 %v6004_v34, %v2501_v5  ;;  %v3263_v30 = vsub.f32 0.0, %v6121_v25 }
 0x160   : > { %9721 = vst [vmem:[#allocation68_spill] sm:$0xff] %v6136_v63  ;;  %9722 = vst [vmem:[#allocation69_spill] sm:$0xff] %v6139_v56  ;;  %v2101_v57 = vsel %vm1372_vm2, %v9725_v0, %v9724_v21  ;;  %v1984_v26 = vadd.f32 %v5950_v10, %v1788_v1  ;;  %v6159_v11 = vmul.f32 %v5492_v3, %v6123_v32  ;;  %v856_v21 = vadd.f32 1.0, %v9728_v44 }
 0x161   : > { %v2815_v47 = vsel %vm1372_vm2, %v9727_v40, %v9726_v42  ;;  %v9729_v0 = vrot.slane %v5977_v18, 2  ;;  %v9730_v42 = vrot.slane %v6024_v29, 1  ;;  %v6173_v5 = vmul.f32 %v5495_v4, %v6123_v32  ;;  %v2556_v40 = vld [vmem:[#allocation2 + $0x64] sm:$0xf]  ;;  %v9733_v18 = vld [vmem:[#allocation16_spill] sm:$0xff]  ;;  %v4953_v29 = vpop.eup %4952 }
 0x162   : > { %v6175_v10 = vunpack.c.l.bf16 %v2553_v43  ;;  %4954 = vrcp.f32 %v3404_v19  ;;  %v6179_v1 = vmul.f32 %v5489_v2, %v5986_v51  ;;  %v1986_v44 = vadd.f32 %v9733_v18, %v5959_v14 }
 0x163   : > { %v3095_v60 = vsel %vm1649_vm3, %v9729_v0, %v9410_v13  ;;  %v6169_v34 = vadd.f32 %v9730_v42, %v1267_v27  ;;  %v9414_v0 = vrot.slane %v6159_v11, 1  ;;  %v3406_v27 = vadd.f32 1.0, %v4951_v55  ;;  %v1120_v13 = vld [vmem:[#allocation2 + $0x64] sm:$0xf] }
 0x164   : > { %9732 = vst [vmem:[#allocation71_spill] sm:$0xff] %v6179_v1  ;;  %v2910_v42 = vadd.f32 %v2815_v47, %v2698_v61  ;;  %v1482_v54 = vadd.f32 %v1387_v12, %v5941_v36  ;;  %v9734_v43 = vrot.slane %v5937_v23, 2  ;;  %v3315_v52 = vmul.f32 1.442695, %v3263_v30  ;;  %v6217_v23 = vld [vmem:[#allocation2 + $0x70] sm:$0x8] }
 0x165   : > { %9731 = vst [vmem:[#allocation28_spill] sm:$0xff] %v6169_v34  ;;  %v2196_v25 = vadd.f32 %v2101_v57, %v1984_v26  ;;  %v2198_v51 = vadd.f32 %v9414_v0, %v1986_v44  ;;  %4956 = vrcp.f32 %v856_v21  ;;  %v2604_v15 = vunpack.c.l.bf16 %v2556_v40  ;;  %v1842_v57 = vld [vmem:[#allocation2 + $0x64] sm:$0xf]  ;;  %v9740_v44 = vld [vmem:[#allocation21_spill] sm:$0xff] }
 0x166   : > { %v2503_v19 = vadd.f32 %v9734_v43, %v2195_v17  ;;  %v9735_v14 = vrot.slane %v6089_v20, 2  ;;  %v9736_v18 = vrot.slane %v5909_v8, 2  ;;  %v9413_v61 = vrot.slane %v6173_v5, 2  ;;  %v9751_v1 = vld [vmem:[#allocation15_spill] sm:$0xff] }
 0x167   : > { %v6197_v36 = vmul.f32 %v5551_v28, %v6175_v10  ;;  %v3409_v17 = vadd.f32 1.0, %v4953_v29  ;;  %v1168_v12 = vunpack.c.l.bf16 %v1120_v13  ;;  %v1165_v55 = vunpack.c.l.bf16 %v1117_v31 }
 0x168   : > { %v1672_v47 = vsel %vm1649_vm3, %v9736_v18, %v9735_v14  ;;  %v9737_v30 = vrot.slane %v6101_v53, 2  ;;  %v9738_v26 = vmov %v9734_v43  ;;  %4958 = vrcp.f32 %v3406_v27 }
 0x169   : > { %v6204_v8 = vadd.f32 %v3095_v60, %v2910_v42  ;;  %v2506_v40 = vadd.f32 %v9413_v61, %v2198_v51  ;;  %v2700_v43 = vadd.f32 %v9740_v44, %v2503_v19  ;;  %v6211_v29 = vmul.f32 %v5500_v9, %v6008_v41  ;;  %v6227_v19 = vld [vmem:[#allocation2 + $0x80] sm:$0x8] }
 0x16a   : > { %v2383_v21 = vsel %vm1649_vm3, %v9738_v26, %v9737_v30  ;;  %4960 = vpow2.f32 %v3315_v52  ;;  %v6213_v31 = vadd.f32 %v1672_v47, %v1482_v54  ;;  %v1890_v14 = vunpack.c.l.bf16 %v1842_v57  ;;  %v6229_v41 = vld [vmem:[#allocation2 + $0xa0] sm:$0x8]  ;;  %v9744_v30 = vld [vmem:[#allocation22_spill] sm:$0xff] }
 0x16b   : > { %9739 = vst [vmem:[#allocation16_spill] sm:$0xff] %v6204_v8  ;;  %9741 = vst [vmem:[#allocation21_spill] sm:$0xff] %v6211_v29  ;;  %v6215_v13 = vadd.f32 %v2383_v21, %v2196_v25  ;;  %v6220_v60 = vmul.f32 %v5551_v28, %v2604_v15  ;;  %v9416_v27 = vrot.slane %v6197_v36, 1  ;;  %v6225_v42 = vmul.f32 %v5717_v16, %v6175_v10  ;;  %v9742_v54 = vld [vmem:[#allocation27_spill] sm:$0xff]  ;;  %v6247_v21 = vpop.f32.mrb[27].mxu1 }
 0x16c   : > { %4962 = vrcp.f32 %v3409_v17  ;;  %v6232_v25 = vmul.f32 %v5448_v22, %v1168_v12  ;;  %v6235_v52 = vmul.f32 %v5448_v22, %v1165_v55  ;;  %v9743_v51 = vunpack.c.l.bf16 %v9742_v54  ;;  %9745 = vst [vmem:[#allocation27_spill] sm:$0xff] %v6247_v21  ;;  %v6249_v44 = vpop.eup %4954 }
 0x16d   : > { %v3266_v47 = vsub.f32 0.0, %v6204_v8  ;;  %v1220_v57 = vmul.f32 %v5456_v33, %v1168_v12  ;;  %v2703_v26 = vadd.f32 %v9744_v30, %v2506_v40  ;;  %v2912_v17 = vadd.f32 %v9416_v27, %v2700_v43  ;;  %9746 = vst [vmem:[#allocation22_spill] sm:$0xff] %v6249_v44  ;;  %v1118_v27 = vld [vmem:[#allocation2 + $0x58] sm:$0xf]  ;;  %v6276_v40 = vld [vmem:[%s9369_s4] ss:$0 sm:$0xff] }
 0x16e   : > { %v6240_v18 = vmul.f32 %v5489_v2, %v9743_v51  ;;  %v6252_v61 = vmul.f32 %v5480_v58, %v1168_v12  ;;  %v6258_v8 = vmul.f32 %v5492_v3, %v1890_v14  ;;  %v6262_v43 = vmul.f32 %v5717_v16, %v2604_v15 }
 0x16f   : > { %v4957_v44 = vpop.eup %4956  ;;  %v6267_v54 = vmul.f32 %v5489_v2, %v1890_v14  ;;  %v6270_v51 = vmul.f32 %v5495_v4, %v1890_v14  ;;  %v3321_v50 = vmul.f32 1.442695, %v3266_v47  ;;  %v6279_v30 = vadd.f32 %v6276_v40, %v1220_v57  ;;  %v1121_v57 = vld [vmem:[#allocation2 + $0x68] sm:$0xf] }
 0x170   : > { %v9747_v12 = vrot.slane %v6220_v60, 1  ;;  %v9748_v56 = vrot.slane %v6225_v42, 2  ;;  %v6289_v0 = vmul.f32 %v5500_v9, %v2604_v15  ;;  %v6292_v47 = vmul.f32 %v5480_v58, %v1165_v55 }
 0x171   : > { %v6294_v53 = vunpack.c.l.bf16 %v1118_v27  ;;  %v9425_v63 = vrot.slane %v6262_v43, 2  ;;  %v9752_v14 = vrot.slane %v6232_v25, 1  ;;  %v1217_v34 = vmul.f32 %v5456_v33, %v1165_v55  ;;  %v9753_v27 = vld [vmem:[#allocation19_spill] sm:$0xff] }
 0x172   : > { %v2915_v62 = vadd.f32 %v9747_v12, %v2703_v26  ;;  %v6285_v29 = vadd.f32 %v9748_v56, %v2912_v17  ;;  %v4959_v7 = vpop.eup %4958  ;;  %v6298_v26 = vunpack.c.l.bf16 %v2554_v35  ;;  %v9750_v12 = vld [vmem:[#allocation10_spill] sm:$0xff]  ;;  %v9754_v20 = vrot.slane %v6235_v52, 1 }
 0x173   : > { %v920_v56 = vmul.f32 %v4957_v44, %v9750_v12  ;;  %v1487_v15 = vadd.f32 %v9752_v14, %v9751_v1  ;;  %4964 = vpow2.f32 %v3321_v50  ;;  %v1939_v35 = vmul.f32 %v5489_v2, %v6123_v32  ;;  %v6327_v32 = vpop.f32.mrb[28].mxu1 }
 0x174   : > { %9749 = vst [vmem:[#allocation72_spill] sm:$0xff] %v6285_v29  ;;  %v4961_v17 = vpop.eup %4960  ;;  %v1484_v46 = vadd.f32 %v9754_v20, %v9753_v27  ;;  %v6313_v44 = vadd.f32 %v9425_v63, %v2915_v62  ;;  %v3268_v1 = vsub.f32 0.0, %v6285_v29  ;;  %v6321_v12 = vmul.f32 %v5448_v22, %v6294_v53  ;;  %9758 = vst [vmem:[#allocation73_spill] sm:$0xff] %v6327_v32  ;;  %v9759_v63 = vld [vmem:[#allocation31_spill] sm:$0xff] }
 0x175   : > { %v6325_v50 = vmul.f32 %v5551_v28, %v6298_v26  ;;  %v4639_v20 = vpack.c.bf16 %v920_v56, %v920_v56  ;;  %v3407_v27 = vadd.f32 1.0, %v4961_v17  ;;  %v1169_v62 = vunpack.c.l.bf16 %v1121_v57 }
 0x176   : > { %9755 = vst [vmem:[#allocation10_spill] sm:$0xff] %v6313_v44  ;;  %v6316_v14 = vpop.eup %4962  ;;  %v6329_v6 = vunpack.c.l.bf16 %v1840_v49  ;;  %v854_v29 = vadd.f32 1.0, %v9759_v63  ;;  %v9761_v55 = vrot.slane %v6252_v61, 2  ;;  %v1272_v21 = vadd.f32 %v6276_v40, %v1217_v34  ;;  %v1843_v63 = vld [vmem:[#allocation2 + $0x68] sm:$0xf] }
 0x177   : > { %9756 = vst [vmem:[#allocation15_spill] sm:$0xff] %v6316_v14  ;;  %9757 = vst [vmem:[#allocation19_spill] sm:$0xff] %v6325_v50  ;;  %v6333_v14 = vmul.f32 %v4959_v7, %v5999_v38  ;;  %v9762_v39 = vrot.slane %v6292_v47, 2  ;;  %v2653_v57 = vmul.f32 %v5500_v9, %v6175_v10  ;;  %v3271_v49 = vsub.f32 0.0, %v6313_v44  ;;  %v2557_v7 = vld [vmem:[#allocation2 + $0x68] sm:$0xf] }
 0x178   : > { %v6337_v45 = vadd.f32 %v9761_v55, %v1487_v15  ;;  %1081 = vst [vmem:[#allocation2 + $0x84] sm:$0xf] %v4639_v20  ;;  %v3325_v17 = vmul.f32 1.442695, %v3268_v1  ;;  %4966 = vrcp.f32 %v854_v29  ;;  %v1987_v38 = vadd.f32 %v1939_v35, %v6213_v31  ;;  %v9765_v29 = vld [vmem:[#allocation20_spill] sm:$0xff]  ;;  %v9767_v15 = vld [vmem:[#allocation33_spill] sm:$0xff] }
 0x179   : > { %9760 = vst [vmem:[#allocation31_spill] sm:$0xff] %v6333_v14  ;;  %v1793_v56 = vadd.f32 %v9762_v39, %v1484_v46  ;;  %v6350_v34 = vmul.f32 %v5717_v16, %v6298_v26  ;;  %4968 = vrcp.f32 %v3407_v27  ;;  %v2701_v46 = vadd.f32 %v2653_v57, %v6215_v13 }
 0x17a   : > { %v1221_v39 = vmul.f32 %v5456_v33, %v1169_v62  ;;  %v6356_v10 = vmul.f32 %v5492_v3, %v6329_v6  ;;  %v1321_v35 = vmul.f32 %v5448_v22, %v1169_v62  ;;  %v1891_v1 = vunpack.c.l.bf16 %v1843_v63 }
 0x17b   : > { %9763 = vst [vmem:[#allocation74_spill] sm:$0xff] %v6350_v34  ;;  %v1989_v31 = vadd.f32 %v9765_v29, %v1793_v56  ;;  %v6362_v20 = vmul.f32 %v5480_v58, %v6294_v53  ;;  %4970 = vpow2.f32 %v3325_v17  ;;  %v3331_v55 = vmul.f32 1.442695, %v3271_v49 }
 0x17c   : > { %9764 = vst [vmem:[#allocation75_spill] sm:$0xff] %v6356_v10  ;;  %v2605_v27 = vunpack.c.l.bf16 %v2557_v7  ;;  %v857_v13 = vadd.f32 1.0, %v9767_v15  ;;  %v9768_v57 = vrot.slane %v6321_v12, 1  ;;  %v9769_v44 = vrot.slane %v6235_v52, 1 }
 0x17d   : > { %9766 = vst [vmem:[#allocation20_spill] sm:$0xff] %v6362_v20  ;;  %v9770_v56 = vrot.slane %v6325_v50, 1  ;;  %v9771_v29 = vrot.slane %v6197_v36, 1  ;;  %v9431_v32 = vrot.slane %v6350_v34, 2  ;;  %v855_v17 = vadd.f32 1.0, %v9772_v59  ;;  %v4965_v49 = vpop.eup %4964 }
 0x17e   : > { %v1390_v14 = vsel %vm1372_vm2, %v9769_v44, %v9768_v57  ;;  %v1276_v7 = vadd.f32 %v6276_v40, %v1221_v39  ;;  %v9432_v15 = vrot.slane %v6356_v10, 1  ;;  %4972 = vrcp.f32 %v857_v13 }
 0x17f   : > { %v2818_v63 = vsel %vm1372_vm2, %v9771_v29, %v9770_v56  ;;  %v6380_v52 = vmul.f32 %v5480_v58, %v1169_v62  ;;  %v6383_v44 = vmul.f32 %v5492_v3, %v1891_v1  ;;  %4974 = vrcp.f32 %v855_v17 }
 0x180   : > { %v2913_v37 = vadd.f32 %v2818_v63, %v2701_v46  ;;  %4976 = vpow2.f32 %v3331_v55  ;;  %v6387_v57 = vmul.f32 %v5551_v28, %v2605_v27  ;;  %v1485_v59 = vadd.f32 %v1390_v14, %v1272_v21  ;;  %v6393_v46 = vpop.f32.mrb[29].mxu1 }
 0x181   : > { %9773 = vst [vmem:[#allocation33_spill] sm:$0xff] %v6380_v52  ;;  %9774 = vst [vmem:[#allocation34_spill] sm:$0xff] %v6383_v44  ;;  %v6391_v39 = vmul.f32 %v5495_v4, %v6329_v6  ;;  %v3410_v13 = vadd.f32 1.0, %v4965_v49  ;;  %v1392_v62 = vrot.slane %v1321_v35, 1  ;;  %v6396_v56 = vmul.f32 %v5717_v16, %v2605_v27 }
 0x182   : > { %9775 = vst [vmem:[#allocation76_spill] sm:$0xff] %v6387_v57  ;;  %9777 = vst [vmem:[#allocation78_spill] sm:$0xff] %v6393_v46  ;;  %v9779_v29 = vrot.slane %v6225_v42, 2  ;;  %v4967_v63 = vpop.eup %4966  ;;  %v9780_v21 = vrot.slane %v6258_v8, 1  ;;  %v1218_v17 = vmul.f32 %v5456_v33, %v6294_v53  ;;  %v9781_v35 = vrot.slane %v6159_v11, 1  ;;  %v6429_v42 = vpop.f32.mrb[30].mxu1 }
 0x183   : > { %9776 = vst [vmem:[#allocation77_spill] sm:$0xff] %v6391_v39  ;;  %9778 = vst [vmem:[#allocation79_spill] sm:$0xff] %v6396_v56  ;;  %4978 = vrcp.f32 %v3410_v13  ;;  %v9789_v50 = vrot.slane %v6232_v25, 1  ;;  %v6437_v11 = vadd.f32 %v1392_v62, %v1276_v7  ;;  %v9795_v7 = vrot.slane %v6258_v8, 1 }
 0x184   : > { %v3100_v55 = vsel %vm1649_vm3, %v9779_v29, %v9431_v32  ;;  %v2201_v14 = vadd.f32 %v9780_v21, %v1989_v31  ;;  %v2104_v49 = vsel %vm1372_vm2, %v9781_v35, %v9432_v15  ;;  %v6417_v29 = vmul.f32 %v5495_v4, %v1891_v1  ;;  %v6424_v32 = vpop.eup %4968  ;;  %v9787_v15 = vld [vmem:[#allocation11_spill] sm:$0xff] }
 0x185   : > { %v6412_v36 = vadd.f32 %v3100_v55, %v2913_v37  ;;  %v9784_v31 = vrot.slane %v6362_v20, 2  ;;  %v9785_v21 = vrot.slane %v6292_v47, 2  ;;  %9786 = vst [vmem:[#allocation82_spill] sm:$0xff] %v6424_v32  ;;  %v9437_v37 = vrot.slane %v6391_v39, 2  ;;  %v1126_v55 = vld [vmem:[#allocation2 + $0x84] sm:$0xf]  ;;  %v4971_v32 = vpop.eup %4970 }
 0x186   : > { %9783 = vst [vmem:[#allocation81_spill] sm:$0xff] %v6417_v29  ;;  %v918_v34 = vmul.f32 %v4967_v63, %v9787_v15  ;;  %9788 = vst [vmem:[#allocation11_spill] sm:$0xff] %v6429_v42  ;;  %v1393_v10 = vsel %vm1372_vm2, %v9789_v50, %v1392_v62  ;;  %v6442_v63 = vmul.f32 %v5489_v2, %v1891_v1  ;;  %v1174_v13 = vunpack.c.l.bf16 %v1126_v55 }
 0x187   : > { %9782 = vst [vmem:[#allocation80_spill] sm:$0xff] %v6412_v36  ;;  %v1677_v53 = vsel %vm1649_vm3, %v9785_v21, %v9784_v31  ;;  %v2199_v31 = vadd.f32 %v2104_v49, %v1987_v38  ;;  %v6435_v21 = vpop.f32.mrb[31].mxu1  ;;  %9791 = vst [vmem:[#allocation84_spill] sm:$0xff] %v6437_v11  ;;  %v6446_v50 = vmul.f32 %v5500_v9, %v2605_v27  ;;  %v9794_v49 = vrot.slane %v6383_v44, 1 }
 0x188   : > { %v1794_v35 = vadd.f32 %v1677_v53, %v1485_v59  ;;  %9790 = vst [vmem:[#allocation83_spill] sm:$0xff] %v6435_v21  ;;  %v1273_v59 = vadd.f32 %v6276_v40, %v1218_v17  ;;  %v3269_v53 = vsub.f32 0.0, %v6412_v36  ;;  %v4637_v15 = vpack.c.bf16 %v918_v34, %v918_v34  ;;  %9792 = vst [vmem:[#allocation85_spill] sm:$0xff] %v6442_v63  ;;  %v4973_v38 = vpop.eup %4972 }
 0x189   : > { %9793 = vst [vmem:[#allocation86_spill] sm:$0xff] %v6446_v50  ;;  %v2107_v62 = vsel %vm1372_vm2, %v9795_v7, %v9794_v49  ;;  %v9796_v17 = vrot.slane %v6387_v57, 1  ;;  %v9797_v34 = vrot.slane %v6220_v60, 1  ;;  %v9798_v25 = vrot.slane %v6173_v5, 2  ;;  %v4975_v47 = vpop.eup %4974 }
 0x18a   : > { %1079 = vst [vmem:[#allocation2 + $0x74] sm:$0xf] %v4637_v15  ;;  %v1990_v55 = vadd.f32 %v6267_v54, %v1794_v35  ;;  %v9799_v8 = vrot.slane %v6396_v56, 2  ;;  %v9800_v49 = vrot.slane %v6262_v43, 2  ;;  %v4977_v57 = vpop.eup %4976  ;;  %v9803_v5 = vrot.slane %v6321_v12, 1  ;;  %v9806_v15 = vld [vmem:[#allocation13_spill] sm:$0xff] }
 0x18b   : > { %v2821_v1 = vsel %vm1372_vm2, %v9797_v34, %v9796_v17  ;;  %v2388_v27 = vsel %vm1649_vm3, %v9798_v25, %v9437_v37  ;;  %v1488_v17 = vadd.f32 %v1393_v10, %v6279_v30  ;;  %v9802_v34 = vld [vmem:[#allocation12_spill] sm:$0xff]  ;;  %v6479_v54 = vmul.f32 %v5489_v2, %v6329_v6  ;;  %v2562_v30 = vld [vmem:[#allocation2 + $0x84] sm:$0xf] }
 0x18c   : > { %v6469_v7 = vsel %vm1649_vm3, %v9800_v49, %v9799_v8  ;;  %v2507_v60 = vadd.f32 %v2388_v27, %v2199_v31  ;;  %v921_v36 = vmul.f32 %v4973_v38, %v9802_v34  ;;  %v6475_v25 = vadd.f32 %v9803_v5, %v1273_v59  ;;  %v1848_v31 = vld [vmem:[#allocation2 + $0x84] sm:$0xf] }
 0x18d   : > { %9801 = vst [vmem:[#allocation87_spill] sm:$0xff] %v6469_v7  ;;  %9805 = vst [vmem:[#allocation88_spill] sm:$0xff] %v6479_v54  ;;  %v3327_v35 = vmul.f32 1.442695, %v3269_v53  ;;  %v919_v43 = vmul.f32 %v4975_v47, %v9806_v15  ;;  %v3412_v37 = vadd.f32 1.0, %v4971_v32  ;;  %v6483_v8 = vmul.f32 %v5448_v22, %v1174_v13 }
 0x18e   : > { %9804 = vst [vmem:[#allocation12_spill] sm:$0xff] %v6475_v25  ;;  %v9807_v10 = vrot.slane %v6380_v52, 2  ;;  %v9808_v38 = vrot.slane %v6252_v61, 2  ;;  %v4640_v59 = vpack.c.bf16 %v921_v36, %v921_v36  ;;  %v2202_v27 = vadd.f32 %v2107_v62, %v1990_v55  ;;  %v6622_v25 = vld [vmem:[#allocation2 + $0xc0] sm:$0x8] }
 0x18f   : > { %v9809_v6 = vrot.slane %v6270_v51, 2  ;;  %v9810_v53 = vunpack.c.l.bf16 %v6217_v23  ;;  %v4638_v47 = vpack.c.bf16 %v919_v43, %v919_v43  ;;  %v3415_v34 = vadd.f32 1.0, %v4977_v57  ;;  %v6506_v23 = vpop.eup %4978 }
 0x190   : > { %v1682_v12 = vsel %vm1649_vm3, %v9808_v38, %v9807_v10  ;;  %v6497_v5 = vmul.f32 %v5500_v9, %v6298_v26  ;;  %v2704_v15 = vadd.f32 %v6289_v0, %v2507_v60  ;;  %1082 = vst [vmem:[#allocation2 + $0x88] sm:$0xf] %v4640_v59  ;;  %4980 = vpow2.f32 %v3327_v35 }
 0x191   : > { %v2509_v49 = vadd.f32 %v9809_v6, %v2201_v14  ;;  %v2658_v32 = vmul.f32 %v5500_v9, %v9810_v53  ;;  %v6500_v61 = vadd.f32 %v1682_v12, %v1488_v17  ;;  %v1896_v36 = vunpack.c.l.bf16 %v1848_v31  ;;  %v9812_v14 = vld [vmem:[#allocation26_spill] sm:$0xff]  ;;  %1080 = vst [vmem:[#allocation2 + $0x78] sm:$0xf] %v4638_v47  ;;  %v2559_v17 = vld [vmem:[#allocation2 + $0x74] sm:$0xf] }
 0x192   : > { %9811 = vst [vmem:[#allocation13_spill] sm:$0xff] %v6497_v5  ;;  %v2610_v62 = vunpack.c.l.bf16 %v2562_v30  ;;  %v6504_v55 = vadd.f32 %v9812_v14, %v6337_v45  ;;  %9813 = vst [vmem:[#allocation26_spill] sm:$0xff] %v6506_v23  ;;  %4982 = vrcp.f32 %v3412_v37  ;;  %v9438_v57 = vrot.slane %v6483_v8, 1  ;;  %v9817_v30 = vld [vmem:[#allocation39_spill] sm:$0xff]  ;;  %v1128_v12 = vld [vmem:[#allocation2 + $0x90] sm:$0x8] }
 0x193   : > { %v9814_v26 = vrot.slane %v6417_v29, 2  ;;  %v9815_v0 = vmov %v9809_v6  ;;  %v9816_v35 = vunpack.c.l.bf16 %v6227_v19  ;;  %v6521_v31 = vadd.f32 %v2658_v32, %v2509_v49  ;;  %v1850_v6 = vld [vmem:[#allocation2 + $0x90] sm:$0x8]  ;;  %v1853_v32 = vld [vmem:[#allocation2 + $0xa0] sm:$0x8] }
 0x194   : > { %v860_v37 = vadd.f32 1.0, %v9817_v30  ;;  %v9818_v10 = vunpack.c.l.bf16 %v6229_v41  ;;  %4984 = vrcp.f32 %v3415_v34  ;;  %v6527_v51 = vadd.f32 %v2821_v1, %v2704_v15  ;;  %v9820_v1 = vld [vmem:[#allocation25_spill] sm:$0xff]  ;;  %v9822_v34 = vld [vmem:[#allocation42_spill] sm:$0xff] }
 0x195   : > { %v2393_v60 = vsel %vm1649_vm3, %v9815_v0, %v9814_v26  ;;  %v6517_v43 = vmul.f32 %v5500_v9, %v9816_v35  ;;  %v1226_v59 = vmul.f32 %v5456_v33, %v1174_v13  ;;  %v6531_v19 = vmul.f32 %v5480_v58, %v1174_v13 }
 0x196   : > { %v6519_v45 = vadd.f32 %v2393_v60, %v2202_v27  ;;  %v1231_v38 = vmul.f32 %v5456_v33, %v9818_v10  ;;  %9819 = vst [vmem:[#allocation39_spill] sm:$0xff] %v6527_v51  ;;  %v6534_v27 = vmul.f32 %v5492_v3, %v1896_v36  ;;  %v6537_v49 = vmul.f32 %v5495_v4, %v1896_v36  ;;  %v1123_v10 = vld [vmem:[#allocation2 + $0x74] sm:$0xf]  ;;  %v1134_v51 = vld [vmem:[#allocation2 + $0xb0] sm:$0x8] }
 0x197   : > { %v6540_v41 = vmul.f32 %v5551_v28, %v2610_v62  ;;  %v6542_v53 = vunpack.c.l.bf16 %v2559_v17  ;;  %v1493_v47 = vadd.f32 %v9438_v57, %v9820_v1  ;;  %v6548_v13 = vmul.f32 %v5717_v16, %v2610_v62  ;;  %v2564_v17 = vld [vmem:[#allocation2 + $0x90] sm:$0x8] }
 0x198   : > { %v858_v15 = vadd.f32 1.0, %v9822_v34  ;;  %v1176_v14 = vunpack.c.l.bf16 %v1128_v12  ;;  %v6552_v26 = vmul.f32 %v5489_v2, %v1896_v36  ;;  %4986 = vrcp.f32 %v860_v37  ;;  %v2567_v12 = vld [vmem:[#allocation2 + $0xa0] sm:$0x8]  ;;  %v1845_v36 = vld [vmem:[#allocation2 + $0x74] sm:$0xf] }
 0x199   : > { %9821 = vst [vmem:[#allocation25_spill] sm:$0xff] %v6548_v13  ;;  %v6555_v0 = vadd.f32 %v6276_v40, %v1231_v38  ;;  %v1898_v60 = vunpack.c.l.bf16 %v1850_v6  ;;  %v6558_v35 = vadd.f32 %v6276_v40, %v1226_v59  ;;  %v9440_v30 = vrot.slane %v6531_v19, 2  ;;  %v1124_v34 = vld [vmem:[#allocation2 + $0x78] sm:$0xf] }
 0x19a   : > { %v6562_v16 = vmul.f32 %v5500_v9, %v2610_v62  ;;  %v1901_v1 = vunpack.c.l.bf16 %v1853_v32  ;;  %v6569_v6 = vmul.f32 %v5551_v28, %v6542_v53  ;;  %4988 = vrcp.f32 %v858_v15  ;;  %v1137_v32 = vld [vmem:[#allocation2 + $0xc0] sm:$0x8]  ;;  %v4981_v57 = vpop.eup %4980  ;;  %v6585_v15 = vld [vmem:[%s9367_s2] ss:$0 sm:$0xff] }
 0x19b   : > { %9823 = vst [vmem:[#allocation42_spill] sm:$0xff] %v6555_v0  ;;  %v1802_v59 = vadd.f32 %v9440_v30, %v1493_v47  ;;  %v1228_v62 = vmul.f32 %v5456_v33, %v1176_v14  ;;  %v1171_v23 = vunpack.c.l.bf16 %v1123_v10  ;;  %v1950_v37 = vmul.f32 %v5489_v2, %v1898_v60  ;;  %v9826_v47 = vld [vmem:[#allocation30_spill] sm:$0xff]  ;;  %v9828_v14 = vld [vmem:[#allocation23_spill] sm:$0xff] }
 0x19c   : > { %v2612_v7 = vunpack.c.l.bf16 %v2564_v17  ;;  %v2615_v38 = vunpack.c.l.bf16 %v2567_v12  ;;  %v6576_v56 = vpop.eup %4982  ;;  %v6579_v50 = vmul.f32 %v5489_v2, %v1901_v1  ;;  %4990 = vpow2.f32 %v9826_v47  ;;  %9827 = vst [vmem:[#allocation30_spill] sm:$0xff] %v6585_v15  ;;  %v9830_v60 = vld [vmem:[#allocation38_spill] sm:$0xff]  ;;  %v1856_v12 = vld [vmem:[#allocation2 + $0xb0] sm:$0x8]  ;;  %v6599_v1 = vld [vmem:[%s9368_s3 + $0x8] ss:$0 sm:$0xff] }
 0x19d   : > { %9824 = vst [vmem:[#allocation89_spill] sm:$0xff] %v6576_v56  ;;  %v6589_v10 = vadd.f32 %v6585_v15, %v9828_v14  ;;  %v6593_v17 = vadd.f32 %v6585_v15, %v9830_v60  ;;  %v6603_v47 = vmul.f32 %v6599_v1, %v6542_v53  ;;  %v1185_v56 = vunpack.c.l.bf16 %v1137_v32  ;;  %v9832_v14 = vld [vmem:[#allocation47_spill] sm:$0xff] }
 0x19e   : > { %9825 = vst [vmem:[#allocation90_spill] sm:$0xff] %v6579_v50  ;;  %v6607_v5 = vadd.f32 %v6585_v15, %v9832_v14  ;;  %v6609_v60 = vpop.eup %4984  ;;  %v3413_v29 = vadd.f32 1.0, %v4981_v57  ;;  %v1893_v39 = vunpack.c.l.bf16 %v1845_v36  ;;  %v6612_v30 = vadd.f32 %v6276_v40, %v1228_v62  ;;  %v6631_v62 = vld [vmem:[#allocation2 + $0xb0] sm:$0x8] }
 0x19f   : > { %9829 = vst [vmem:[#allocation23_spill] sm:$0xff] %v6589_v10  ;;  %9831 = vst [vmem:[#allocation38_spill] sm:$0xff] %v6593_v17  ;;  %v1182_v44 = vunpack.c.l.bf16 %v1134_v51  ;;  %v6615_v63 = vmul.f32 %v5448_v22, %v1171_v23  ;;  %v9836_v54 = vrot.slane %v6569_v6, 1  ;;  %v6620_v32 = vadd.f32 %v1950_v37, %v1802_v59  ;;  %v2560_v59 = vld [vmem:[#allocation2 + $0x78] sm:$0xf] }
 0x1a0   : > { %9833 = vst [vmem:[#allocation47_spill] sm:$0xff] %v6607_v5  ;;  %9834 = vst [vmem:[#allocation91_spill] sm:$0xff] %v6609_v60  ;;  %v1904_v14 = vunpack.c.l.bf16 %v1856_v12  ;;  %v6624_v52 = vunpack.c.l.bf16 %v1124_v34  ;;  %v6627_v57 = vmul.f32 %v5500_v9, %v2612_v7  ;;  %v763_v36 = vsub.f32 0.0, %v6589_v10  ;;  %v1849_v10 = vld [vmem:[#allocation2 + $0x88] sm:$0xf] }
 0x1a1   : > { %9835 = vst [vmem:[#allocation92_spill] sm:$0xff] %v6612_v30  ;;  %v2918_v11 = vadd.f32 %v9836_v54, %v6521_v31  ;;  %9837 = vst [vmem:[#allocation93_spill] sm:$0xff] %v6620_v32  ;;  %v768_v51 = vsub.f32 0.0, %v6593_v17  ;;  %v9448_v20 = vrot.slane %v6603_v47, 2  ;;  %v6635_v54 = vmul.f32 %v5500_v9, %v2615_v38 }
 0x1a2   : > { %9838 = vst [vmem:[#allocation94_spill] sm:$0xff] %v6631_v62  ;;  %v4987_v60 = vpop.eup %4986  ;;  %v1237_v31 = vmul.f32 %v5456_v33, %v1185_v56  ;;  %v766_v37 = vsub.f32 0.0, %v6607_v5  ;;  %4992 = vrcp.f32 %v3413_v29  ;;  %v6640_v7 = vmul.f32 %v5492_v3, %v1893_v39 }
 0x1a3   : > { %9839 = vst [vmem:[#allocation95_spill] sm:$0xff] %v6635_v54  ;;  %v6643_v34 = vmul.f32 %v5456_v33, %v1182_v44  ;;  %v1394_v21 = vrot.slane %v6615_v63, 1  ;;  %v6649_v38 = vadd.f32 %v9448_v20, %v2918_v11  ;;  %v6652_v56 = vmul.f32 %v5489_v2, %v1904_v14  ;;  %v1846_v44 = vld [vmem:[#allocation2 + $0x78] sm:$0xf]  ;;  %v9842_v54 = vld [vmem:[#allocation17_spill] sm:$0xff] }
 0x1a4   : > { %v4989_v42 = vpop.eup %4988  ;;  %v6657_v46 = vmul.f32 %v5448_v22, %v6624_v52  ;;  %v924_v5 = vmul.f32 %v4987_v60, %v9842_v54  ;;  %v812_v12 = vmul.f32 1.442695, %v763_v36  ;;  %v6660_v17 = vmul.f32 1.442695, %v768_v51  ;;  %v1127_v20 = vld [vmem:[#allocation2 + $0x88] sm:$0xf] }
 0x1a5   : > { %9840 = vst [vmem:[#allocation96_spill] sm:$0xff] %v6649_v38  ;;  %9841 = vst [vmem:[#allocation97_spill] sm:$0xff] %v6652_v56  ;;  %v1223_v63 = vmul.f32 %v5456_v33, %v1171_v23  ;;  %v1574_v11 = vmul.f32 %v5480_v58, %v1171_v23  ;;  %v1945_v14 = vmul.f32 %v5489_v2, %v1893_v39  ;;  %v6665_v56 = vunpack.c.l.bf16 %v2560_v59  ;;  %v9844_v51 = vld [vmem:[#allocation29_spill] sm:$0xff] }
 0x1a6   : > { %v4991_v29 = vpop.eup %4990  ;;  %v2108_v32 = vrot.slane %v6640_v7, 1  ;;  %v6669_v0 = vmul.f32 %v5495_v4, %v1893_v39  ;;  %v6672_v60 = vadd.f32 %v6276_v40, %v1237_v31  ;;  %v818_v36 = vmul.f32 1.442695, %v766_v37  ;;  %v9845_v39 = vld [vmem:[#allocation18_spill] sm:$0xff] }
 0x1a7   : > { %v1490_v54 = vadd.f32 %v1394_v21, %v9844_v51  ;;  %v2659_v23 = vmul.f32 %v5500_v9, %v6542_v53  ;;  %v3274_v50 = vsub.f32 0.0, %v6649_v38  ;;  %v6678_v59 = vunpack.c.l.bf16 %v1846_v44  ;;  %v2563_v51 = vld [vmem:[#allocation2 + $0x88] sm:$0xf] }
 0x1a8   : > { %9843 = vst [vmem:[#allocation17_spill] sm:$0xff] %v6672_v60  ;;  %v1175_v30 = vunpack.c.l.bf16 %v1127_v20  ;;  %v9452_v7 = vrot.slane %v6657_v46, 1  ;;  %v4643_v24 = vpack.c.bf16 %v924_v5, %v924_v5  ;;  %v922_v62 = vmul.f32 %v4989_v42, %v9845_v39 }
 0x1a9   : > { %v1278_v31 = vadd.f32 %v6276_v40, %v1223_v63  ;;  %v1685_v60 = vrot.slane %v1574_v11, 2  ;;  %v1993_v37 = vadd.f32 %v1945_v14, %v6500_v61  ;;  %v6686_v53 = vmul.f32 %v5551_v28, %v6665_v56 }
 0x1aa   : > { %v2204_v38 = vadd.f32 %v2108_v32, %v6504_v55  ;;  %v1897_v44 = vunpack.c.l.bf16 %v1849_v10  ;;  %v6691_v20 = vmul.f32 %v5480_v58, %v6624_v52  ;;  %1085 = vst [vmem:[#allocation2 + $0xa4] sm:$0xf] %v4643_v24  ;;  %v4641_v5 = vpack.c.bf16 %v922_v62, %v922_v62 }
 0x1ab   : > { %9846 = vst [vmem:[#allocation29_spill] sm:$0xff] %v6686_v53  ;;  %v9455_v42 = vrot.slane %v6669_v0, 2  ;;  %v2707_v63 = vadd.f32 %v2659_v23, %v6519_v45  ;;  %v3337_v11 = vmul.f32 1.442695, %v3274_v50  ;;  %v6697_v61 = vmul.f32 %v5492_v3, %v6678_v59 }
 0x1ac   : > { %9847 = vst [vmem:[#allocation18_spill] sm:$0xff] %v6691_v20  ;;  %v6699_v14 = vpop.eup %4992  ;;  %v1799_v39 = vadd.f32 %v1685_v60, %v1490_v54  ;;  %v1325_v55 = vmul.f32 %v5448_v22, %v1175_v30  ;;  %v2611_v10 = vunpack.c.l.bf16 %v2563_v51  ;;  %v1396_v24 = vsel %vm1372_vm2, %v1394_v21, %v9452_v7  ;;  %1083 = vst [vmem:[#allocation2 + $0x94] sm:$0xf] %v4641_v5 }
 0x1ad   : > { %9848 = vst [vmem:[#allocation98_spill] sm:$0xff] %v6697_v61  ;;  %9849 = vst [vmem:[#allocation99_spill] sm:$0xff] %v6699_v14  ;;  %v1227_v62 = vmul.f32 %v5456_v33, %v1175_v30  ;;  %v6709_v50 = vmul.f32 %v6599_v1, %v6665_v56  ;;  %v861_v23 = vadd.f32 1.0, %v4991_v29  ;;  %v2512_v54 = vadd.f32 %v9455_v42, %v2204_v38 }
 0x1ae   : > { %v6714_v14 = vmul.f32 %v5480_v58, %v1175_v30  ;;  %v6717_v51 = vmul.f32 %v5489_v2, %v1897_v44  ;;  %4994 = vpow2.f32 %v3337_v11  ;;  %v6721_v5 = vmul.f32 %v5492_v3, %v1897_v44 }
 0x1af   : > { %9850 = vst [vmem:[#allocation100_spill] sm:$0xff] %v6709_v50  ;;  %v1491_v7 = vadd.f32 %v1396_v24, %v1278_v31  ;;  %v1995_v29 = vadd.f32 %v6240_v18, %v1799_v39  ;;  %v1398_v15 = vrot.slane %v1325_v55, 1  ;;  %v6726_v38 = vmul.f32 %v5551_v28, %v2611_v10 }
 0x1b0   : > { %9851 = vst [vmem:[#allocation101_spill] sm:$0xff] %v6714_v14  ;;  %9852 = vst [vmem:[#allocation102_spill] sm:$0xff] %v6717_v51  ;;  %4996 = vrcp.f32 %v861_v23  ;;  %v6730_v30 = vmul.f32 %v5495_v4, %v6678_v59  ;;  %v9856_v42 = vrot.slane %v6686_v53, 1  ;;  %v9857_v11 = vrot.slane %v6569_v6, 1  ;;  %v9909_v51 = vld [vmem:[#allocation93_spill] sm:$0xff] }
 0x1b1   : > { %9853 = vst [vmem:[#allocation103_spill] sm:$0xff] %v6721_v5  ;;  %9854 = vst [vmem:[#allocation104_spill] sm:$0xff] %v6726_v38  ;;  %4998 = vpow2.f32 %v812_v12  ;;  %v6739_v18 = vmul.f32 %v6599_v1, %v2611_v10  ;;  %v9859_v39 = vrot.slane %v6691_v20, 2  ;;  %v1224_v23 = vmul.f32 %v5456_v33, %v6624_v52 }
 0x1b2   : > { %9855 = vst [vmem:[#allocation105_spill] sm:$0xff] %v6730_v30  ;;  %v2824_v21 = vsel %vm1372_vm2, %v9857_v11, %v9856_v42  ;;  %5000 = vpow2.f32 %v6660_v17  ;;  %v9860_v6 = vrot.slane %v6697_v61, 1  ;;  %v2709_v12 = vadd.f32 %v6517_v43, %v2512_v54 }
 0x1b3   : > { %9858 = vst [vmem:[#allocation106_spill] sm:$0xff] %v6739_v18  ;;  %v1687_v55 = vsel %vm1649_vm3, %v1685_v60, %v9859_v39  ;;  %v2919_v24 = vadd.f32 %v2824_v21, %v2707_v63  ;;  %5002 = vpow2.f32 %v818_v36  ;;  %v1282_v11 = vadd.f32 %v6276_v40, %v1227_v62 }
 0x1b4   : > { %v1800_v45 = vadd.f32 %v1687_v55, %v1491_v7  ;;  %v2110_v42 = vsel %vm1372_vm2, %v2108_v32, %v9860_v6  ;;  %v9461_v31 = vrot.slane %v6714_v14, 2  ;;  %v6754_v60 = vmul.f32 %v5495_v4, %v1897_v44 }
 0x1b5   : > { %v9862_v17 = vrot.slane %v6483_v8, 1  ;;  %v9460_v52 = vrot.slane %v6721_v5, 1  ;;  %v9459_v7 = vrot.slane %v6730_v30, 2  ;;  %v9863_v32 = vrot.slane %v6709_v50, 2  ;;  %v1129_v8 = vld [vmem:[#allocation2 + $0x94] sm:$0xf] }
 0x1b6   : > { %9861 = vst [vmem:[#allocation107_spill] sm:$0xff] %v6754_v60  ;;  %v9864_v36 = vrot.slane %v6603_v47, 2  ;;  %v9865_v62 = vrot.slane %v6534_v27, 1  ;;  %v9456_v44 = vrot.slane %v6726_v38, 1  ;;  %v2205_v21 = vadd.f32 %v2110_v42, %v1993_v37 }
 0x1b7   : > { %v1399_v63 = vsel %vm1372_vm2, %v9862_v17, %v1398_v15  ;;  %v6772_v55 = vmul.f32 %v5500_v9, %v2611_v10  ;;  %v9457_v6 = vrot.slane %v6739_v18, 2  ;;  %v1279_v17 = vadd.f32 %v6276_v40, %v1224_v23 }
 0x1b8   : > { %v3110_v43 = vsel %vm1649_vm3, %v9864_v36, %v9863_v32  ;;  %v2207_v54 = vadd.f32 %v9865_v62, %v1995_v29  ;;  %v1996_v47 = vadd.f32 %v6552_v26, %v1800_v45  ;;  %v9868_v32 = vrot.slane %v6540_v41, 1  ;;  %v4995_v42 = vpop.eup %4994 }
 0x1b9   : > { %v6769_v39 = vadd.f32 %v3110_v43, %v2919_v24  ;;  %9867 = vst [vmem:[#allocation109_spill] sm:$0xff] %v6772_v55  ;;  %v6781_v29 = vadd.f32 %v1398_v15, %v1282_v11  ;;  %v9458_v37 = vrot.slane %v6754_v60, 2  ;;  %v1494_v24 = vadd.f32 %v1399_v63, %v6558_v35  ;;  %v2565_v35 = vld [vmem:[#allocation2 + $0x94] sm:$0xf] }
 0x1ba   : > { %v6779_v36 = vadd.f32 %v9868_v32, %v2709_v12  ;;  %v9871_v10 = vmov %v9865_v62  ;;  %v6792_v26 = vmul.f32 %v5489_v2, %v6678_v59  ;;  %v9873_v15 = vrot.slane %v6669_v0, 2  ;;  %v4997_v12 = vpop.eup %4996 }
 0x1bb   : > { %9866 = vst [vmem:[#allocation108_spill] sm:$0xff] %v6769_v39  ;;  %9870 = vst [vmem:[#allocation111_spill] sm:$0xff] %v6781_v29  ;;  %v2113_v43 = vsel %vm1372_vm2, %v9871_v10, %v9460_v52  ;;  %v6799_v23 = vunpack.c.l.bf16 %v1129_v8  ;;  %v9874_v27 = vmov %v9868_v32  ;;  %v3275_v59 = vsub.f32 0.0, %v6769_v39  ;;  %v4999_v0 = vpop.eup %4998 }
 0x1bc   : > { %9869 = vst [vmem:[#allocation110_spill] sm:$0xff] %v6779_v36  ;;  %9872 = vst [vmem:[#allocation112_spill] sm:$0xff] %v6792_v26  ;;  %v2398_v45 = vsel %vm1649_vm3, %v9873_v15, %v9459_v7  ;;  %v6806_v11 = vsel %vm1372_vm2, %v9874_v27, %v9456_v44  ;;  %v9876_v62 = vrot.slane %v6537_v49, 2  ;;  %v9877_v8 = vrot.slane %v6548_v13, 2 }
 0x1bd   : > { %9875 = vst [vmem:[#allocation113_spill] sm:$0xff] %v6806_v11  ;;  %v2513_v63 = vadd.f32 %v2398_v45, %v2205_v21  ;;  %v9879_v15 = vrot.slane %v6657_v46, 1  ;;  %v9881_v21 = vrot.slane %v6531_v19, 2  ;;  %v2208_v27 = vadd.f32 %v2113_v43, %v1996_v47  ;;  %v9884_v43 = vld [vmem:[#allocation24_spill] sm:$0xff] }
 0x1be   : > { %v2515_v32 = vadd.f32 %v9876_v62, %v2207_v54  ;;  %v6816_v10 = vsel %vm1649_vm3, %v9877_v8, %v9457_v6  ;;  %v5001_v54 = vpop.eup %5000  ;;  %v6829_v62 = vmul.f32 %v5500_v9, %v6665_v56  ;;  %v9883_v46 = vrot.slane %v6537_v49, 2  ;;  %v1132_v6 = vld [vmem:[#allocation2 + $0xa4] sm:$0xf] }
 0x1bf   : > { %9878 = vst [vmem:[#allocation114_spill] sm:$0xff] %v6816_v10  ;;  %v6820_v41 = vadd.f32 %v9879_v15, %v1279_v17  ;;  %v1692_v45 = vsel %vm1649_vm3, %v9881_v21, %v9461_v31  ;;  %v6838_v8 = vunpack.c.l.bf16 %v2565_v35  ;;  %v5003_v15 = vpop.eup %5002  ;;  %v3418_v19 = vadd.f32 1.0, %v4995_v42  ;;  %v1851_v42 = vld [vmem:[#allocation2 + $0x94] sm:$0xf]  ;;  %v9892_v31 = vld [vmem:[#allocation55_spill] sm:$0xff] }
 0x1c0   : > { %9882 = vst [vmem:[#allocation116_spill] sm:$0xff] %v6829_v62  ;;  %v6831_v44 = vadd.f32 %v1692_v45, %v1494_v24  ;;  %v2403_v17 = vsel %vm1649_vm3, %v9883_v46, %v9458_v37  ;;  %v6842_v47 = vmul.f32 %v5448_v22, %v6799_v23  ;;  %v925_v21 = vmul.f32 %v4997_v12, %v9884_v43  ;;  %v1143_v46 = vld [vmem:[#allocation2 + $0xe0] sm:$0x8] }
 0x1c1   : > { %9880 = vst [vmem:[#allocation115_spill] sm:$0xff] %v6820_v41  ;;  %v6847_v56 = vadd.f32 %v6276_v40, %v6643_v34  ;;  %v6850_v24 = vadd.f32 %v6562_v16, %v2513_v63  ;;  %v3339_v49 = vmul.f32 1.442695, %v3275_v59  ;;  %v2712_v45 = vadd.f32 %v6627_v57, %v2515_v32  ;;  %v9889_v34 = vld [vmem:[#allocation30_spill] sm:$0xff]  ;;  %v9896_v59 = vld [vmem:[#allocation92_spill] sm:$0xff] }
 0x1c2   : > { %v859_v35 = vadd.f32 1.0, %v4999_v0  ;;  %v6853_v37 = vadd.f32 %v2403_v17, %v2208_v27  ;;  %v864_v7 = vadd.f32 1.0, %v5001_v54  ;;  %v9887_v52 = vunpack.c.l.bf16 %v6622_v25  ;;  %v9890_v32 = vld [vmem:[#allocation94_spill] sm:$0xff]  ;;  %v2568_v54 = vld [vmem:[#allocation2 + $0xa4] sm:$0xf] }
 0x1c3   : > { %9885 = vst [vmem:[#allocation24_spill] sm:$0xff] %v6847_v56  ;;  %9886 = vst [vmem:[#allocation117_spill] sm:$0xff] %v6850_v24  ;;  %v6862_v43 = vadd.f32 %v9889_v34, %v5886_v48  ;;  %v6866_v16 = vmul.f32 %v5551_v28, %v6838_v8  ;;  %v4644_v57 = vpack.c.bf16 %v925_v21, %v925_v21  ;;  %v862_v63 = vadd.f32 1.0, %v5003_v15  ;;  %v1854_v48 = vld [vmem:[#allocation2 + $0xa4] sm:$0xf] }
 0x1c4   : > { %v6858_v12 = vmul.f32 %v5489_v2, %v9887_v52  ;;  %5004 = vrcp.f32 %v859_v35  ;;  %v9891_v0 = vunpack.c.l.bf16 %v9890_v32  ;;  %v1191_v52 = vunpack.c.l.bf16 %v1143_v46  ;;  %v9893_v35 = vld [vmem:[#allocation61_spill] sm:$0xff] }
 0x1c5   : > { %5006 = vrcp.f32 %v3418_v19  ;;  %v1180_v27 = vunpack.c.l.bf16 %v1132_v6  ;;  %v1899_v17 = vunpack.c.l.bf16 %v1851_v42  ;;  %1086 = vst [vmem:[#allocation2 + $0xa8] sm:$0xf] %v4644_v57  ;;  %v6876_v21 = vadd.f32 %v9889_v34, %v9892_v31  ;;  %v6887_v6 = vld [vmem:[#allocation2 + $0xd0] sm:$0x8]  ;;  %v9895_v31 = vld [vmem:[#allocation62_spill] sm:$0xff] }
 0x1c6   : > { %9888 = vst [vmem:[#allocation118_spill] sm:$0xff] %v6858_v12  ;;  %v6872_v25 = vmul.f32 %v5500_v9, %v9891_v0  ;;  %5008 = vpow2.f32 %v3339_v49  ;;  %v6880_v15 = vmul.f32 %v5480_v58, %v6799_v23  ;;  %v769_v19 = vsub.f32 0.0, %v6862_v43 }
 0x1c7   : > { %5010 = vrcp.f32 %v864_v7  ;;  %v6885_v46 = vadd.f32 %v9889_v34, %v9893_v35  ;;  %v6892_v42 = vmul.f32 %v6599_v1, %v6838_v8  ;;  %v6896_v57 = vadd.f32 %v9889_v34, %v9895_v31  ;;  %v6898_v7 = vld [vmem:[#allocation2 + $0xd0] sm:$0x8] }
 0x1c8   : > { %5012 = vrcp.f32 %v862_v63  ;;  %v1902_v32 = vunpack.c.l.bf16 %v1854_v48  ;;  %v2616_v0 = vunpack.c.l.bf16 %v2568_v54  ;;  %v9897_v35 = vrot.slane %v6842_v47, 1 }
 0x1c9   : > { %9894 = vst [vmem:[#allocation30_spill] sm:$0xff] %v6892_v42  ;;  %v6904_v10 = vmul.f32 %v5456_v33, %v1191_v52  ;;  %v6907_v49 = vmul.f32 %v5448_v22, %v1180_v27  ;;  %v6910_v63 = vmul.f32 %v5492_v3, %v1899_v17  ;;  %v9898_v31 = vrot.slane %v6866_v16, 1 }
 0x1ca   : > { %v1496_v39 = vadd.f32 %v9897_v35, %v9896_v59  ;;  %v9468_v48 = vrot.slane %v6880_v15, 2  ;;  %v824_v54 = vmul.f32 1.442695, %v769_v19  ;;  %v767_v18 = vsub.f32 0.0, %v6876_v21 }
 0x1cb   : > { %v2924_v13 = vadd.f32 %v9898_v31, %v2712_v45  ;;  %v1232_v52 = vmul.f32 %v5456_v33, %v1180_v27  ;;  %v6920_v35 = vmul.f32 %v5480_v58, %v1180_v27  ;;  %v772_v38 = vsub.f32 0.0, %v6885_v46 }
 0x1cc   : > { %v6925_v45 = vmul.f32 %v5489_v2, %v1902_v32  ;;  %v6928_v31 = vmul.f32 %v5492_v3, %v1902_v32  ;;  %v1805_v19 = vadd.f32 %v9468_v48, %v1496_v39  ;;  %v770_v59 = vsub.f32 0.0, %v6896_v57  ;;  %v9904_v39 = vld [vmem:[#allocation23_spill] sm:$0xff] }
 0x1cd   : > { %v6935_v27 = vmul.f32 %v5495_v4, %v1902_v32  ;;  %v9900_v24 = vrot.slane %v6892_v42, 2  ;;  %v6945_v62 = vmul.f32 %v5500_v9, %v2616_v0  ;;  %5014 = vpow2.f32 %v824_v54  ;;  %v9912_v32 = vld [vmem:[#allocation38_spill] sm:$0xff] }
 0x1ce   : > { %9899 = vst [vmem:[#allocation94_spill] sm:$0xff] %v6925_v45  ;;  %v5005_v36 = vpop.eup %5004  ;;  %v820_v60 = vmul.f32 1.442695, %v767_v18  ;;  %v6949_v11 = vadd.f32 %v6276_v40, %v1232_v52  ;;  %v6953_v50 = vmul.f32 %v5495_v4, %v1899_v17  ;;  %v6957_v5 = vmul.f32 %v5551_v28, %v2616_v0 }
 0x1cf   : > { %v6940_v53 = vadd.f32 %v9900_v24, %v2924_v13  ;;  %v6942_v55 = vpop.eup %5006  ;;  %9903 = vst [vmem:[#allocation62_spill] sm:$0xff] %v6945_v62  ;;  %v923_v48 = vmul.f32 %v5005_v36, %v9904_v39  ;;  %v830_v13 = vmul.f32 1.442695, %v772_v38  ;;  %v9906_v62 = vld [vmem:[#allocation90_spill] sm:$0xff]  ;;  %v826_v54 = vmul.f32 1.442695, %v770_v59 }
 0x1d0   : > { %9902 = vst [vmem:[#allocation61_spill] sm:$0xff] %v6942_v55  ;;  %v5009_v30 = vpop.eup %5008  ;;  %9905 = vst [vmem:[#allocation92_spill] sm:$0xff] %v6957_v5  ;;  %v2001_v36 = vadd.f32 %v9906_v62, %v1805_v19  ;;  %v9907_v39 = vld [vmem:[#allocation42_spill] sm:$0xff]  ;;  %v9908_v52 = vrot.slane %v6907_v49, 1  ;;  %v9910_v26 = vrot.slane %v6910_v63, 1  ;;  %v6969_v55 = vmul.f32 %v6599_v1, %v2616_v0  ;;  %v9914_v0 = vld [vmem:[#allocation47_spill] sm:$0xff] }
 0x1d1   : > { %9901 = vst [vmem:[#allocation55_spill] sm:$0xff] %v6940_v53  ;;  %v5011_v24 = vpop.eup %5010  ;;  %v3280_v29 = vsub.f32 0.0, %v6940_v53  ;;  %v1229_v62 = vmul.f32 %v5456_v33, %v6799_v23  ;;  %v4642_v59 = vpack.c.bf16 %v923_v48, %v923_v48  ;;  %5016 = vpow2.f32 %v820_v60 }
 0x1d2   : > { %v5013_v18 = vpop.eup %5012  ;;  %v1499_v61 = vadd.f32 %v9908_v52, %v9907_v39  ;;  %v2210_v38 = vadd.f32 %v9910_v26, %v9909_v51  ;;  %9911 = vst [vmem:[#allocation23_spill] sm:$0xff] %v6969_v55  ;;  %v1951_v19 = vmul.f32 %v5489_v2, %v1899_v17  ;;  %v9476_v39 = vrot.slane %v6953_v50, 2  ;;  %v1133_v52 = vld [vmem:[#allocation2 + $0xa8] sm:$0xf] }
 0x1d3   : > { %v928_v41 = vmul.f32 %v5011_v24, %v9912_v32  ;;  %5018 = vpow2.f32 %v830_v13  ;;  %v3419_v14 = vadd.f32 1.0, %v5009_v30  ;;  %v9913_v51 = vrot.slane %v6928_v31, 1  ;;  %1084 = vst [vmem:[#allocation2 + $0x98] sm:$0xf] %v4642_v59  ;;  %v3644_v24 = vld [vmem:[%s9370_s5] sm:$0xff] }
 0x1d4   : > { %v926_v53 = vmul.f32 %v5013_v18, %v9914_v0  ;;  %5020 = vpow2.f32 %v826_v54  ;;  %v9915_v23 = vrot.slane %v6920_v35, 2  ;;  %v2518_v60 = vadd.f32 %v9476_v39, %v2210_v38  ;;  %v9916_v18 = vld [vmem:[#allocation70_spill] sm:$0xff]  ;;  %v9922_v0 = vld [vmem:[#allocation97_spill] sm:$0xff] }
 0x1d5   : > { %v2213_v26 = vadd.f32 %v9913_v51, %v2001_v36  ;;  %v3349_v17 = vmul.f32 1.442695, %v3280_v29  ;;  %v4647_v20 = vpack.c.bf16 %v928_v41, %v928_v41  ;;  %v2665_v30 = vmul.f32 %v5500_v9, %v6838_v8  ;;  %v1855_v29 = vld [vmem:[#allocation2 + $0xa8] sm:$0xf]  ;;  %v9933_v39 = vld [vmem:[#allocation78_spill] sm:$0xff] }
 0x1d6   : > { %v1808_v48 = vadd.f32 %v9915_v23, %v1499_v61  ;;  %v1181_v32 = vunpack.c.l.bf16 %v1133_v52  ;;  %v4645_v13 = vpack.c.bf16 %v926_v53, %v926_v53  ;;  %v6991_v61 = vadd.f32 %v6276_v40, %v1229_v62  ;;  %v2569_v41 = vld [vmem:[#allocation2 + $0xa8] sm:$0xf]  ;;  %v9920_v52 = vld [vmem:[#allocation95_spill] sm:$0xff] }
 0x1d7   : > { %v6994_v54 = vadd.f32 %v1951_v19, %v6831_v44  ;;  %1089 = vst [vmem:[#allocation2 + $0xc4] sm:$0xf] %v4647_v20  ;;  %v6998_v8 = vadd.f32 %v9889_v34, %v9916_v18  ;;  %v3645_v53 = vld [vmem:[%s9370_s5 + $0x8] sm:$0xff]  ;;  %v5015_v38 = vpop.eup %5014  ;;  %5022 = vrcp.f32 %v3419_v14  ;;  %v7004_v59 = vadd.f32 %v2665_v30, %v6853_v37  ;;  %v3646_v14 = vld [vmem:[%s9370_s5 + $0x10] sm:$0xff]  ;;  %v3647_v37 = vld [vmem:[%s9370_s5 + $0x18] sm:$0xff] }
 0x1d8   : > { %1087 = vst [vmem:[#allocation2 + $0xb4] sm:$0xf] %v4645_v13  ;;  %v9918_v44 = vrot.slane %v6935_v27, 2  ;;  %v9919_v19 = vunpack.c.l.bf16 %v6887_v6  ;;  %v7012_v51 = vadd.f32 %v9920_v52, %v2518_v60  ;;  %5024 = vpow2.f32 %v3349_v17  ;;  %v7026_v13 = vld [vmem:[#allocation2 + $0xf0] sm:$0x8] }
 0x1d9   : > { %9917 = vst [vmem:[#allocation90_spill] sm:$0xff] %v6998_v8  ;;  %v7015_v23 = vadd.f32 %v9922_v0, %v1808_v48  ;;  %v1903_v6 = vunpack.c.l.bf16 %v1855_v29  ;;  %v2617_v30 = vunpack.c.l.bf16 %v2569_v41  ;;  %v9477_v60 = vmov 0.0|0.0  }
 0x1da   : > { %v2521_v62 = vadd.f32 %v9918_v44, %v2213_v26  ;;  %v1240_v20 = vmul.f32 %v5456_v33, %v9919_v19  ;;  %9921 = vst [vmem:[#allocation42_spill] sm:$0xff] %v7012_v51  ;;  %v7024_v26 = vmul.f32 %v5448_v22, %v1181_v32  ;;  %4839 = vmatprep.subr.bf16.mxu1 %v9477_v60  ;;  %v865_v17 = vadd.f32 1.0, %v5015_v38  ;;  %v1130_v12 = vld [vmem:[#allocation2 + $0x98] sm:$0xf] }
 0x1db   : > { %9923 = vst [vmem:[#allocation93_spill] sm:$0xff] %v7015_v23  ;;  %v4840_v48 = vpack.c.bf16 %v3645_v53, %v3644_v24  ;;  %v7031_v18 = vadd.f32 %v6276_v40, %v6904_v10  ;;  %v9925_v44 = vunpack.c.l.bf16 %v6898_v7  ;;  %v773_v52 = vsub.f32 0.0, %v6998_v8  ;;  %v5017_v29 = vpop.eup %5016  ;;  %v9929_v24 = vld [vmem:[#allocation27_spill] sm:$0xff]  ;;  %v1852_v51 = vld [vmem:[#allocation2 + $0x98] sm:$0xf] }
 0x1dc   : > { %v7040_v41 = vadd.f32 %v6872_v25, %v2521_v62  ;;  %v7043_v0 = vadd.f32 %v6276_v40, %v1240_v20  ;;  %v7047_v53 = vadd.f32 %v9889_v34, %v9929_v24  ;;  %v4843_v10 = vpack.c.bf16 %v3647_v37, %v3646_v14  ;;  %v3648_v62 = vld [vmem:[%s9370_s5 + $0x20] sm:$0xff]  ;;  %v3649_v20 = vld [vmem:[%s9370_s5 + $0x28] sm:$0xff]  ;;  %v2566_v42 = vld [vmem:[#allocation2 + $0x98] sm:$0xf] }
 0x1dd   : > { %9924 = vst [vmem:[#allocation38_spill] sm:$0xff] %v7031_v18  ;;  %v7036_v19 = vmul.f32 %v5489_v2, %v9925_v44  ;;  %4841 = vmatpush3.bf16.msra.mxu1 %v4840_v48  ;;  %v5019_v38 = vpop.eup %5018  ;;  %v1233_v7 = vmul.f32 %v5456_v33, %v1181_v32  ;;  %v9931_v44 = vld [vmem:[#allocation73_spill] sm:$0xff]  ;;  %v7056_v25 = vadd.f32 %v9889_v34, %v9933_v39  ;;  %v1404_v37 = vrot.slane %v7024_v26, 1  ;;  %v9936_v24 = vld [vmem:[#allocation11_spill] sm:$0xff] }
 0x1de   : > { %9927 = vst [vmem:[#allocation70_spill] sm:$0xff] %v7040_v41  ;;  %9928 = vst [vmem:[#allocation95_spill] sm:$0xff] %v7043_v0  ;;  %v7052_v36 = vadd.f32 %v9889_v34, %v9931_v44  ;;  %4842 = vmatprep.subr.bf16.mxu1 %v9477_v60  ;;  %v5021_v14 = vpop.eup %5020  ;;  %v7068_v48 = vmul.f32 %v5492_v3, %v1903_v6  ;;  %v7071_v39 = vmul.f32 %v5551_v28, %v2617_v30 }
 0x1df   : > { %9926 = vst [vmem:[#allocation47_spill] sm:$0xff] %v7036_v19  ;;  %9930 = vst [vmem:[#allocation97_spill] sm:$0xff] %v7047_v53  ;;  %v7075_v44 = vadd.f32 %v9889_v34, %v9936_v24  ;;  %v7078_v40 = vmul.f32 %v5480_v58, %v1181_v32  ;;  %5026 = vrcp.f32 %v865_v17  ;;  %v863_v60 = vadd.f32 1.0, %v5017_v29  ;;  %v7089_v24 = vld [vmem:[%s9369_s4] ss:$0 sm:$0xff] }
 0x1e0   : > { %9932 = vst [vmem:[#allocation27_spill] sm:$0xff] %v7052_v36  ;;  %9934 = vst [vmem:[#allocation73_spill] sm:$0xff] %v7068_v48  ;;  %v7080_v55 = vmul.f32 1.442695, %v773_v52  ;;  %v7083_v26 = vmul.f32 %v5495_v4, %v1903_v6  ;;  %v868_v0 = vadd.f32 1.0, %v5019_v38  ;;  %v771_v18 = vsub.f32 0.0, %v7047_v53 }
 0x1e1   : > { %9935 = vst [vmem:[#allocation78_spill] sm:$0xff] %v7071_v39  ;;  %9937 = vst [vmem:[#allocation11_spill] sm:$0xff] %v7078_v40  ;;  %4844 = vmatpush3.bf16.msra.mxu1 %v4843_v10  ;;  %v4846_v8 = vpack.c.bf16 %v3649_v20, %v3648_v62  ;;  %v1288_v32 = vadd.f32 %v7089_v24, %v1233_v7  ;;  %v7093_v17 = vmul.f32 %v6599_v1, %v2617_v30  ;;  %v9940_v19 = vmov 0.0|0.0   ;;  %v3650_v10 = vld [vmem:[%s9370_s5 + $0x30] sm:$0xff]  ;;  %v3651_v38 = vld [vmem:[%s9370_s5 + $0x38] sm:$0xff]  ;;  %v7103_v62 = vpop.eup %5022 }
 0x1e2   : > { %9938 = vst [vmem:[#allocation119_spill] sm:$0xff] %v7083_v26  ;;  %v866_v52 = vadd.f32 1.0, %v5021_v14  ;;  %v776_v29 = vsub.f32 0.0, %v7052_v36  ;;  %4845 = vmatprep.subr.bf16.mxu1 %v9940_v19  ;;  %9941 = vst [vmem:[#allocation121_spill] sm:$0xff] %v7103_v62  ;;  %v9942_v7 = vrot.slane %v6907_v49, 1  ;;  %v9485_v36 = vrot.slane %v7071_v39, 1  ;;  %v5025_v41 = vpop.eup %5024 }
 0x1e3   : > { %9939 = vst [vmem:[#allocation120_spill] sm:$0xff] %v7093_v17  ;;  %v1178_v53 = vunpack.c.l.bf16 %v1130_v12  ;;  %v7112_v56 = vmul.f32 %v5489_v2, %v1903_v6  ;;  %v1900_v45 = vunpack.c.l.bf16 %v1852_v51  ;;  %5028 = vrcp.f32 %v863_v60  ;;  %v3652_v51 = vld [vmem:[%s9370_s5 + $0x40] sm:$0xff]  ;;  %v3653_v6 = vld [vmem:[%s9370_s5 + $0x48] sm:$0xff] }
 0x1e4   : > { %v1405_v20 = vsel %vm1372_vm2, %v9942_v7, %v1404_v37  ;;  %v9489_v62 = vrot.slane %v7083_v26, 2  ;;  %v7116_v49 = vmul.f32 %v5500_v9, %v2617_v30  ;;  %5030 = vrcp.f32 %v868_v0  ;;  %v10018_v26 = vld [vmem:[#allocation90_spill] sm:$0xff] }
 0x1e5   : > { %9943 = vst [vmem:[#allocation122_spill] sm:$0xff] %v7112_v56  ;;  %4847 = vmatpush3.bf16.msra.mxu1 %v4846_v8  ;;  %v4849_v7 = vpack.c.bf16 %v3651_v38, %v3650_v10  ;;  %v7118_v14 = vadd.f32 %v1404_v37, %v1288_v32  ;;  %v1500_v23 = vadd.f32 %v1405_v20, %v6949_v11  ;;  %5032 = vrcp.f32 %v866_v52 }
 0x1e6   : > { %9944 = vst [vmem:[#allocation123_spill] sm:$0xff] %v7116_v49  ;;  %4848 = vmatprep.subr.bf16.mxu1 %v9940_v19  ;;  %v9946_v8 = vrot.slane %v7068_v48, 1  ;;  %v9947_v30 = vrot.slane %v6928_v31, 1  ;;  %v9948_v11 = vrot.slane %v6957_v5, 1  ;;  %v1327_v37 = vmul.f32 %v5448_v22, %v1178_v53 }
 0x1e7   : > { %9945 = vst [vmem:[#allocation124_spill] sm:$0xff] %v7118_v14  ;;  %v2614_v32 = vunpack.c.l.bf16 %v2566_v42  ;;  %v3424_v52 = vadd.f32 1.0, %v5025_v41  ;;  %v7145_v10 = vmul.f32 %v5492_v3, %v1900_v45  ;;  %v9951_v38 = vrot.slane %v7078_v40, 2 }
 0x1e8   : > { %v7134_v60 = vsel %vm1372_vm2, %v9947_v30, %v9946_v8  ;;  %v7141_v0 = vsel %vm1372_vm2, %v9948_v11, %v9485_v36  ;;  %v9952_v31 = vrot.slane %v6920_v35, 2  ;;  %v774_v8 = vsub.f32 0.0, %v7056_v25 }
 0x1e9   : > { %9949 = vst [vmem:[#allocation125_spill] sm:$0xff] %v7141_v0  ;;  %9950 = vst [vmem:[#allocation126_spill] sm:$0xff] %v7145_v10  ;;  %v1230_v30 = vmul.f32 %v5456_v33, %v1178_v53  ;;  %v7155_v11 = vmul.f32 %v5480_v58, %v1178_v53  ;;  %v9954_v42 = vrot.slane %v6935_v27, 2  ;;  %4850 = vmatpush3.bf16.msra.mxu1 %v4849_v7  ;;  %v5027_v36 = vpop.eup %5026  ;;  %v777_v53 = vsub.f32 0.0, %v7075_v44  ;;  %v9958_v7 = vld [vmem:[#allocation83_spill] sm:$0xff] }
 0x1ea   : > { %v1702_v20 = vsel %vm1649_vm3, %v9952_v31, %v9951_v38  ;;  %v4852_v12 = vpack.c.bf16 %v3653_v6, %v3652_v51  ;;  %v828_v38 = vmul.f32 1.442695, %v771_v18  ;;  %v9955_v31 = vunpack.c.l.bf16 %v7026_v13  ;;  %4851 = vmatprep.subr.bf16.mxu1 %v9940_v19 }
 0x1eb   : > { %9953 = vst [vmem:[#allocation127_spill] sm:$0xff] %v7155_v11  ;;  %v7162_v41 = vsel %vm1649_vm3, %v9954_v42, %v9489_v62  ;;  %v7164_v35 = vadd.f32 %v1702_v20, %v1500_v23  ;;  %v1401_v39 = vrot.slane %v1327_v37, 1  ;;  %v7172_v27 = vmul.f32 %v5495_v4, %v1900_v45  ;;  %v1138_v20 = vld [vmem:[#allocation2 + $0xc4] sm:$0xf] }
 0x1ec   : > { %v1246_v17 = vmul.f32 %v5456_v33, %v9955_v31  ;;  %v7175_v42 = vmul.f32 %v5551_v28, %v2614_v32  ;;  %v7179_v23 = vadd.f32 %v9889_v34, %v9958_v7  ;;  %5034 = vrcp.f32 %v3424_v52  ;;  %v1135_v52 = vld [vmem:[#allocation2 + $0xb4] sm:$0xf] }
 0x1ed   : > { %9956 = vst [vmem:[#allocation128_spill] sm:$0xff] %v7172_v27  ;;  %v9491_v13 = vrot.slane %v7145_v10, 1  ;;  %v7182_v18 = vmul.f32 1.442695, %v776_v29  ;;  %v7184_v51 = vmul.f32 1.442695, %v774_v8  ;;  %v1285_v6 = vadd.f32 %v7089_v24, %v1230_v30  ;;  %4853 = vmatpush3.bf16.msra.mxu1 %v4852_v12  ;;  %v5029_v62 = vpop.eup %5028 }
 0x1ee   : > { %9957 = vst [vmem:[#allocation129_spill] sm:$0xff] %v7175_v42  ;;  %v929_v31 = vmul.f32 %v5027_v36, %v6862_v43  ;;  %5036 = vpow2.f32 %v7080_v55  ;;  %v7191_v34 = vmul.f32 %v6599_v1, %v2614_v32  ;;  %v7194_v29 = vadd.f32 %v7089_v24, %v1246_v17  ;;  %4854 = vmatprep.subr.bf16.mxu1 %v9940_v19  ;;  %v5031_v30 = vpop.eup %5030  ;;  %v434_v10 = vld [vmem:[#allocation2 + $0x4c] sm:$0x1] }
 0x1ef   : > { %5038 = vpow2.f32 %v828_v38  ;;  %v7196_v8 = vmul.f32 1.442695, %v777_v53  ;;  %v9961_v7 = vrot.slane %v6842_v47, 1  ;;  %v5033_v37 = vpop.eup %5032  ;;  %v7206_v38 = vmul.f32 %v5489_v2, %v1900_v45 }
 0x1f0   : > { %9959 = vst [vmem:[#allocation83_spill] sm:$0xff] %v7191_v34  ;;  %9960 = vst [vmem:[#allocation130_spill] sm:$0xff] %v7194_v29  ;;  %v9963_v17 = vrot.slane %v6910_v63, 1  ;;  %v7214_v47 = vmul.f32 %v5500_v9, %v2614_v32  ;;  %v7216_v0 = vadd.f32 %v1401_v39, %v1285_v6  ;;  %v9966_v36 = vrot.slane %v7155_v11, 2  ;;  %v449_v11 = vld [vmem:[#allocation2 + $0x9c] sm:$0x1] }
 0x1f1   : > { %v1402_v43 = vsel %vm1372_vm2, %v9961_v7, %v1401_v39  ;;  %9962 = vst [vmem:[#allocation131_spill] sm:$0xff] %v7206_v38  ;;  %v1186_v7 = vunpack.c.l.bf16 %v1138_v20  ;;  %v9967_v12 = vrot.slane %v6880_v15, 2  ;;  %v7223_v45 = vunpack.c.l.bf16 %v1135_v52 }
 0x1f2   : > { %v2116_v53 = vsel %vm1372_vm2, %v9963_v17, %v9491_v13  ;;  %9964 = vst [vmem:[#allocation132_spill] sm:$0xff] %v7214_v47  ;;  %9965 = vst [vmem:[#allocation133_spill] sm:$0xff] %v7216_v0  ;;  %v4648_v5 = vpack.c.bf16 %v929_v31, %v929_v31  ;;  %v1497_v49 = vadd.f32 %v1402_v43, %v6991_v61  ;;  %v9494_v63 = vrot.slane %v7191_v34, 2  ;;  %v1860_v43 = vld [vmem:[#allocation2 + $0xc4] sm:$0xf] }
 0x1f3   : > { %v1697_v55 = vsel %vm1649_vm3, %v9967_v12, %v9966_v36  ;;  %v927_v17 = vmul.f32 %v5029_v62, %v6876_v21  ;;  %v932_v32 = vmul.f32 %v5031_v30, %v6885_v46  ;;  %v2211_v39 = vadd.f32 %v2116_v53, %v6994_v54  ;;  %v3654_v46 = vld [vmem:[%s9370_s5 + $0x50] sm:$0xff]  ;;  %v3657_v53 = vld [vmem:[%s9370_s5 + $0x68] sm:$0xff] }
 0x1f4   : > { %v9968_v6 = vrot.slane %v7172_v27, 2  ;;  %v9969_v20 = vrot.slane %v6953_v50, 2  ;;  %v9970_v52 = vrot.slane %v7175_v42, 1  ;;  %v9971_v31 = vrot.slane %v6866_v16, 1  ;;  %1090 = vst [vmem:[#allocation2 + $0xc8] sm:$0xf] %v4648_v5 }
 0x1f5   : > { %v930_v21 = vmul.f32 %v5033_v37, %v6896_v57  ;;  %v3655_v50 = vld [vmem:[%s9370_s5 + $0x58] sm:$0xff]  ;;  %v1238_v62 = vmul.f32 %v5456_v33, %v1186_v7  ;;  %v1857_v16 = vld [vmem:[#allocation2 + $0xb4] sm:$0xf]  ;;  %v4646_v30 = vpack.c.bf16 %v927_v17, %v927_v17  ;;  %v4651_v36 = vpack.c.bf16 %v932_v32, %v932_v32  ;;  %v446_v0 = vld [vmem:[#allocation2 + $0x8c] sm:$0x1] }
 0x1f6   : > { %v2408_v15 = vsel %vm1649_vm3, %v9969_v20, %v9968_v6  ;;  %v2830_v61 = vsel %vm1372_vm2, %v9971_v31, %v9970_v52  ;;  %v7252_v5 = vmul.f32 %v5448_v22, %v1186_v7  ;;  %v7255_v57 = vmul.f32 %v5480_v58, %v1186_v7  ;;  %v7267_v17 = vpop.eup %5034  ;;  %v9974_v7 = vld [vmem:[#allocation30_spill] sm:$0xff]  ;;  %v2574_v31 = vld [vmem:[#allocation2 + $0xc4] sm:$0xf] }
 0x1f7   : > { %v7248_v54 = vadd.f32 %v2830_v61, %v7004_v59  ;;  %v7259_v37 = vmul.f32 %v5448_v22, %v7223_v45  ;;  %v4649_v12 = vpack.c.bf16 %v930_v21, %v930_v21  ;;  %v3656_v59 = vld [vmem:[%s9370_s5 + $0x60] sm:$0xff]  ;;  %9973 = vst [vmem:[#allocation135_spill] sm:$0xff] %v7267_v17  ;;  %v1806_v32 = vadd.f32 %v1697_v55, %v1497_v49  ;;  %v394_v21 = vld [vmem:[#allocation2 + $0xc] sm:$0x1]  ;;  %v425_v17 = vld [vmem:[#allocation2 + $0x1c] sm:$0x1] }
 0x1f8   : > { %v9975_v6 = vrot.slane %v9974_v7, 2  ;;  %v1908_v52 = vunpack.c.l.bf16 %v1860_v43  ;;  %1088 = vst [vmem:[#allocation2 + $0xb8] sm:$0xf] %v4646_v30  ;;  %1093 = vst [vmem:[#allocation2 + $0xe4] sm:$0xf] %v4651_v36  ;;  %v4855_v61 = vpack.c.bf16 %v3655_v50, %v3654_v46  ;;  %v5037_v13 = vpop.eup %5036  ;;  %v7278_v42 = vadd.f32 %v2408_v15, %v2211_v39  ;;  %v3658_v46 = vld [vmem:[%s9370_s5 + $0x70] sm:$0xff] }
 0x1f9   : > { %9972 = vst [vmem:[#allocation134_spill] sm:$0xff] %v7248_v54  ;;  %v7276_v54 = vunpack.c.l.bf16 %v1857_v16  ;;  %1091 = vst [vmem:[#allocation2 + $0xd4] sm:$0xf] %v4649_v12  ;;  %v428_v49 = vld [vmem:[#allocation2 + $0x2c] sm:$0x1]  ;;  %v5039_v34 = vpop.eup %5038  ;;  %v7281_v7 = vadd.f32 %v7089_v24, %v1238_v62  ;;  %v4858_v30 = vpack.c.bf16 %v3657_v53, %v3656_v59  ;;  %v3659_v50 = vld [vmem:[%s9370_s5 + $0x78] sm:$0xff]  ;;  %v2622_v62 = vunpack.c.l.bf16 %v2574_v31 }
 0x1fa   : > { %v7274_v20 = vsel %vm1649_vm3, %v9975_v6, %v9494_v63  ;;  %v431_v55 = vld [vmem:[#allocation2 + $0x3c] sm:$0x1]  ;;  %9977 = vst [vmem:[#allocation136_spill] sm:$0xff] %v7278_v42  ;;  %v2571_v43 = vld [vmem:[#allocation2 + $0xb4] sm:$0xf]  ;;  %4856 = vmatpush3.bf16.msra.mxu1 %v4855_v61  ;;  %v9495_v16 = vmov 0.0   ;;  %v7301_v53 = vmul.f32 %v5489_v2, %v1908_v52  ;;  %v7304_v6 = vmul.f32 %v5492_v3, %v1908_v52 }
 0x1fb   : > { %9976 = vst [vmem:[#allocation30_spill] sm:$0xff] %v7274_v20  ;;  %4783 = vmatprep.mubr.msk.f32.mxu1 %vm5261_vm5, %v9495_v16  ;;  %4857 = vmatprep.subr.bf16.mxu1 %v9940_v19  ;;  %v401_v59 = vld [vmem:[#allocation2 + $0x11c] sm:$0x1]  ;;  %v7308_v61 = vmul.f32 %v5480_v58, %v7223_v45  ;;  %v7313_v15 = vmul.f32 %v5492_v3, %v7276_v54  ;;  %v2619_v16 = vunpack.c.l.bf16 %v2571_v43  ;;  %v395_v36 = vsel %vm7296_vm7, 0, %v394_v21 }
 0x1fc   : > { %9980 = vst [vmem:[#allocation137_spill] sm:$0xff] %v7301_v53  ;;  %v9981_v31 = vld [vmem:[#allocation94_spill] sm:$0xff]  ;;  %v4861_v39 = vpack.c.bf16 %v3659_v50, %v3658_v46  ;;  %396 = vst [vmem:[#allocation2 + $0xc] sm:$0x1] %v395_v36  ;;  %v402_v20 = vsel %vm7296_vm7, 0, %v401_v59  ;;  %v426_v42 = vsel %vm7296_vm7, 0, %v425_v17  ;;  %v7326_v43 = vmul.f32 %v5495_v4, %v1908_v52 }
 0x1fd   : > { %v2002_v63 = vadd.f32 %v9981_v31, %v1806_v32  ;;  %v429_v32 = vsel %vm7296_vm7, 0, %v428_v49  ;;  %v432_v31 = vsel %vm7296_vm7, 0, %v431_v55  ;;  %v7329_v46 = vmul.f32 %v5500_v9, %v2622_v62  ;;  %403 = vst [vmem:[#allocation2 + $0x11c] sm:$0x1] %v402_v20  ;;  %427 = vst [vmem:[#allocation2 + $0x1c] sm:$0x1] %v426_v42 }
 0x1fe   : > { %4859 = vmatpush3.bf16.msra.mxu1 %v4858_v30  ;;  %9982 = vst [vmem:[#allocation94_spill] sm:$0xff] %v7326_v43  ;;  %v7332_v21 = vmul.f32 %v5551_v28, %v2622_v62  ;;  %v9985_v30 = vld [vmem:[#allocation24_spill] sm:$0xff]  ;;  %v9986_v50 = vrot.slane %v7259_v37, 1  ;;  %430 = vst [vmem:[#allocation2 + $0x2c] sm:$0x1] %v429_v32  ;;  %v9987_v17 = vld [vmem:[#allocation17_spill] sm:$0xff]  ;;  %v7342_v55 = vmul.f32 %v6599_v1, %v2622_v62  ;;  %5040 = vpow2.f32 %v7182_v18 }
 0x1ff   : > { %9983 = vst [vmem:[#allocation138_spill] sm:$0xff] %v7329_v46  ;;  %4860 = vmatprep.subr.bf16.mxu1 %v9940_v19  ;;  %433 = vst [vmem:[#allocation2 + $0x3c] sm:$0x1] %v432_v31  ;;  %v9988_v52 = vrot.slane %v7252_v5, 1  ;;  %v2214_v59 = vadd.f32 %v7134_v60, %v2002_v63  ;;  %v869_v46 = vadd.f32 1.0, %v5037_v13  ;;  %v1235_v47 = vmul.f32 %v5456_v33, %v7223_v45  ;;  %v9994_v13 = vld [vmem:[#allocation93_spill] sm:$0xff] }
 0x200   : > { %9984 = vst [vmem:[#allocation139_spill] sm:$0xff] %v7332_v21  ;;  %v1502_v36 = vadd.f32 %v9986_v50, %v9985_v30  ;;  %9989 = vst [vmem:[#allocation24_spill] sm:$0xff] %v7342_v55  ;;  %v9497_v30 = vrot.slane %v7308_v61, 2  ;;  %v9498_v19 = vrot.slane %v7313_v15, 1  ;;  %v867_v42 = vadd.f32 1.0, %v5039_v34 }
 0x201   : > { %v1505_v49 = vadd.f32 %v9988_v52, %v9987_v17  ;;  %v7352_v32 = vmul.f32 %v5495_v4, %v7276_v54  ;;  %v7355_v62 = vmul.f32 %v5551_v28, %v2619_v16  ;;  %v7358_v60 = vmul.f32 %v6599_v1, %v2619_v16  ;;  %v1139_v17 = vld [vmem:[#allocation2 + $0xc8] sm:$0xf]  ;;  %v1868_v31 = vld [vmem:[#allocation2 + $0xf0] sm:$0x8] }
 0x202   : > { %4862 = vmatpush3.bf16.msra.mxu1 %v4861_v39  ;;  %v1811_v45 = vadd.f32 %v9497_v30, %v1502_v36  ;;  %v1957_v34 = vmul.f32 %v5489_v2, %v7276_v54  ;;  %v9992_v63 = vmov 0.0   ;;  %v2522_v1 = vadd.f32 %v7162_v41, %v2214_v59  ;;  %v1861_v54 = vld [vmem:[#allocation2 + $0xc8] sm:$0xf]  ;;  %v1865_v30 = vld [vmem:[#allocation2 + $0xe0] sm:$0x8] }
 0x203   : > { %9990 = vst [vmem:[#allocation17_spill] sm:$0xff] %v7355_v62  ;;  %9991 = vst [vmem:[#allocation140_spill] sm:$0xff] %v7358_v60  ;;  %4786 = vmatprep.subr.mxu1 %v9992_v63  ;;  %5042 = vrcp.f32 %v869_v46  ;;  %v9993_v39 = vrot.slane %v7255_v57, 2  ;;  %v7373_v36 = vadd.f32 %v7089_v24, %v1235_v47  ;;  %v2216_v18 = vadd.f32 %v9498_v19, %v9994_v13  ;;  %v2575_v19 = vld [vmem:[#allocation2 + $0xc8] sm:$0xf] }
 0x204   : > { %5044 = vrcp.f32 %v867_v42  ;;  %v2671_v41 = vmul.f32 %v5500_v9, %v2619_v16  ;;  %v9505_v46 = vrot.slane %v7355_v62, 1  ;;  %v7385_v47 = vadd.f32 %v1957_v34, %v7164_v35  ;;  %v1136_v42 = vld [vmem:[#allocation2 + $0xb8] sm:$0xf] }
 0x205   : > { %v1814_v52 = vadd.f32 %v9993_v39, %v1505_v49  ;;  %v7382_v49 = vld [vmem:[#allocation2 + $0x100] sm:$0x8]  ;;  %v9996_v39 = vld [vmem:[#allocation118_spill] sm:$0xff]  ;;  %v1187_v13 = vunpack.c.l.bf16 %v1139_v17  ;;  %v9997_v63 = vsub.f32 0.0, %v7179_v23  ;;  %v1909_v59 = vunpack.c.l.bf16 %v1861_v54 }
 0x206   : > { %9995 = vst [vmem:[#allocation93_spill] sm:$0xff] %v7382_v49  ;;  %v2007_v20 = vadd.f32 %v9996_v39, %v1811_v45  ;;  %v7390_v50 = vadd.f32 %v2671_v41, %v2522_v1  ;;  %v9999_v16 = vld [vmem:[#allocation70_spill] sm:$0xff]  ;;  %5046 = vpow2.f32 %v7184_v51  ;;  %v10001_v35 = vrot.slane %v7352_v32, 2  ;;  %v10003_v45 = vld [vmem:[#allocation47_spill] sm:$0xff] }
 0x207   : > { %v836_v55 = vmul.f32 1.442695, %v9997_v63  ;;  %v7395_v21 = vadd.f32 %v9505_v46, %v9999_v16  ;;  %v7403_v17 = vadd.f32 %v10003_v45, %v1814_v52  ;;  %v1913_v39 = vunpack.c.l.bf16 %v1865_v30  ;;  %v7405_v63 = vld [vmem:[#allocation2 + $0xc0] sm:$0x8]  ;;  %v7409_v16 = vld [vmem:[#allocation2 + $0xd0] sm:$0x8] }
 0x208   : > { %9998 = vst [vmem:[#allocation118_spill] sm:$0xff] %v7390_v50  ;;  %v7400_v34 = vadd.f32 %v10001_v35, %v2216_v18  ;;  %v1916_v60 = vunpack.c.l.bf16 %v1868_v31  ;;  %10004 = vst [vmem:[#allocation47_spill] sm:$0xff] %v7405_v63  ;;  %v2623_v1 = vunpack.c.l.bf16 %v2575_v19  ;;  %v1184_v41 = vunpack.c.l.bf16 %v1136_v42  ;;  %v1858_v50 = vld [vmem:[#allocation2 + $0xb8] sm:$0xf]  ;;  %v5041_v35 = vpop.eup %5040  ;;  %v440_v63 = vld [vmem:[#allocation2 + $0x6c] sm:$0x1] }
 0x209   : > { %10000 = vst [vmem:[#allocation70_spill] sm:$0xff] %v7395_v21  ;;  %5048 = vpow2.f32 %v7196_v8  ;;  %10005 = vst [vmem:[#allocation142_spill] sm:$0xff] %v7409_v16  ;;  %v1239_v51 = vmul.f32 %v5456_v33, %v1187_v13  ;;  %v1333_v18 = vmul.f32 %v5448_v22, %v1187_v13  ;;  %v7414_v52 = vmul.f32 %v5480_v58, %v1187_v13 }
 0x20a   : > { %10002 = vst [vmem:[#allocation141_spill] sm:$0xff] %v7400_v34  ;;  %5050 = vpow2.f32 %v836_v55  ;;  %v7417_v30 = vmul.f32 %v5492_v3, %v1909_v59  ;;  %v7420_v19 = vmul.f32 %v5495_v4, %v1909_v59  ;;  %v10008_v8 = vrot.slane %v7304_v6, 1  ;;  %v1144_v34 = vld [vmem:[#allocation2 + $0xe4] sm:$0xf] }
 0x20b   : > { %v7427_v45 = vunpack.c.l.bf16 %v1858_v50  ;;  %v7430_v46 = vmul.f32 %v5489_v2, %v1913_v39  ;;  %v7433_v55 = vmul.f32 %v5489_v2, %v1916_v60  ;;  %v7437_v21 = vmul.f32 %v5489_v2, %v1909_v59  ;;  %v2572_v39 = vld [vmem:[#allocation2 + $0xb8] sm:$0xf]  ;;  %v7453_v59 = vld [vmem:[%s9368_s3 + $0x8] ss:$0 sm:$0xff] }
 0x20c   : > { %10006 = vst [vmem:[#allocation143_spill] sm:$0xff] %v7417_v30  ;;  %10007 = vst [vmem:[#allocation144_spill] sm:$0xff] %v7420_v19  ;;  %v7424_v31 = vadd.f32 %v10008_v8, %v2007_v20  ;;  %v7440_v20 = vmul.f32 %v5500_v9, %v2623_v1  ;;  %v7443_v8 = vmul.f32 %v5551_v28, %v2623_v1  ;;  %v1410_v62 = vrot.slane %v1333_v18, 1  ;;  %v10019_v19 = vld [vmem:[#allocation97_spill] sm:$0xff] }
 0x20d   : > { %10010 = vst [vmem:[#allocation146_spill] sm:$0xff] %v7430_v46  ;;  %10011 = vst [vmem:[#allocation147_spill] sm:$0xff] %v7433_v55  ;;  %v5043_v54 = vpop.eup %5042  ;;  %v7446_v50 = vmul.f32 %v5448_v22, %v1184_v41  ;;  %v1294_v60 = vadd.f32 %v7089_v24, %v1239_v51  ;;  %v7462_v51 = vmul.f32 %v5480_v58, %v1184_v41  ;;  %v7476_v43 = vunpack.c.l.bf16 %v1144_v34  ;;  %v443_v34 = vld [vmem:[#allocation2 + $0x7c] sm:$0x1] }
 0x20e   : > { %10009 = vst [vmem:[#allocation145_spill] sm:$0xff] %v7424_v31  ;;  %10012 = vst [vmem:[#allocation148_spill] sm:$0xff] %v7437_v21  ;;  %v5045_v42 = vpop.eup %5044  ;;  %v1236_v31 = vmul.f32 %v5456_v33, %v1184_v41  ;;  %v7466_v18 = vmul.f32 %v5492_v3, %v7427_v45  ;;  %v7470_v13 = vmul.f32 %v5495_v4, %v7427_v45  ;;  %v872_v48 = vadd.f32 1.0, %v5041_v35  ;;  %v437_v21 = vld [vmem:[#allocation2 + $0x5c] sm:$0x1] }
 0x20f   : > { %10013 = vst [vmem:[#allocation149_spill] sm:$0xff] %v7440_v20  ;;  %10014 = vst [vmem:[#allocation150_spill] sm:$0xff] %v7443_v8  ;;  %v7456_v20 = vmul.f32 %v7453_v59, %v2623_v1  ;;  %v7472_v1 = vunpack.c.l.bf16 %v2572_v39  ;;  %v933_v27 = vmul.f32 %v5043_v54, %v10018_v26  ;;  %v931_v41 = vmul.f32 %v5045_v42, %v10019_v19  ;;  %v1141_v54 = vld [vmem:[#allocation2 + $0xd4] sm:$0xf]  ;;  %v461_v26 = vld [vmem:[#allocation2 + $0xdc] sm:$0x1] }
 0x210   : > { %10016 = vst [vmem:[#allocation152_spill] sm:$0xff] %v7466_v18  ;;  %10017 = vst [vmem:[#allocation153_spill] sm:$0xff] %v7470_v13  ;;  %v5047_v16 = vpop.eup %5046  ;;  %v10020_v56 = vrot.slane %v7252_v5, 1  ;;  %v7484_v14 = vadd.f32 %v1410_v62, %v1294_v60  ;;  %v7489_v19 = vadd.f32 %v7089_v24, %v1236_v31  ;;  %v455_v60 = vld [vmem:[#allocation2 + $0xbc] sm:$0x1]  ;;  %v10023_v29 = vrot.slane %v7446_v50, 1 }
 0x211   : > { %10015 = vst [vmem:[#allocation151_spill] sm:$0xff] %v7456_v20  ;;  %v4652_v5 = vpack.c.bf16 %v933_v27, %v933_v27  ;;  %v4650_v35 = vpack.c.bf16 %v931_v41, %v931_v41  ;;  %v7496_v20 = vmul.f32 %v5551_v28, %v7472_v1  ;;  %v870_v8 = vadd.f32 1.0, %v5047_v16  ;;  %v458_v31 = vld [vmem:[#allocation2 + $0xcc] sm:$0x1]  ;;  %v467_v46 = vld [vmem:[#allocation2 + $0xfc] sm:$0x1] }
 0x212   : > { %v7482_v38 = vsel %vm1372_vm2, %v10020_v56, %v1410_v62  ;;  %10021 = vst [vmem:[#allocation90_spill] sm:$0xff] %v7484_v14  ;;  %v422_v56 = vld [vmem:[#allocation2 + $0xc] sm:$0x1]  ;;  %v10024_v27 = vrot.slane %v7259_v37, 1  ;;  %v7505_v42 = vmul.f32 %v5448_v22, %v7476_v43  ;;  %v7507_v55 = vunpack.c.l.bf16 %v1141_v54 }
 0x213   : > { %v5049_v40 = vpop.eup %5048  ;;  %v452_v62 = vld [vmem:[#allocation2 + $0xac] sm:$0x1]  ;;  %10022 = vst [vmem:[#allocation97_spill] sm:$0xff] %v7496_v20  ;;  %1094 = vst [vmem:[#allocation2 + $0xe8] sm:$0xf] %v4652_v5  ;;  %5052 = vrcp.f32 %v872_v48  ;;  %v423_v53 = vsel %vm7296_vm7, 0, %v422_v56 }
 0x214   : > { %v5051_v14 = vpop.eup %5050  ;;  %v1408_v41 = vsel %vm1372_vm2, %v10024_v27, %v10023_v29  ;;  %1092 = vst [vmem:[#allocation2 + $0xd8] sm:$0xf] %v4650_v35  ;;  %v464_v39 = vld [vmem:[#allocation2 + $0xec] sm:$0x1]  ;;  %v873_v16 = vadd.f32 1.0, %v5049_v40  ;;  %v435_v37 = vsel %vm7296_vm7, 0, %v434_v10  ;;  %5054 = vrcp.f32 %v870_v8 }
 0x215   : > { %v438_v29 = vsel %vm7296_vm7, 0, %v437_v21  ;;  %v470_v27 = vld [vmem:[#allocation2 + $0x10c] sm:$0x1]  ;;  %v871_v49 = vadd.f32 1.0, %v5051_v14  ;;  %424 = vst [vmem:[#allocation2 + $0xc] sm:$0x1] %v423_v53  ;;  %v7537_v8 = vmul.f32 %v5448_v22, %v7507_v55 }
 0x216   : > { %436 = vst [vmem:[#allocation2 + $0x4c] sm:$0x1] %v435_v37  ;;  %439 = vst [vmem:[#allocation2 + $0x5c] sm:$0x1] %v438_v29  ;;  %v441_v48 = vsel %vm7296_vm7, 0, %v440_v63  ;;  %v444_v40 = vsel %vm7296_vm7, 0, %v443_v34  ;;  %5056 = vrcp.f32 %v873_v16 }
 0x217   : > { %v447_v54 = vsel %vm7296_vm7, 0, %v446_v0  ;;  %v473_v5 = vld [vmem:[#allocation2 + $0x11c] sm:$0x1]  ;;  %v1866_v35 = vld [vmem:[#allocation2 + $0xe4] sm:$0xf]  ;;  %v450_v14 = vsel %vm7296_vm7, 0, %v449_v11  ;;  %5058 = vrcp.f32 %v871_v49  ;;  %v7570_v49 = vmul.f32 %v7453_v59, %v7472_v1 }
 0x218   : > { %442 = vst [vmem:[#allocation2 + $0x6c] sm:$0x1] %v441_v48  ;;  %445 = vst [vmem:[#allocation2 + $0x7c] sm:$0x1] %v444_v40  ;;  %v453_v10 = vsel %vm7296_vm7, 0, %v452_v62  ;;  %v456_v53 = vsel %vm7296_vm7, 0, %v455_v60  ;;  %v7552_v60 = vmul.f32 %v5489_v2, %v7427_v45  ;;  %v1503_v45 = vadd.f32 %v1408_v41, %v7373_v36 }
 0x219   : > { %448 = vst [vmem:[#allocation2 + $0x8c] sm:$0x1] %v447_v54  ;;  %451 = vst [vmem:[#allocation2 + $0x9c] sm:$0x1] %v450_v14  ;;  %v459_v0 = vsel %vm7296_vm7, 0, %v458_v31  ;;  %v462_v21 = vsel %vm7296_vm7, 0, %v461_v26  ;;  %v1914_v31 = vunpack.c.l.bf16 %v1866_v35 }
 0x21a   : > { %454 = vst [vmem:[#allocation2 + $0xac] sm:$0x1] %v453_v10  ;;  %457 = vst [vmem:[#allocation2 + $0xbc] sm:$0x1] %v456_v53  ;;  %v465_v63 = vsel %vm7296_vm7, 0, %v464_v39  ;;  %v468_v11 = vsel %vm7296_vm7, 0, %v467_v46 }
 0x21b   : > { %v1863_v34 = vld [vmem:[#allocation2 + $0xd4] sm:$0xf]  ;;  %460 = vst [vmem:[#allocation2 + $0xcc] sm:$0x1] %v459_v0  ;;  %463 = vst [vmem:[#allocation2 + $0xdc] sm:$0x1] %v462_v21  ;;  %v7595_v0 = vmul.f32 %v5480_v58, %v7476_v43  ;;  %v1506_v21 = vadd.f32 %v7482_v38, %v7281_v7 }
 0x21c   : > { %466 = vst [vmem:[#allocation2 + $0xec] sm:$0x1] %v465_v63  ;;  %469 = vst [vmem:[#allocation2 + $0xfc] sm:$0x1] %v468_v11  ;;  %v471_v56 = vsel %vm7296_vm7, 0, %v470_v27  ;;  %v474_v26 = vsel %vm7296_vm7, 0, %v473_v5  ;;  %v7566_v27 = vmul.f32 %v5500_v9, %v7472_v1  ;;  %v1911_v54 = vunpack.c.l.bf16 %v1863_v34 }
 0x21d   : > { %v10025_v39 = vrot.slane %v7417_v30, 1  ;;  %v10026_v46 = vrot.slane %v7304_v6, 1  ;;  %472 = vst [vmem:[#allocation2 + $0x10c] sm:$0x1] %v471_v56  ;;  %475 = vst [vmem:[#allocation2 + $0x11c] sm:$0x1] %v474_v26  ;;  %v5053_v10 = vpop.eup %5052  ;;  %v7604_v11 = vmul.f32 %v5495_v4, %v1914_v31 }
 0x21e   : > { %v10027_v16 = vrot.slane %v7446_v50, 1  ;;  %v10028_v37 = vrot.slane %v7466_v18, 1  ;;  %v10029_v6 = vrot.slane %v7313_v15, 1  ;;  %10030 = vst [vmem:[#allocation154_spill] sm:$0xff] %v7566_v27  ;;  %10031 = vst [vmem:[#allocation155_spill] sm:$0xff] %v7570_v49  ;;  %v10032_v50 = vrot.slane %v7462_v51, 2  ;;  %v5055_v38 = vpop.eup %5054 }
 0x21f   : > { %v7548_v62 = vsel %vm1372_vm2, %v10026_v46, %v10025_v39  ;;  %v1244_v15 = vmul.f32 %v5456_v33, %v7476_v43  ;;  %v2580_v40 = vld [vmem:[#allocation2 + $0xe4] sm:$0xf]  ;;  %v10034_v5 = vrot.slane %v7470_v13, 2  ;;  %v10035_v35 = vrot.slane %v7352_v32, 2  ;;  %v2577_v14 = vld [vmem:[#allocation2 + $0xd4] sm:$0xf] }
 0x220   : > { %v7557_v12 = vadd.f32 %v10027_v16, %v7489_v19  ;;  %v2122_v29 = vsel %vm1372_vm2, %v10029_v6, %v10028_v37  ;;  %v10033_v19 = vrot.slane %v7308_v61, 2  ;;  %v9524_v41 = vrot.slane %v7505_v42, 1  ;;  %10039 = vst [vmem:[#allocation159_spill] sm:$0xff] %v7604_v11  ;;  %v10042_v7 = vld [vmem:[#allocation38_spill] sm:$0xff]  ;;  %v10043_v37 = vld [vmem:[#allocation95_spill] sm:$0xff] }
 0x221   : > { %v7585_v1 = vsel %vm1649_vm3, %v10035_v35, %v10034_v5  ;;  %v9525_v61 = vrot.slane %v7537_v8, 1  ;;  %v7591_v53 = vadd.f32 %v2122_v29, %v7385_v47  ;;  %v7598_v32 = vmul.f32 %v5492_v3, %v1914_v31  ;;  %v1518_v5 = vld [vmem:[#allocation2 + $0x1c] sm:$0x1]  ;;  %v5057_v35 = vpop.eup %5056  ;;  %v10049_v63 = vld [vmem:[#allocation27_spill] sm:$0xff] }
 0x222   : > { %v1707_v48 = vsel %vm1649_vm3, %v10033_v19, %v10032_v50  ;;  %10036 = vst [vmem:[#allocation156_spill] sm:$0xff] %v7585_v1  ;;  %v7606_v34 = vunpack.c.l.bf16 %v2580_v40  ;;  %v7610_v47 = vmul.f32 %v5480_v58, %v7507_v55  ;;  %v7613_v43 = vadd.f32 %v7089_v24, %v1244_v15  ;;  %v1530_v11 = vld [vmem:[#allocation2 + $0xdc] sm:$0x1] }
 0x223   : > { %10037 = vst [vmem:[#allocation157_spill] sm:$0xff] %v7591_v53  ;;  %10038 = vst [vmem:[#allocation158_spill] sm:$0xff] %v7598_v32  ;;  %v1812_v56 = vadd.f32 %v1707_v48, %v1503_v45  ;;  %v7616_v26 = vmul.f32 %v5492_v3, %v1911_v54  ;;  %v7618_v39 = vunpack.c.l.bf16 %v2577_v14  ;;  %v1511_v46 = vadd.f32 %v9524_v41, %v10042_v7  ;;  %v1529_v53 = vld [vmem:[#allocation2 + $0xcc] sm:$0x1] }
 0x224   : > { %10040 = vst [vmem:[#allocation160_spill] sm:$0xff] %v7606_v34  ;;  %v1241_v16 = vmul.f32 %v5456_v33, %v7507_v55  ;;  %v1508_v6 = vadd.f32 %v9525_v61, %v10043_v37  ;;  %v10044_v29 = vrot.slane %v7414_v52, 2  ;;  %v10045_v45 = vrot.slane %v7255_v57, 2  ;;  %v1145_v37 = vld [vmem:[#allocation2 + $0xe8] sm:$0xf] }
 0x225   : > { %10041 = vst [vmem:[#allocation161_spill] sm:$0xff] %v7618_v39  ;;  %v9532_v19 = vrot.slane %v7595_v0, 2  ;;  %v1963_v40 = vmul.f32 %v5489_v2, %v1911_v54  ;;  %v7637_v55 = vmul.f32 %v5489_v2, %v1914_v31  ;;  %v7642_v7 = vmul.f32 %v5500_v9, %v7606_v34  ;;  %v1520_v34 = vld [vmem:[#allocation2 + $0x3c] sm:$0x1] }
 0x226   : > { %v1712_v50 = vsel %vm1649_vm3, %v10045_v45, %v10044_v29  ;;  %v9533_v57 = vrot.slane %v7610_v47, 2  ;;  %v1142_v29 = vld [vmem:[#allocation2 + $0xd8] sm:$0xf]  ;;  %v5059_v45 = vpop.eup %5058  ;;  %v7651_v31 = vmul.f32 %v5551_v28, %v7618_v39  ;;  %v936_v36 = vmul.f32 %v5053_v10, %v10049_v63  ;;  %v1867_v63 = vld [vmem:[#allocation2 + $0xe8] sm:$0xf] }
 0x227   : > { %v1815_v15 = vadd.f32 %v1712_v50, %v1506_v21  ;;  %10046 = vst [vmem:[#allocation38_spill] sm:$0xff] %v7642_v7  ;;  %v7647_v50 = vmul.f32 %v5495_v4, %v1911_v54  ;;  %v1820_v14 = vadd.f32 %v9532_v19, %v1511_v46  ;;  %v7657_v48 = vadd.f32 %v7089_v24, %v1241_v16  ;;  %v1519_v54 = vld [vmem:[#allocation2 + $0x2c] sm:$0x1] }
 0x228   : > { %10048 = vst [vmem:[#allocation162_spill] sm:$0xff] %v7651_v31  ;;  %v1817_v41 = vadd.f32 %v9533_v57, %v1508_v6  ;;  %v7663_v61 = vmul.f32 %v5500_v9, %v7618_v39  ;;  %v1193_v49 = vunpack.c.l.bf16 %v1145_v37  ;;  %v1190_v20 = vunpack.c.l.bf16 %v1142_v29  ;;  %v2581_v29 = vld [vmem:[#allocation2 + $0xe8] sm:$0xf] }
 0x229   : > { %10047 = vst [vmem:[#allocation95_spill] sm:$0xff] %v7647_v50  ;;  %v7665_v21 = vadd.f32 %v1963_v40, %v1815_v15  ;;  %v1534_v10 = vunpack.c.l.bf16 %v1518_v5  ;;  %v4655_v7 = vpack.c.bf16 %v936_v36, %v936_v36  ;;  %v934_v46 = vmul.f32 %v5055_v38, %v7056_v25 }
 0x22a   : > { %10050 = vst [vmem:[#allocation27_spill] sm:$0xff] %v7663_v61  ;;  %v937_v16 = vmul.f32 %v5057_v35, %v7075_v44  ;;  %v935_v19 = vmul.f32 %v5059_v45, %v7179_v23  ;;  %v10052_v6 = vrot.slane %v7616_v26, 1  ;;  %v1535_v37 = vunpack.c.l.bf16 %v1519_v54  ;;  %v1864_v23 = vld [vmem:[#allocation2 + $0xd8] sm:$0xf]  ;;  %v10054_v35 = vld [vmem:[#allocation93_spill] sm:$0xff] }
 0x22b   : > { %10051 = vst [vmem:[#allocation163_spill] sm:$0xff] %v7665_v21  ;;  %1097 = vst [vmem:[#allocation2 + $0x104] sm:$0xf] %v4655_v7  ;;  %v4653_v5 = vpack.c.bf16 %v934_v46, %v934_v46  ;;  %v1536_v25 = vunpack.c.l.bf16 %v1520_v34  ;;  %v1915_v38 = vunpack.c.l.bf16 %v1867_v63  ;;  %v1335_v44 = vmul.f32 %v5448_v22, %v1190_v20  ;;  %v7684_v61 = vld [vmem:[#allocation2 + $0x1c] sm:$0x1] }
 0x22c   : > { %v7673_v57 = vadd.f32 %v10052_v6, %v7403_v17  ;;  %v4656_v36 = vpack.c.bf16 %v937_v16, %v937_v16  ;;  %v4654_v39 = vpack.c.bf16 %v935_v19, %v935_v19  ;;  %v10055_v45 = vunpack.c.l.bf16 %v10054_v35  ;;  %v10056_v6 = vld [vmem:[#allocation137_spill] sm:$0xff]  ;;  %10057 = vst [vmem:[#allocation93_spill] sm:$0xff] %v7684_v61  ;;  %v2578_v46 = vld [vmem:[#allocation2 + $0xd8] sm:$0xf] }
 0x22d   : > { %v2008_v15 = vadd.f32 %v10056_v6, %v1812_v56  ;;  %v1245_v54 = vmul.f32 %v5456_v33, %v1193_v49  ;;  %v1337_v7 = vmul.f32 %v5448_v22, %v1193_v49  ;;  %1095 = vst [vmem:[#allocation2 + $0xf4] sm:$0xf] %v4653_v5  ;;  %v7689_v34 = vmul.f32 %v5480_v58, %v1534_v10  ;;  %v10058_v19 = vld [vmem:[#allocation146_spill] sm:$0xff] }
 0x22e   : > { %10053 = vst [vmem:[#allocation164_spill] sm:$0xff] %v7673_v57  ;;  %v7681_v17 = vmul.f32 %v5489_v2, %v10055_v45  ;;  %1098 = vst [vmem:[#allocation2 + $0x108] sm:$0xf] %v4656_v36  ;;  %v7692_v63 = vadd.f32 %v10058_v19, %v1817_v41  ;;  %v7694_v16 = vunpack.c.l.bf16 %v2581_v29  ;;  %v1242_v56 = vmul.f32 %v5456_v33, %v1190_v20  ;;  %v10061_v36 = vld [vmem:[#allocation147_spill] sm:$0xff] }
 0x22f   : > { %1096 = vst [vmem:[#allocation2 + $0xf8] sm:$0xf] %v4654_v39  ;;  %v7698_v35 = vmul.f32 %v5480_v58, %v1190_v20  ;;  %v7701_v45 = vmul.f32 %v5480_v58, %v1535_v37  ;;  %v7704_v5 = vmul.f32 %v5480_v58, %v1193_v49  ;;  %v1912_v39 = vunpack.c.l.bf16 %v1864_v23  ;;  %v1517_v23 = vld [vmem:[#allocation2 + $0xc] sm:$0x1] }
 0x230   : > { %10059 = vst [vmem:[#allocation137_spill] sm:$0xff] %v7692_v63  ;;  %10060 = vst [vmem:[#allocation146_spill] sm:$0xff] %v7694_v16  ;;  %v7707_v10 = vadd.f32 %v10061_v36, %v1820_v14  ;;  %v7711_v29 = vmul.f32 %v5492_v3, %v1915_v38  ;;  %v1413_v6 = vrot.slane %v1335_v44, 1  ;;  %v2626_v19 = vunpack.c.l.bf16 %v2578_v46  ;;  %v1523_v46 = vld [vmem:[#allocation2 + $0x6c] sm:$0x1] }
 0x231   : > { %v7714_v20 = vmul.f32 %v5480_v58, %v1536_v25  ;;  %v1300_v37 = vadd.f32 %v7089_v24, %v1245_v54  ;;  %v1416_v40 = vrot.slane %v1337_v7, 1  ;;  %v7718_v49 = vmul.f32 %v5495_v4, %v1915_v38  ;;  %v1522_v54 = vld [vmem:[#allocation2 + $0x5c] sm:$0x1] }
 0x232   : > { %10062 = vst [vmem:[#allocation147_spill] sm:$0xff] %v7707_v10  ;;  %v7721_v14 = vadd.f32 %v7548_v62, %v2008_v15  ;;  %v7724_v36 = vmul.f32 %v5489_v2, %v1915_v38  ;;  %v7728_v44 = vmul.f32 %v5500_v9, %v7694_v16  ;;  %v1297_v25 = vadd.f32 %v7089_v24, %v1242_v56  ;;  %v1521_v38 = vld [vmem:[#allocation2 + $0x4c] sm:$0x1] }
 0x233   : > { %10063 = vst [vmem:[#allocation165_spill] sm:$0xff] %v7718_v49  ;;  %v7735_v7 = vmul.f32 %v7453_v59, %v7694_v16  ;;  %v7738_v62 = vmul.f32 %v5492_v3, %v1912_v39  ;;  %v7741_v15 = vmul.f32 %v5495_v4, %v1912_v39  ;;  %v10068_v31 = vrot.slane %v7537_v8, 1  ;;  %v1524_v8 = vld [vmem:[#allocation2 + $0x7c] sm:$0x1] }
 0x234   : > { %10064 = vst [vmem:[#allocation166_spill] sm:$0xff] %v7721_v14  ;;  %10065 = vst [vmem:[#allocation167_spill] sm:$0xff] %v7728_v44  ;;  %v7748_v56 = vmul.f32 %v5551_v28, %v2626_v19  ;;  %v1533_v44 = vunpack.c.l.bf16 %v1517_v23  ;;  %v7753_v27 = vadd.f32 %v1416_v40, %v1300_v37  ;;  %v7757_v41 = vmul.f32 %v7453_v59, %v2626_v19  ;;  %v1525_v14 = vld [vmem:[#allocation2 + $0x8c] sm:$0x1]  ;;  %v1526_v37 = vld [vmem:[#allocation2 + $0x9c] sm:$0x1] }
 0x235   : > { %10066 = vst [vmem:[#allocation168_spill] sm:$0xff] %v7735_v7  ;;  %10067 = vst [vmem:[#allocation169_spill] sm:$0xff] %v7741_v15  ;;  %v1414_v24 = vsel %vm1372_vm2, %v10068_v31, %v1413_v6  ;;  %v10070_v7 = vrot.slane %v7505_v42, 1  ;;  %v7759_v31 = vadd.f32 %v1413_v6, %v1297_v25  ;;  %v10072_v28 = vrot.slane %v7698_v35, 2  ;;  %v1528_v59 = vld [vmem:[#allocation2 + $0xbc] sm:$0x1] }
 0x236   : > { %10069 = vst [vmem:[#allocation170_spill] sm:$0xff] %v7748_v56  ;;  %10071 = vst [vmem:[#allocation171_spill] sm:$0xff] %v7757_v41  ;;  %v10073_v1 = vrot.slane %v7610_v47, 2  ;;  %v7767_v42 = vmul.f32 %v5489_v2, %v1912_v39  ;;  %v1509_v57 = vadd.f32 %v1414_v24, %v7657_v48  ;;  %v1537_v47 = vunpack.c.l.bf16 %v1521_v38  ;;  %v1532_v39 = vld [vmem:[#allocation2 + $0xfc] sm:$0x1] }
 0x237   : > { %v1417_v16 = vsel %vm1372_vm2, %v10070_v7, %v1416_v40  ;;  %v7770_v40 = vmul.f32 %v5500_v9, %v2626_v19  ;;  %v1527_v7 = vld [vmem:[#allocation2 + $0xac] sm:$0x1]  ;;  %v1538_v49 = vunpack.c.l.bf16 %v1522_v54  ;;  %v1539_v13 = vunpack.c.l.bf16 %v1523_v46  ;;  %v1147_v9 = vld [vmem:[#allocation2 + $0xf4] sm:$0xf]  ;;  %v1148_v61 = vld [vmem:[#allocation2 + $0xf8] sm:$0xf] }
 0x238   : > { %v1717_v23 = vsel %vm1649_vm3, %v10073_v1, %v10072_v28  ;;  %v1531_v1 = vld [vmem:[#allocation2 + $0xec] sm:$0x1]  ;;  %v1555_v19 = vmul.f32 %v5480_v58, %v1533_v44  ;;  %v1540_v50 = vunpack.c.l.bf16 %v1524_v8  ;;  %v1541_v48 = vunpack.c.l.bf16 %v1525_v14 }
 0x239   : > { %10074 = vst [vmem:[#allocation172_spill] sm:$0xff] %v7770_v40  ;;  %v1542_v24 = vunpack.c.l.bf16 %v1526_v37  ;;  %v7779_v6 = vadd.f32 %v1417_v16, %v7613_v43  ;;  %v1543_v25 = vunpack.c.l.bf16 %v1527_v7  ;;  %v1544_v15 = vunpack.c.l.bf16 %v1528_v59  ;;  %v1869_v43 = vld [vmem:[#allocation2 + $0xf4] sm:$0xf] }
 0x23a   : > { %v1545_v38 = vunpack.c.l.bf16 %v1529_v53  ;;  %v1546_v28 = vunpack.c.l.bf16 %v1530_v11  ;;  %v1547_v56 = vunpack.c.l.bf16 %v1531_v1  ;;  %v1548_v10 = vunpack.c.l.bf16 %v1532_v39 }
 0x23b   : > { %v7782_v46 = vmul.f32 %v5480_v58, %v1537_v47  ;;  %v1195_v44 = vunpack.c.l.bf16 %v1147_v9  ;;  %v7785_v54 = vmul.f32 %v5480_v58, %v1538_v49  ;;  %v7788_v14 = vmul.f32 %v5480_v58, %v1539_v13  ;;  %v1872_v9 = vld [vmem:[#allocation2 + $0x104] sm:$0xf] }
 0x23c   : > { %v1653_v8 = vrot.slane %v1555_v19, 2  ;;  %v7791_v16 = vmul.f32 %v5480_v58, %v1540_v50  ;;  %v7794_v53 = vmul.f32 %v5480_v58, %v1541_v48  ;;  %v7797_v11 = vmul.f32 %v5480_v58, %v1542_v24  ;;  %v2586_v47 = vld [vmem:[#allocation2 + $0x104] sm:$0xf]  ;;  %v10076_v19 = vld [vmem:[#allocation6_spill] sm:$0xff] }
 0x23d   : > { %v1658_v37 = vrot.slane %v7689_v34, 2  ;;  %v1196_v7 = vunpack.c.l.bf16 %v1148_v61  ;;  %v7801_v49 = vmul.f32 %v5480_v58, %v1543_v25  ;;  %v1663_v13 = vrot.slane %v7701_v45, 2  ;;  %v1873_v45 = vld [vmem:[#allocation2 + $0x108] sm:$0xf] }
 0x23e   : > { %v1668_v59 = vrot.slane %v7714_v20, 2  ;;  %v7806_v50 = vmul.f32 %v5480_v58, %v1544_v15  ;;  %v7809_v1 = vmul.f32 %v5480_v58, %v1545_v38  ;;  %v7812_v39 = vmul.f32 %v5480_v58, %v1546_v28  ;;  %v10078_v38 = vld [vmem:[#allocation49_spill] sm:$0xff] }
 0x23f   : > { %v7815_v34 = vmul.f32 %v5480_v58, %v1547_v56  ;;  %v1338_v61 = vmul.f32 %v5448_v22, %v1195_v44  ;;  %v7818_v25 = vunpack.c.l.bf16 %v1869_v43  ;;  %v7821_v20 = vmul.f32 %v5480_v58, %v1548_v10 }
 0x240   : > { %v10077_v15 = vrot.slane %v10076_v19, 2  ;;  %v7826_v24 = vunpack.c.l.bf16 %v1872_v9  ;;  %v10079_v28 = vrot.slane %v10078_v38, 2  ;;  %v10080_v56 = vrot.slane %v7704_v5, 2  ;;  %v10083_v9 = vld [vmem:[#allocation40_spill] sm:$0xff] }
 0x241   : > { %10075 = vst [vmem:[#allocation173_spill] sm:$0xff] %v7818_v25  ;;  %v10081_v41 = vrot.slane %v7595_v0, 2  ;;  %v7838_v63 = vadd.f32 %v1717_v23, %v1509_v57  ;;  %v7840_v10 = vunpack.c.l.bf16 %v2586_v47  ;;  %v1339_v19 = vmul.f32 %v5448_v22, %v1196_v7  ;;  %v2583_v57 = vld [vmem:[#allocation2 + $0xf4] sm:$0xf]  ;;  %v2587_v47 = vld [vmem:[#allocation2 + $0x108] sm:$0xf] }
 0x242   : > { %v1654_v48 = vsel %vm1649_vm3, %v10077_v15, %v1653_v8  ;;  %v1659_v40 = vsel %vm1649_vm3, %v10079_v28, %v1658_v37  ;;  %v1870_v8 = vld [vmem:[#allocation2 + $0xf8] sm:$0xf]  ;;  %v10084_v15 = vrot.slane %v10083_v9, 2  ;;  %v10085_v37 = vld [vmem:[#allocation7_spill] sm:$0xff]  ;;  %v1247_v0 = vmul.f32 %v5456_v33, %v1195_v44  ;;  %v10087_v22 = vld [vmem:[#allocation9_spill] sm:$0xff] }
 0x243   : > { %v7836_v43 = vsel %vm1649_vm3, %v10081_v41, %v10080_v56  ;;  %10082 = vst [vmem:[#allocation6_spill] sm:$0xff] %v7840_v10  ;;  %v10086_v28 = vrot.slane %v10085_v37, 2  ;;  %v7853_v41 = vmul.f32 %v5480_v58, %v1195_v44  ;;  %v7855_v23 = vunpack.c.l.bf16 %v1873_v45  ;;  %v2584_v10 = vld [vmem:[#allocation2 + $0xf8] sm:$0xf] }
 0x244   : > { %v7846_v38 = vsel %vm1649_vm3, %v10084_v15, %v1663_v13  ;;  %v7858_v56 = vadd.f32 %v1654_v48, %v10087_v22  ;;  %v1418_v9 = vrot.slane %v1338_v61, 1  ;;  %v7862_v13 = vmul.f32 %v5492_v3, %v7818_v25 }
 0x245   : > { %v1669_v21 = vsel %vm1649_vm3, %v10086_v28, %v1668_v59  ;;  %v1248_v15 = vmul.f32 %v5456_v33, %v1196_v7  ;;  %v10089_v59 = vld [vmem:[#allocation53_spill] sm:$0xff]  ;;  %v7870_v44 = vmul.f32 %v5489_v2, %v7826_v24  ;;  %v1599_v45 = vmul.f32 %v5480_v58, %v1196_v7 }
 0x246   : > { %10088 = vst [vmem:[#allocation49_spill] sm:$0xff] %v7862_v13  ;;  %v7866_v37 = vadd.f32 %v1659_v40, %v10089_v59  ;;  %v1918_v28 = vunpack.c.l.bf16 %v1870_v8  ;;  %v1673_v48 = vrot.slane %v7782_v46, 2  ;;  %v7876_v61 = vmul.f32 %v5489_v2, %v7818_v25  ;;  %v5217_v59 = vld [vmem:[%s9369_s4] ss:$0 sm:$0xff]  ;;  %v10093_v8 = vld [vmem:[#allocation130_spill] sm:$0xff]  ;;  %v10099_v13 = vld [vmem:[#allocation33_spill] sm:$0xff] }
 0x247   : > { %v7878_v22 = vunpack.c.l.bf16 %v2583_v57  ;;  %v7880_v33 = vunpack.c.l.bf16 %v2587_v47  ;;  %v1419_v40 = vrot.slane %v1339_v19, 1  ;;  %v1302_v30 = vadd.f32 %v5217_v59, %v1247_v0  ;;  %v10095_v25 = vld [vmem:[#allocation14_spill] sm:$0xff] }
 0x248   : > { %v1725_v58 = vrot.slane %v7853_v41, 2  ;;  %v7888_v7 = vmul.f32 %v5489_v2, %v7855_v23  ;;  %v7892_v46 = vmul.f32 %v5495_v4, %v7855_v23  ;;  %v1514_v57 = vadd.f32 %v1418_v9, %v10093_v8 }
 0x249   : > { %10090 = vst [vmem:[#allocation40_spill] sm:$0xff] %v7878_v22  ;;  %10091 = vst [vmem:[#allocation7_spill] sm:$0xff] %v7880_v33  ;;  %v1303_v19 = vadd.f32 %v5217_v59, %v1248_v15  ;;  %v7896_v33 = vunpack.c.l.bf16 %v2584_v10  ;;  %v1726_v22 = vrot.slane %v1599_v45, 2  ;;  %v7899_v0 = vmul.f32 %v5492_v3, %v1918_v28 }
 0x24a   : > { %10092 = vst [vmem:[#allocation9_spill] sm:$0xff] %v7892_v46  ;;  %v7902_v41 = vmul.f32 %v5495_v4, %v1918_v28  ;;  %v10096_v18 = vrot.slane %v10095_v25, 2  ;;  %v1420_v46 = vsel %vm1372_vm2, %v1418_v9, %v1419_v40  ;;  %v1678_v8 = vrot.slane %v7785_v54, 2  ;;  %v10097_v4 = vld [vmem:[#allocation20_spill] sm:$0xff] }
 0x24b   : > { %10094 = vst [vmem:[#allocation53_spill] sm:$0xff] %v7896_v33  ;;  %v1683_v47 = vrot.slane %v7788_v14, 2  ;;  %v1688_v10 = vrot.slane %v7791_v16, 2  ;;  %v1693_v15 = vrot.slane %v7794_v53, 2  ;;  %v1698_v45 = vrot.slane %v7797_v11, 2  ;;  %v10105_v16 = vld [vmem:[#allocation127_spill] sm:$0xff] }
 0x24c   : > { %v1674_v32 = vsel %vm1649_vm3, %v10096_v18, %v1673_v48  ;;  %v1703_v59 = vrot.slane %v7801_v49, 2  ;;  %v1708_v33 = vrot.slane %v7806_v50, 2  ;;  %v1970_v25 = vmul.f32 %v5489_v2, %v1918_v28  ;;  %v10101_v28 = vld [vmem:[#allocation18_spill] sm:$0xff] }
 0x24d   : > { %v1713_v18 = vrot.slane %v7809_v1, 2  ;;  %v1718_v9 = vrot.slane %v7812_v39, 2  ;;  %v1723_v54 = vrot.slane %v7815_v34, 2  ;;  %v1516_v48 = vadd.f32 %v1419_v40, %v1303_v19  ;;  %v10103_v40 = vld [vmem:[#allocation101_spill] sm:$0xff] }
 0x24e   : > { %v1515_v53 = vadd.f32 %v1420_v46, %v1302_v30  ;;  %v10098_v11 = vrot.slane %v10097_v4, 2  ;;  %v10100_v50 = vrot.slane %v10099_v13, 2  ;;  %v10102_v1 = vrot.slane %v10101_v28, 2  ;;  %v10107_v46 = vld [vmem:[#allocation11_spill] sm:$0xff] }
 0x24f   : > { %v1728_v34 = vrot.slane %v7821_v20, 2  ;;  %v10104_v19 = vrot.slane %v10103_v40, 2  ;;  %v10106_v30 = vrot.slane %v10105_v16, 2  ;;  %v10112_v16 = vrot.slane %v7704_v5, 2  ;;  %v10119_v5 = vld [vmem:[#allocation111_spill] sm:$0xff] }
 0x250   : > { %v1679_v49 = vsel %vm1649_vm3, %v10098_v11, %v1678_v8  ;;  %v1684_v2 = vsel %vm1649_vm3, %v10100_v50, %v1683_v47  ;;  %v1689_v39 = vsel %vm1649_vm3, %v10102_v1, %v1688_v10  ;;  %v10108_v8 = vrot.slane %v10107_v46, 2  ;;  %v10113_v1 = vld [vmem:[#allocation50_spill] sm:$0xff] }
 0x251   : > { %v1694_v14 = vsel %vm1649_vm3, %v10104_v19, %v1693_v15  ;;  %v1699_v4 = vsel %vm1649_vm3, %v10106_v30, %v1698_v45  ;;  %v10109_v47 = vrot.slane %v7462_v51, 2  ;;  %v10110_v10 = vrot.slane %v7414_v52, 2  ;;  %v10114_v51 = vld [vmem:[#allocation28_spill] sm:$0xff] }
 0x252   : > { %v1704_v13 = vsel %vm1649_vm3, %v10108_v8, %v1703_v59  ;;  %v10111_v50 = vrot.slane %v7698_v35, 2  ;;  %v1724_v45 = vsel %vm1649_vm3, %v10112_v16, %v1723_v54  ;;  %v1727_v28 = vsel %vm1649_vm3, %v1725_v58, %v1726_v22  ;;  %v10116_v52 = vld [vmem:[#allocation12_spill] sm:$0xff]  ;;  %v10120_v54 = vld [vmem:[#allocation133_spill] sm:$0xff] }
 0x253   : > { %v1709_v11 = vsel %vm1649_vm3, %v10109_v47, %v1708_v33  ;;  %v1714_v20 = vsel %vm1649_vm3, %v10110_v10, %v1713_v18  ;;  %v1786_v59 = vadd.f32 %v7846_v38, %v10113_v1  ;;  %v1789_v40 = vadd.f32 %v1669_v21, %v10114_v51  ;;  %v10115_v33 = vld [vmem:[#allocation67_spill] sm:$0xff]  ;;  %v10117_v35 = vld [vmem:[#allocation84_spill] sm:$0xff]  ;;  %v10122_v1 = vld [vmem:[#allocation90_spill] sm:$0xff] }
 0x254   : > { %v1719_v15 = vsel %vm1649_vm3, %v10111_v50, %v1718_v9  ;;  %v1792_v19 = vadd.f32 %v1674_v32, %v10115_v33  ;;  %v1795_v30 = vadd.f32 %v1679_v49, %v10116_v52  ;;  %v1729_v18 = vsel %vm1649_vm3, %v1726_v22, %v1728_v34  ;;  %v10118_v9 = vld [vmem:[#allocation115_spill] sm:$0xff]  ;;  %v10121_v50 = vld [vmem:[#allocation124_spill] sm:$0xff] }
 0x255   : > { %v1798_v46 = vadd.f32 %v1684_v2, %v10117_v35  ;;  %v1801_v8 = vadd.f32 %v1689_v39, %v10118_v9  ;;  %v1804_v47 = vadd.f32 %v1694_v14, %v10119_v5  ;;  %v1807_v10 = vadd.f32 %v1699_v4, %v10120_v54  ;;  %v10123_v14 = vld [vmem:[#allocation52_spill] sm:$0xff]  ;;  %v10124_v4 = vld [vmem:[#allocation46_spill] sm:$0xff]  ;;  %v10125_v33 = vld [vmem:[#allocation71_spill] sm:$0xff] }
 0x256   : > { %v1810_v16 = vadd.f32 %v1704_v13, %v10121_v50  ;;  %v1813_v38 = vadd.f32 %v1709_v11, %v7557_v12  ;;  %v1816_v21 = vadd.f32 %v1714_v20, %v10122_v1  ;;  %v1819_v32 = vadd.f32 %v1719_v15, %v7759_v31  ;;  %v10126_v11 = vld [vmem:[#allocation68_spill] sm:$0xff]  ;;  %v10131_v15 = vld [vmem:[#allocation131_spill] sm:$0xff] }
 0x257   : > { %v1821_v49 = vadd.f32 %v7836_v43, %v7779_v6  ;;  %v1822_v22 = vadd.f32 %v1724_v45, %v7753_v27  ;;  %v1823_v2 = vadd.f32 %v1725_v58, %v1514_v57  ;;  %v1824_v34 = vadd.f32 %v1727_v28, %v1515_v53  ;;  %v10127_v52 = vld [vmem:[#allocation88_spill] sm:$0xff]  ;;  %v10128_v43 = vld [vmem:[#allocation85_spill] sm:$0xff]  ;;  %v10132_v45 = vld [vmem:[#allocation122_spill] sm:$0xff] }
 0x258   : > { %v1825_v39 = vadd.f32 %v1729_v18, %v1516_v48  ;;  %v1976_v51 = vadd.f32 %v10123_v14, %v7858_v56  ;;  %v1979_v13 = vadd.f32 %v10124_v4, %v7866_v37  ;;  %v1982_v12 = vadd.f32 %v10125_v33, %v1786_v59  ;;  %v10129_v58 = vld [vmem:[#allocation112_spill] sm:$0xff]  ;;  %v10130_v48 = vld [vmem:[#allocation102_spill] sm:$0xff] }
 0x259   : > { %v1985_v20 = vadd.f32 %v10126_v11, %v1789_v40  ;;  %v1988_v31 = vadd.f32 %v10127_v52, %v1792_v19  ;;  %v2057_v6 = vmul.f32 %v5492_v3, %v7855_v23  ;;  %v1991_v27 = vadd.f32 %v10128_v43, %v1795_v30  ;;  %v10133_v59 = vld [vmem:[#allocation148_spill] sm:$0xff]  ;;  %v10152_v33 = vld [vmem:[#allocation34_spill] sm:$0xff] }
 0x25a   : > { %v1994_v57 = vadd.f32 %v10129_v58, %v1798_v46  ;;  %v1997_v53 = vadd.f32 %v10130_v48, %v1801_v8  ;;  %v2000_v56 = vadd.f32 %v10131_v15, %v1804_v47  ;;  %v2003_v28 = vadd.f32 %v10132_v45, %v1807_v10  ;;  %v10154_v52 = vld [vmem:[#allocation98_spill] sm:$0xff]  ;;  %v2235_v43 = vld [vmem:[#allocation2 + $0x2c] sm:$0x1]  ;;  %v10156_v58 = vld [vmem:[#allocation103_spill] sm:$0xff] }
 0x25b   : > { %v2006_v37 = vadd.f32 %v7552_v60, %v1810_v16  ;;  %v2009_v18 = vadd.f32 %v10133_v59, %v1813_v38  ;;  %v2056_v40 = vmul.f32 %v5492_v3, %v7826_v24  ;;  %v2012_v19 = vadd.f32 %v7767_v42, %v1816_v21  ;;  %v10146_v21 = vld [vmem:[#allocation56_spill] sm:$0xff] }
 0x25c   : > { %v2014_v23 = vadd.f32 %v7637_v55, %v7838_v63  ;;  %v2015_v30 = vadd.f32 %v7724_v36, %v1819_v32  ;;  %v2017_v35 = vadd.f32 %v7876_v61, %v1821_v49  ;;  %v2018_v46 = vadd.f32 %v1970_v25, %v1822_v22  ;;  %v10137_v63 = vld [vmem:[#allocation158_spill] sm:$0xff]  ;;  %v10148_v22 = vld [vmem:[#allocation59_spill] sm:$0xff] }
 0x25d   : > { %v2019_v9 = vadd.f32 %v7681_v17, %v1823_v2  ;;  %v2020_v8 = vadd.f32 %v7870_v44, %v1824_v34  ;;  %v2136_v60 = vrot.slane %v2057_v6, 1  ;;  %v2021_v5 = vadd.f32 %v7888_v7, %v1825_v39  ;;  %v10140_v17 = vld [vmem:[#allocation49_spill] sm:$0xff]  ;;  %v10142_v7 = vld [vmem:[#allocation32_spill] sm:$0xff]  ;;  %v10150_v39 = vld [vmem:[#allocation75_spill] sm:$0xff] }
 0x25e   : > { %v10134_v47 = vrot.slane %v7738_v62, 1  ;;  %v10135_v3 = vrot.slane %v7616_v26, 1  ;;  %v10136_v55 = vrot.slane %v7711_v29, 1  ;;  %v10138_v36 = vrot.slane %v10137_v63, 1  ;;  %v10144_v26 = vld [vmem:[#allocation41_spill] sm:$0xff] }
 0x25f   : > { %v10139_v25 = vrot.slane %v7899_v0, 1  ;;  %v10141_v54 = vrot.slane %v10140_v17, 1  ;;  %v2135_v10 = vrot.slane %v2056_v40, 1  ;;  %v10143_v50 = vrot.slane %v10142_v7, 1 }
 0x260   : > { %v2128_v42 = vsel %vm1372_vm2, %v10135_v3, %v10134_v47  ;;  %v2131_v61 = vsel %vm1372_vm2, %v10138_v36, %v10136_v55  ;;  %v10145_v38 = vrot.slane %v10144_v26, 1  ;;  %v10147_v32 = vrot.slane %v10146_v21, 1  ;;  %v2237_v3 = vld [vmem:[#allocation2 + $0x4c] sm:$0x1]  ;;  %v10168_v21 = vld [vmem:[#allocation137_spill] sm:$0xff] }
 0x261   : > { %v2134_v44 = vsel %vm1372_vm2, %v10141_v54, %v10139_v25  ;;  %v8013_v16 = vadd.f32 %v10143_v50, %v1976_v51  ;;  %v10149_v2 = vrot.slane %v10148_v22, 1  ;;  %v10151_v14 = vrot.slane %v10150_v39, 1  ;;  %v10162_v55 = vld [vmem:[#allocation152_spill] sm:$0xff]  ;;  %v10164_v25 = vld [vmem:[#allocation143_spill] sm:$0xff]  ;;  %v2240_v39 = vld [vmem:[#allocation2 + $0x7c] sm:$0x1] }
 0x262   : > { %v8017_v1 = vadd.f32 %v10145_v38, %v1979_v13  ;;  %v8021_v49 = vadd.f32 %v10147_v32, %v1982_v12  ;;  %v10153_v11 = vrot.slane %v10152_v33, 1  ;;  %v10155_v6 = vrot.slane %v10154_v52, 1  ;;  %v2238_v38 = vld [vmem:[#allocation2 + $0x5c] sm:$0x1]  ;;  %v10171_v33 = vld [vmem:[#allocation147_spill] sm:$0xff] }
 0x263   : > { %v8025_v34 = vadd.f32 %v10149_v2, %v1985_v20  ;;  %v8029_v4 = vadd.f32 %v10151_v14, %v1988_v31  ;;  %v2137_v12 = vsel %vm1372_vm2, %v2135_v10, %v2136_v60  ;;  %v10157_v48 = vrot.slane %v10156_v58, 1  ;;  %v10158_v20 = vld [vmem:[#allocation126_spill] sm:$0xff]  ;;  %v10160_v31 = vld [vmem:[#allocation73_spill] sm:$0xff] }
 0x264   : > { %v8033_v51 = vadd.f32 %v10153_v11, %v1991_v27  ;;  %v8037_v13 = vadd.f32 %v10155_v6, %v1994_v57  ;;  %v10159_v45 = vrot.slane %v10158_v20, 1  ;;  %v10161_v40 = vrot.slane %v10160_v31, 1  ;;  %v2236_v27 = vld [vmem:[#allocation2 + $0x3c] sm:$0x1] }
 0x265   : > { %v8042_v15 = vadd.f32 %v10157_v48, %v1997_v53  ;;  %v10163_v57 = vrot.slane %v10162_v55, 1  ;;  %v10165_v54 = vrot.slane %v10164_v25, 1  ;;  %v10166_v53 = vld [vmem:[#allocation163_spill] sm:$0xff]  ;;  %v10169_v32 = vrot.slane %v10137_v63, 1  ;;  %v2242_v52 = vld [vmem:[#allocation2 + $0x9c] sm:$0x1] }
 0x266   : > { %v8046_v59 = vadd.f32 %v10159_v45, %v2000_v56  ;;  %v8050_v47 = vadd.f32 %v10161_v40, %v2003_v28  ;;  %v8061_v50 = vadd.f32 %v2128_v42, %v10166_v53  ;;  %v10167_v56 = vrot.slane %v7738_v62, 1  ;;  %v2239_v28 = vld [vmem:[#allocation2 + $0x6c] sm:$0x1] }
 0x267   : > { %v8054_v36 = vadd.f32 %v10163_v57, %v2006_v37  ;;  %v8058_v7 = vadd.f32 %v10165_v54, %v2009_v18  ;;  %v8070_v22 = vadd.f32 %v10169_v32, %v10168_v21  ;;  %v8072_v37 = vadd.f32 %v2131_v61, %v2014_v23  ;;  %v2241_v42 = vld [vmem:[#allocation2 + $0x8c] sm:$0x1] }
 0x268   : > { %v8065_v26 = vadd.f32 %v10167_v56, %v2012_v19  ;;  %v10170_v2 = vrot.slane %v7711_v29, 1  ;;  %v2251_v14 = vunpack.c.l.bf16 %v2235_v43  ;;  %v10172_v62 = vrot.slane %v10140_v17, 1  ;;  %v2243_v63 = vld [vmem:[#allocation2 + $0xac] sm:$0x1] }
 0x269   : > { %v8083_v11 = vadd.f32 %v2134_v44, %v2017_v35  ;;  %v2252_v6 = vunpack.c.l.bf16 %v2236_v27  ;;  %v2253_v58 = vunpack.c.l.bf16 %v2237_v3  ;;  %v10173_v23 = vrot.slane %v7899_v0, 1  ;;  %v2245_v48 = vld [vmem:[#allocation2 + $0xcc] sm:$0x1]  ;;  %v2246_v35 = vld [vmem:[#allocation2 + $0xdc] sm:$0x1] }
 0x26a   : > { %v8076_v18 = vadd.f32 %v10170_v2, %v2015_v30  ;;  %v8081_v19 = vadd.f32 %v10172_v62, %v10171_v33  ;;  %v8089_v29 = vadd.f32 %v2135_v10, %v2019_v9  ;;  %v2244_v30 = vld [vmem:[#allocation2 + $0xbc] sm:$0x1]  ;;  %v2254_v43 = vunpack.c.l.bf16 %v2238_v38  ;;  %v2247_v44 = vld [vmem:[#allocation2 + $0xec] sm:$0x1] }
 0x26b   : > { %v8087_v61 = vadd.f32 %v10173_v23, %v2018_v46  ;;  %v2255_v20 = vunpack.c.l.bf16 %v2239_v28  ;;  %v8091_v45 = vadd.f32 %v2137_v12, %v2020_v8  ;;  %v8093_v17 = vadd.f32 %v2136_v60, %v2021_v5  ;;  %v2248_v27 = vld [vmem:[#allocation2 + $0xfc] sm:$0x1]  ;;  %v2249_v3 = vld [vmem:[#allocation2 + $0x10c] sm:$0x1]  ;;  %v10174_v46 = vld [vmem:[#allocation93_spill] sm:$0xff] }
 0x26c   : > { %v2256_v31 = vunpack.c.l.bf16 %v2240_v39  ;;  %v2257_v40 = vunpack.c.l.bf16 %v2241_v42  ;;  %v2258_v55 = vunpack.c.l.bf16 %v2242_v52  ;;  %v2259_v0 = vunpack.c.l.bf16 %v2243_v63  ;;  %v10176_v9 = vld [vmem:[#allocation4_spill] sm:$0xff] }
 0x26d   : > { %v10175_v57 = vunpack.c.l.bf16 %v10174_v46  ;;  %v2275_v25 = vmul.f32 %v10176_v9, %v2251_v14  ;;  %v2260_v54 = vunpack.c.l.bf16 %v2244_v30  ;;  %v2261_v53 = vunpack.c.l.bf16 %v2245_v48  ;;  %v10180_v46 = vld [vmem:[#allocation43_spill] sm:$0xff] }
 0x26e   : > { %v2278_v8 = vmul.f32 %v10176_v9, %v2252_v6  ;;  %v2281_v60 = vmul.f32 %v10176_v9, %v2253_v58  ;;  %v2262_v5 = vunpack.c.l.bf16 %v2246_v35  ;;  %v2263_v12 = vunpack.c.l.bf16 %v2247_v44 }
 0x26f   : > { %v2272_v10 = vmul.f32 %v10176_v9, %v10175_v57  ;;  %v2284_v56 = vmul.f32 %v10176_v9, %v2254_v43  ;;  %v2287_v38 = vmul.f32 %v10176_v9, %v2255_v20  ;;  %v2264_v28 = vunpack.c.l.bf16 %v2248_v27  ;;  %v10177_v43 = vld [vmem:[#allocation173_spill] sm:$0xff] }
 0x270   : > { %v2265_v21 = vunpack.c.l.bf16 %v2249_v3  ;;  %v2290_v32 = vmul.f32 %v10176_v9, %v2256_v31  ;;  %v2293_v2 = vmul.f32 %v10176_v9, %v2257_v40  ;;  %v2296_v39 = vmul.f32 %v10176_v9, %v2258_v55  ;;  %v10178_v3 = vld [vmem:[#allocation35_spill] sm:$0xff] }
 0x271   : > { %v2299_v42 = vmul.f32 %v10176_v9, %v2259_v0  ;;  %v2369_v14 = vrot.slane %v2272_v10, 2  ;;  %v2374_v33 = vrot.slane %v2275_v25, 2  ;;  %v2302_v62 = vmul.f32 %v10176_v9, %v2260_v54  ;;  %v10182_v25 = vld [vmem:[#allocation36_spill] sm:$0xff] }
 0x272   : > { %v2305_v52 = vmul.f32 %v10176_v9, %v2261_v53  ;;  %v2379_v63 = vrot.slane %v2278_v8, 2  ;;  %v2384_v6 = vrot.slane %v2281_v60, 2  ;;  %v2308_v58 = vmul.f32 %v10176_v9, %v2262_v5  ;;  %v10184_v8 = vld [vmem:[#allocation64_spill] sm:$0xff] }
 0x273   : > { %v2311_v23 = vmul.f32 %v10176_v9, %v2263_v12  ;;  %v2389_v30 = vrot.slane %v2284_v56, 2  ;;  %v2394_v48 = vrot.slane %v2287_v38, 2  ;;  %v8113_v20 = vmul.f32 %v10176_v9, %v10177_v43  ;;  %v10186_v56 = vld [vmem:[#allocation77_spill] sm:$0xff] }
 0x274   : > { %v2314_v35 = vmul.f32 %v10176_v9, %v2264_v28  ;;  %v2399_v44 = vrot.slane %v2290_v32, 2  ;;  %v2404_v31 = vrot.slane %v2293_v2, 2  ;;  %v8118_v40 = vmul.f32 %v10176_v9, %v7826_v24  ;;  %v10188_v28 = vld [vmem:[#allocation81_spill] sm:$0xff] }
 0x275   : > { %v2317_v27 = vmul.f32 %v10176_v9, %v2265_v21  ;;  %v10179_v55 = vrot.slane %v10178_v3, 2  ;;  %v10181_v57 = vrot.slane %v10180_v46, 2  ;;  %v10183_v54 = vrot.slane %v10182_v25, 2  ;;  %v10192_v3 = vld [vmem:[#allocation107_spill] sm:$0xff]  ;;  %v10194_v46 = vld [vmem:[#allocation144_spill] sm:$0xff]  ;;  %v10196_v25 = vld [vmem:[#allocation94_spill] sm:$0xff] }
 0x276   : > { %v10185_v60 = vrot.slane %v10184_v8, 2  ;;  %v2409_v24 = vrot.slane %v2296_v39, 2  ;;  %v2414_v12 = vrot.slane %v2299_v42, 2  ;;  %v10187_v9 = vrot.slane %v10186_v56, 2 }
 0x277   : > { %v2370_v0 = vsel %vm1649_vm3, %v10179_v55, %v2369_v14  ;;  %v2375_v10 = vsel %vm1649_vm3, %v10181_v57, %v2374_v33  ;;  %v2380_v53 = vsel %vm1649_vm3, %v10183_v54, %v2379_v63  ;;  %v10189_v21 = vrot.slane %v10188_v28, 2  ;;  %v10190_v33 = vld [vmem:[#allocation105_spill] sm:$0xff] }
 0x278   : > { %v2385_v5 = vsel %vm1649_vm3, %v10185_v60, %v2384_v6  ;;  %v2390_v38 = vsel %vm1649_vm3, %v10187_v9, %v2389_v30  ;;  %v2419_v2 = vrot.slane %v2302_v62, 2  ;;  %v2424_v14 = vrot.slane %v2305_v52, 2  ;;  %v10199_v60 = vld [vmem:[#allocation128_spill] sm:$0xff]  ;;  %v10201_v9 = vld [vmem:[#allocation119_spill] sm:$0xff] }
 0x279   : > { %v2395_v32 = vsel %vm1649_vm3, %v10189_v21, %v2394_v48  ;;  %v10191_v43 = vrot.slane %v10190_v33, 2  ;;  %v10193_v55 = vrot.slane %v10192_v3, 2  ;;  %v2429_v39 = vrot.slane %v2308_v58, 2  ;;  %v10198_v48 = vld [vmem:[#allocation9_spill] sm:$0xff]  ;;  %v10205_v21 = vld [vmem:[#allocation95_spill] sm:$0xff] }
 0x27a   : > { %v2434_v42 = vrot.slane %v2311_v23, 2  ;;  %v10195_v57 = vrot.slane %v10194_v46, 2  ;;  %v10197_v30 = vrot.slane %v10196_v25, 2  ;;  %v2439_v8 = vrot.slane %v2314_v35, 2  ;;  %v10203_v58 = vld [vmem:[#allocation169_spill] sm:$0xff] }
 0x27b   : > { %v2400_v63 = vsel %vm1649_vm3, %v10191_v43, %v2399_v44  ;;  %v2405_v6 = vsel %vm1649_vm3, %v10193_v55, %v2404_v31  ;;  %v2442_v62 = vrot.slane %v10198_v48, 2  ;;  %v2444_v52 = vrot.slane %v2317_v27, 2  ;;  %v10207_v35 = vld [vmem:[#allocation153_spill] sm:$0xff] }
 0x27c   : > { %v2423_v54 = vsel %vm1649_vm3, %v10197_v30, %v10195_v57  ;;  %v10200_v56 = vrot.slane %v10199_v60, 2  ;;  %v10202_v28 = vrot.slane %v10201_v9, 2  ;;  %v10204_v23 = vrot.slane %v10203_v58, 2  ;;  %v10209_v30 = vld [vmem:[#allocation165_spill] sm:$0xff]  ;;  %v10211_v60 = vld [vmem:[#allocation159_spill] sm:$0xff] }
 0x27d   : > { %v10206_v33 = vrot.slane %v10205_v21, 2  ;;  %v2436_v3 = vrot.slane %v8113_v20, 2  ;;  %v10208_v55 = vrot.slane %v10207_v35, 2  ;;  %v10210_v48 = vrot.slane %v10209_v30, 2 }
 0x27e   : > { %v2410_v44 = vsel %vm1649_vm3, %v10200_v56, %v2409_v24  ;;  %v2415_v31 = vsel %vm1649_vm3, %v10202_v28, %v2414_v12  ;;  %v2425_v24 = vsel %vm1649_vm3, %v10195_v57, %v2424_v14  ;;  %v10212_v12 = vrot.slane %v10211_v60, 2 }
 0x27f   : > { %v2428_v43 = vsel %vm1649_vm3, %v10206_v33, %v10204_v23  ;;  %v2420_v27 = vsel %vm1649_vm3, %v10208_v55, %v2419_v2  ;;  %v2441_v9 = vrot.slane %v8118_v40, 2  ;;  %v10213_v28 = vmov %v10204_v23 }
 0x280   : > { %v2433_v56 = vsel %vm1649_vm3, %v10212_v12, %v10210_v48  ;;  %v2430_v20 = vsel %vm1649_vm3, %v10213_v28, %v2429_v39  ;;  %v10214_v23 = vmov %v10210_v48  ;;  %v10215_v46 = vrot.slane %v7902_v41, 2  ;;  %v2579_v12 = vld [vmem:[#allocation2 + $0xe0] sm:$0x8] }
 0x281   : > { %v2435_v2 = vsel %vm1649_vm3, %v10214_v23, %v2434_v42  ;;  %v2496_v33 = vadd.f32 %v2370_v0, %v8013_v16  ;;  %v2443_v40 = vsel %vm1649_vm3, %v2441_v9, %v2442_v62  ;;  %v2445_v58 = vsel %vm1649_vm3, %v2442_v62, %v2444_v52  ;;  %v2582_v62 = vld [vmem:[#allocation2 + $0xf0] sm:$0x8] }
 0x282   : > { %v2438_v14 = vsel %vm1649_vm3, %v2436_v3, %v10215_v46  ;;  %v10216_v35 = vmov %v10215_v46  ;;  %v2499_v39 = vadd.f32 %v2375_v10, %v8017_v1  ;;  %v2502_v57 = vadd.f32 %v2380_v53, %v8021_v49  ;;  %v10217_v52 = vld [vmem:[#allocation157_spill] sm:$0xff]  ;;  %v10218_v1 = vld [vmem:[#allocation156_spill] sm:$0xff] }
 0x283   : > { %v2440_v55 = vsel %vm1649_vm3, %v10216_v35, %v2439_v8  ;;  %v2505_v42 = vadd.f32 %v2385_v5, %v8025_v34  ;;  %v2508_v30 = vadd.f32 %v2390_v38, %v8029_v4  ;;  %v2511_v48 = vadd.f32 %v2395_v32, %v8033_v51  ;;  %v10219_v34 = vld [vmem:[#allocation145_spill] sm:$0xff]  ;;  %v10221_v51 = vld [vmem:[#allocation166_spill] sm:$0xff]  ;;  %v10222_v38 = vld [vmem:[#allocation164_spill] sm:$0xff] }
 0x284   : > { %v2514_v16 = vadd.f32 %v2400_v63, %v8037_v13  ;;  %v2517_v41 = vadd.f32 %v2405_v6, %v8042_v15  ;;  %v2520_v0 = vadd.f32 %v2410_v44, %v8046_v59  ;;  %v2523_v8 = vadd.f32 %v2415_v31, %v8050_v47  ;;  %v2585_v13 = vld [vmem:[#allocation2 + $0x100] sm:$0x8]  ;;  %v2588_v6 = vld [vmem:[#allocation2 + $0x110] sm:$0x8]  ;;  %v2589_v31 = vld [vmem:[#allocation2 + $0x114] sm:$0xff]  }
 0x285   : > { %v2525_v10 = vadd.f32 %v10218_v1, %v10217_v52  ;;  %v2526_v49 = vadd.f32 %v2420_v27, %v8054_v36  ;;  %v10220_v4 = vrot.slane %v10196_v25, 2  ;;  %v2528_v5 = vadd.f32 %v2423_v54, %v10221_v51  ;;  %v10229_v23 = vld [vmem:[#allocation5_spill] sm:$0xff]  ;;  %v10234_v35 = vld [vmem:[#allocation6_spill] sm:$0xff]  ;;  %v10236_v1 = vld [vmem:[#allocation51_spill] sm:$0xff] }
 0x286   : > { %v2529_v15 = vadd.f32 %v2425_v24, %v8058_v7  ;;  %v10223_v59 = vrot.slane %v10205_v21, 2  ;;  %v2531_v32 = vadd.f32 %v2428_v43, %v8061_v50  ;;  %v2532_v63 = vadd.f32 %v2430_v20, %v8065_v26 }
 0x287   : > { %v2527_v53 = vadd.f32 %v10220_v4, %v10219_v34  ;;  %v10224_v36 = vrot.slane %v10211_v60, 2  ;;  %v2534_v25 = vadd.f32 %v2433_v56, %v8072_v37  ;;  %v2627_v54 = vunpack.c.l.bf16 %v2579_v12  ;;  %v10227_v56 = vld [vmem:[#allocation47_spill] sm:$0xff]  ;;  %v10237_v4 = vld [vmem:[#allocation21_spill] sm:$0xff] }
 0x288   : > { %v2530_v47 = vadd.f32 %v10223_v59, %v10222_v38  ;;  %v2630_v27 = vunpack.c.l.bf16 %v2582_v62  ;;  %v2535_v7 = vadd.f32 %v2435_v2, %v8076_v18  ;;  %v2536_v24 = vadd.f32 %v2436_v3, %v8081_v19  ;;  %v10230_v3 = vld [vmem:[#allocation142_spill] sm:$0xff]  ;;  %v10239_v59 = vld [vmem:[#allocation13_spill] sm:$0xff] }
 0x289   : > { %v2533_v44 = vadd.f32 %v10224_v36, %v8070_v22  ;;  %v2537_v21 = vadd.f32 %v2438_v14, %v8083_v11  ;;  %v2633_v28 = vunpack.c.l.bf16 %v2585_v13  ;;  %v2538_v50 = vadd.f32 %v2440_v55, %v8087_v61  ;;  %v10238_v13 = vld [vmem:[#allocation69_spill] sm:$0xff]  ;;  %v10240_v36 = vld [vmem:[#allocation86_spill] sm:$0xff] }
 0x28a   : > { %v2539_v26 = vadd.f32 %v2441_v9, %v8089_v29  ;;  %v2636_v43 = vunpack.c.l.bf16 %v2588_v6  ;;  %v8221_v20 = vunpack.c.h.bf16 %v2589_v31  ;;  %v2540_v22 = vadd.f32 %v2443_v40, %v8091_v45  ;;  %v10232_v9 = vld [vmem:[#allocation40_spill] sm:$0xff]  ;;  %v10233_v45 = vld [vmem:[#allocation53_spill] sm:$0xff]  ;;  %v10235_v40 = vld [vmem:[#allocation7_spill] sm:$0xff] }
 0x28b   : > { %v2541_v37 = vadd.f32 %v2445_v58, %v8093_v17  ;;  %v8225_v60 = vunpack.c.l.bf16 %v2589_v31  ;;  %v10228_v18 = vunpack.c.l.bf16 %v10227_v56  ;;  %v10231_v11 = vunpack.c.l.bf16 %v10230_v3  ;;  %v10243_v56 = vld [vmem:[#allocation132_spill] sm:$0xff] }
 0x28c   : > { %10225 = vst [vmem:[#allocation130_spill] sm:$0xff] %v8221_v20  ;;  %v2679_v61 = vmul.f32 %v10229_v23, %v2627_v54  ;;  %v2682_v29 = vmul.f32 %v10229_v23, %v2630_v27  ;;  %v2683_v46 = vmul.f32 %v10229_v23, %v10232_v9  ;;  %v2684_v17 = vmul.f32 %v10229_v23, %v10233_v45  ;;  %v10241_v54 = vld [vmem:[#allocation116_spill] sm:$0xff] }
 0x28d   : > { %10226 = vst [vmem:[#allocation14_spill] sm:$0xff] %v8225_v60  ;;  %v2673_v19 = vmul.f32 %v10229_v23, %v10228_v18  ;;  %v2676_v2 = vmul.f32 %v10229_v23, %v10231_v11  ;;  %v2685_v14 = vmul.f32 %v10229_v23, %v2633_v28  ;;  %v2686_v55 = vmul.f32 %v10229_v23, %v10234_v35  ;;  %v10242_v28 = vld [vmem:[#allocation109_spill] sm:$0xff]  ;;  %v10244_v3 = vld [vmem:[#allocation136_spill] sm:$0xff]  ;;  %v10245_v11 = vld [vmem:[#allocation62_spill] sm:$0xff] }
 0x28e   : > { %v2687_v58 = vmul.f32 %v10229_v23, %v10235_v40  ;;  %v2688_v12 = vmul.f32 %v10229_v23, %v2636_v43  ;;  %v2689_v62 = vmul.f32 %v10229_v23, %v8225_v60  ;;  %v2690_v52 = vmul.f32 %v10229_v23, %v8221_v20  ;;  %v10246_v23 = vld [vmem:[#allocation123_spill] sm:$0xff] }
 0x28f   : > { %v2693_v34 = vadd.f32 %v10236_v1, %v2496_v33  ;;  %v2696_v51 = vadd.f32 %v10237_v4, %v2499_v39  ;;  %v2699_v38 = vadd.f32 %v10238_v13, %v2502_v57  ;;  %v2702_v6 = vadd.f32 %v10239_v59, %v2505_v42  ;;  %v10247_v33 = vld [vmem:[#allocation154_spill] sm:$0xff]  ;;  %v10248_v39 = vld [vmem:[#allocation141_spill] sm:$0xff] }
 0x290   : > { %v2705_v31 = vadd.f32 %v10240_v36, %v2508_v30  ;;  %v2708_v27 = vadd.f32 %v10241_v54, %v2511_v48  ;;  %v2711_v43 = vadd.f32 %v10242_v28, %v2514_v16  ;;  %v2714_v18 = vadd.f32 %v10243_v56, %v2517_v41  ;;  %v10249_v57 = vld [vmem:[#allocation138_spill] sm:$0xff]  ;;  %v10250_v42 = vld [vmem:[#allocation149_spill] sm:$0xff]  ;;  %v10251_v36 = vld [vmem:[#allocation27_spill] sm:$0xff] }
 0x291   : > { %v2716_v60 = vadd.f32 %v10245_v11, %v10244_v3  ;;  %v2717_v35 = vadd.f32 %v10246_v23, %v2520_v0  ;;  %v2720_v1 = vadd.f32 %v10247_v33, %v2523_v8  ;;  %v2721_v4 = vadd.f32 %v2673_v19, %v10248_v39  ;;  %v10252_v54 = vld [vmem:[#allocation146_spill] sm:$0xff]  ;;  %v10253_v16 = vld [vmem:[#allocation8_spill] sm:$0xff] }
 0x292   : > { %v2722_v13 = vadd.f32 %v10249_v57, %v2525_v10  ;;  %v2723_v59 = vadd.f32 %v10250_v42, %v2526_v49  ;;  %v2724_v30 = vadd.f32 %v2676_v2, %v2527_v53  ;;  %v2725_v48 = vadd.f32 %v10251_v36, %v2528_v5  ;;  %v10254_v41 = vld [vmem:[#allocation172_spill] sm:$0xff]  ;;  %v10255_v10 = vld [vmem:[#allocation38_spill] sm:$0xff]  ;;  %v10256_v53 = vld [vmem:[#allocation167_spill] sm:$0xff] }
 0x293   : > { %v8267_v28 = vmul.f32 %v10253_v16, %v10252_v54  ;;  %v2726_v56 = vadd.f32 %v10254_v41, %v2529_v15  ;;  %v2727_v3 = vadd.f32 %v2679_v61, %v2530_v47  ;;  %v8272_v0 = vmul.f32 %v10253_v16, %v10233_v45  ;;  %v10257_v5 = vld [vmem:[#allocation160_spill] sm:$0xff]  ;;  %v10258_v23 = vld [vmem:[#allocation6_spill] sm:$0xff] }
 0x294   : > { %v8276_v8 = vmul.f32 %v10253_v16, %v10235_v40  ;;  %v2728_v49 = vadd.f32 %v10255_v10, %v2531_v32  ;;  %v2729_v19 = vadd.f32 %v10256_v53, %v2532_v63  ;;  %v2767_v2 = vmul.f32 %v10253_v16, %v10257_v5  ;;  %v10259_v32 = vld [vmem:[#allocation14_spill] sm:$0xff]  ;;  %v10281_v45 = vld [vmem:[#allocation76_spill] sm:$0xff] }
 0x295   : > { %v8284_v11 = vmul.f32 %v10253_v16, %v8221_v20  ;;  %v2730_v15 = vadd.f32 %v2682_v29, %v2533_v44  ;;  %v2731_v47 = vadd.f32 %v2683_v46, %v2534_v25  ;;  %v2769_v61 = vmul.f32 %v10253_v16, %v10232_v9  ;;  %v10260_v20 = vld [vmem:[#allocation97_spill] sm:$0xff] }
 0x296   : > { %v2771_v33 = vmul.f32 %v10253_v16, %v10258_v23  ;;  %v2732_v39 = vadd.f32 %v2684_v17, %v2535_v7  ;;  %v2733_v57 = vadd.f32 %v2685_v14, %v2536_v24  ;;  %v2773_v63 = vmul.f32 %v10253_v16, %v10259_v32  ;;  %v10262_v24 = vld [vmem:[#allocation17_spill] sm:$0xff]  ;;  %v10277_v32 = vld [vmem:[#allocation60_spill] sm:$0xff] }
 0x297   : > { %v2844_v42 = vrot.slane %v8267_v28, 1  ;;  %v2734_v36 = vadd.f32 %v2686_v55, %v2537_v21  ;;  %v2735_v54 = vadd.f32 %v2687_v58, %v2538_v50  ;;  %v2847_v41 = vrot.slane %v8272_v0, 1  ;;  %v10264_v21 = vld [vmem:[#allocation150_spill] sm:$0xff]  ;;  %v10266_v55 = vld [vmem:[#allocation139_spill] sm:$0xff] }
 0x298   : > { %v2850_v44 = vrot.slane %v8276_v8, 1  ;;  %v2736_v25 = vadd.f32 %v2688_v12, %v2539_v26  ;;  %v2737_v29 = vadd.f32 %v2689_v62, %v2540_v22  ;;  %v2843_v46 = vrot.slane %v2767_v2, 1  ;;  %v10268_v26 = vld [vmem:[#allocation170_spill] sm:$0xff] }
 0x299   : > { %v2853_v10 = vrot.slane %v8284_v11, 1  ;;  %v2738_v53 = vadd.f32 %v2690_v52, %v2541_v37  ;;  %v10261_v7 = vrot.slane %v10260_v20, 1  ;;  %v10263_v17 = vrot.slane %v10262_v24, 1  ;;  %v10270_v12 = vld [vmem:[#allocation162_spill] sm:$0xff] }
 0x29a   : > { %v2846_v16 = vrot.slane %v2769_v61, 1  ;;  %v2849_v28 = vrot.slane %v2771_v33, 1  ;;  %v10265_v50 = vrot.slane %v10264_v21, 1  ;;  %v10267_v58 = vrot.slane %v10266_v55, 1  ;;  %v10272_v61 = vld [vmem:[#allocation44_spill] sm:$0xff]  ;;  %v10274_v24 = vld [vmem:[#allocation58_spill] sm:$0xff] }
 0x29b   : > { %v2836_v14 = vsel %vm1372_vm2, %v10263_v17, %v10261_v7  ;;  %v10269_v22 = vrot.slane %v10268_v26, 1  ;;  %v10271_v62 = vrot.slane %v10270_v12, 1  ;;  %v2845_v52 = vsel %vm1372_vm2, %v2843_v46, %v2844_v42 }
 0x29c   : > { %v2839_v0 = vsel %vm1372_vm2, %v10267_v58, %v10265_v50  ;;  %v2852_v8 = vrot.slane %v2773_v63, 1  ;;  %v2848_v2 = vsel %vm1372_vm2, %v2846_v16, %v2847_v41  ;;  %v2851_v11 = vsel %vm1372_vm2, %v2849_v28, %v2850_v44 }
 0x29d   : > { %v2842_v37 = vsel %vm1372_vm2, %v10271_v62, %v10269_v22  ;;  %v10273_v33 = vrot.slane %v10272_v61, 1  ;;  %v10275_v17 = vrot.slane %v10274_v24, 1  ;;  %v10278_v40 = vrot.slane %v10277_v32, 1  ;;  %v10279_v62 = vld [vmem:[#allocation19_spill] sm:$0xff]  ;;  %v10287_v24 = vld [vmem:[#allocation113_spill] sm:$0xff] }
 0x29e   : > { %v2854_v58 = vsel %vm1372_vm2, %v2852_v8, %v2853_v10  ;;  %v10280_v63 = vrot.slane %v10279_v62, 1  ;;  %v10282_v9 = vrot.slane %v10281_v45, 1  ;;  %v10293_v45 = vld [vmem:[#allocation92_spill] sm:$0xff] }
 0x29f   : > { %v8316_v7 = vadd.f32 %v10273_v33, %v2693_v34  ;;  %v8320_v50 = vadd.f32 %v10275_v17, %v2696_v51  ;;  %v8325_v22 = vadd.f32 %v10278_v40, %v2699_v38  ;;  %v10283_v34 = vld [vmem:[#allocation29_spill] sm:$0xff] }
 0x2a0   : > { %v8329_v23 = vadd.f32 %v10280_v63, %v2702_v6  ;;  %v8333_v5 = vadd.f32 %v10282_v9, %v2705_v31  ;;  %v10284_v61 = vrot.slane %v10283_v34, 1  ;;  %v10286_v51 = vld [vmem:[#allocation117_spill] sm:$0xff]  ;;  %v10292_v63 = vld [vmem:[#allocation42_spill] sm:$0xff]  ;;  %v10294_v9 = vrot.slane %v10293_v45, 1  ;;  %v2951_v45 = vld [vmem:[#allocation2 + $0x2c] sm:$0x1] }
 0x2a1   : > { %10276 = vst [vmem:[#allocation20_spill] sm:$0xff] %v8320_v50  ;;  %v8341_v17 = vadd.f32 %v10287_v24, %v10286_v51  ;;  %v10288_v50 = vld [vmem:[#allocation104_spill] sm:$0xff]  ;;  %v10290_v38 = vld [vmem:[#allocation129_spill] sm:$0xff]  ;;  %v10298_v24 = vld [vmem:[#allocation118_spill] sm:$0xff] }
 0x2a2   : > { %v8337_v33 = vadd.f32 %v10284_v61, %v2708_v27  ;;  %v10289_v32 = vrot.slane %v10288_v50, 1  ;;  %v10291_v62 = vrot.slane %v10290_v38, 1  ;;  %v8354_v31 = vadd.f32 %v10294_v9, %v10292_v63  ;;  %v10295_v34 = vld [vmem:[#allocation125_spill] sm:$0xff]  ;;  %v10296_v61 = vld [vmem:[#allocation78_spill] sm:$0xff] }
 0x2a3   : > { %v8357_v27 = vadd.f32 %v10295_v34, %v2716_v60  ;;  %v8364_v50 = vadd.f32 %v2836_v14, %v10298_v24  ;;  %v10301_v60 = vrot.slane %v10264_v21, 1  ;;  %v8384_v14 = vadd.f32 %v2842_v37, %v2725_v48  ;;  %v2956_v48 = vld [vmem:[#allocation2 + $0x7c] sm:$0x1]  ;;  %v2957_v37 = vld [vmem:[#allocation2 + $0x8c] sm:$0x1] }
 0x2a4   : > { %10285 = vst [vmem:[#allocation33_spill] sm:$0xff] %v8337_v33  ;;  %v8345_v40 = vadd.f32 %v10289_v32, %v2711_v43  ;;  %v8349_v6 = vadd.f32 %v10291_v62, %v2714_v18  ;;  %v10297_v33 = vrot.slane %v10296_v61, 1  ;;  %v10299_v43 = vrot.slane %v10260_v20, 1 }
 0x2a5   : > { %v10300_v18 = vrot.slane %v10266_v55, 1  ;;  %v8374_v62 = vadd.f32 %v2839_v0, %v2722_v13  ;;  %v8378_v63 = vadd.f32 %v10301_v60, %v2723_v59  ;;  %v10303_v20 = vrot.slane %v10268_v26, 1  ;;  %v2953_v13 = vld [vmem:[#allocation2 + $0x4c] sm:$0x1]  ;;  %v2954_v0 = vld [vmem:[#allocation2 + $0x5c] sm:$0x1] }
 0x2a6   : > { %v8361_v51 = vadd.f32 %v10297_v33, %v2717_v35  ;;  %v8368_v32 = vadd.f32 %v10299_v43, %v2720_v1  ;;  %v10302_v35 = vrot.slane %v10270_v12, 1  ;;  %v8390_v55 = vadd.f32 %v2843_v46, %v2727_v3  ;;  %v2958_v26 = vld [vmem:[#allocation2 + $0x9c] sm:$0x1] }
 0x2a7   : > { %v8372_v38 = vadd.f32 %v10300_v18, %v2721_v4  ;;  %v8388_v1 = vadd.f32 %v10303_v20, %v2726_v56  ;;  %v2952_v4 = vld [vmem:[#allocation2 + $0x3c] sm:$0x1]  ;;  %v8392_v9 = vadd.f32 %v2845_v52, %v2728_v49  ;;  %v8394_v59 = vadd.f32 %v2844_v42, %v2729_v19  ;;  %v2959_v49 = vld [vmem:[#allocation2 + $0xac] sm:$0x1] }
 0x2a8   : > { %v8382_v33 = vadd.f32 %v10302_v35, %v2724_v30  ;;  %v8396_v21 = vadd.f32 %v2846_v16, %v2730_v15  ;;  %v8398_v12 = vadd.f32 %v2848_v2, %v2731_v47  ;;  %v2955_v30 = vld [vmem:[#allocation2 + $0x6c] sm:$0x1]  ;;  %v8400_v34 = vadd.f32 %v2847_v41, %v2732_v39  ;;  %v2960_v52 = vld [vmem:[#allocation2 + $0xbc] sm:$0x1] }
 0x2a9   : > { %v8402_v56 = vadd.f32 %v2849_v28, %v2733_v57  ;;  %v8404_v3 = vadd.f32 %v2851_v11, %v2734_v36  ;;  %v8406_v46 = vadd.f32 %v2850_v44, %v2735_v54  ;;  %v8408_v19 = vadd.f32 %v2852_v8, %v2736_v25  ;;  %v2961_v42 = vld [vmem:[#allocation2 + $0xcc] sm:$0x1]  ;;  %v2962_v16 = vld [vmem:[#allocation2 + $0xdc] sm:$0x1] }
 0x2aa   : > { %10304 = vst [vmem:[#allocation18_spill] sm:$0xff] %v8396_v21  ;;  %10305 = vst [vmem:[#allocation101_spill] sm:$0xff] %v8398_v12  ;;  %v8410_v15 = vadd.f32 %v2854_v58, %v2737_v29  ;;  %v8412_v47 = vadd.f32 %v2853_v10, %v2738_v53  ;;  %v2963_v2 = vld [vmem:[#allocation2 + $0xec] sm:$0x1]  ;;  %v2967_v39 = vunpack.c.l.bf16 %v2951_v45  ;;  %v2964_v41 = vld [vmem:[#allocation2 + $0xfc] sm:$0x1]  ;;  %v2968_v36 = vunpack.c.l.bf16 %v2952_v4 }
 0x2ab   : > { %10306 = vst [vmem:[#allocation127_spill] sm:$0xff] %v8400_v34  ;;  %10307 = vst [vmem:[#allocation11_spill] sm:$0xff] %v8402_v56  ;;  %v2965_v57 = vld [vmem:[#allocation2 + $0x10c] sm:$0x1]  ;;  %v2966_v28 = vld [vmem:[#allocation2 + $0x11c] sm:$0x1]  ;;  %v2969_v11 = vunpack.c.l.bf16 %v2953_v13  ;;  %v2970_v54 = vunpack.c.l.bf16 %v2954_v0  ;;  %v2971_v44 = vunpack.c.l.bf16 %v2955_v30  ;;  %v2972_v61 = vunpack.c.l.bf16 %v2956_v48 }
 0x2ac   : > { %10308 = vst [vmem:[#allocation50_spill] sm:$0xff] %v8404_v3  ;;  %10309 = vst [vmem:[#allocation28_spill] sm:$0xff] %v8406_v46  ;;  %v2973_v24 = vunpack.c.l.bf16 %v2957_v37  ;;  %v2974_v43 = vunpack.c.l.bf16 %v2958_v26  ;;  %v2975_v25 = vunpack.c.l.bf16 %v2959_v49  ;;  %v2976_v8 = vunpack.c.l.bf16 %v2960_v52  ;;  %v5218_v45 = vld [vmem:[%s9368_s3 + $0x8] ss:$0 sm:$0xff]  ;;  %v10320_v46 = vld [vmem:[#allocation130_spill] sm:$0xff] }
 0x2ad   : > { %10310 = vst [vmem:[#allocation67_spill] sm:$0xff] %v8408_v19  ;;  %10311 = vst [vmem:[#allocation12_spill] sm:$0xff] %v8410_v15  ;;  %v2977_v29 = vunpack.c.l.bf16 %v2961_v42  ;;  %v2978_v58 = vunpack.c.l.bf16 %v2962_v16  ;;  %v2979_v10 = vunpack.c.l.bf16 %v2963_v2  ;;  %v2980_v53 = vunpack.c.l.bf16 %v2964_v41  ;;  %v10313_v42 = vld [vmem:[#allocation161_spill] sm:$0xff]  ;;  %v10314_v41 = vld [vmem:[#allocation160_spill] sm:$0xff] }
 0x2ae   : > { %10312 = vst [vmem:[#allocation84_spill] sm:$0xff] %v8412_v47  ;;  %v2981_v18 = vunpack.c.l.bf16 %v2965_v57  ;;  %v2982_v60 = vunpack.c.l.bf16 %v2966_v28  ;;  %v2989_v35 = vmul.f32 %v5218_v45, %v2967_v39  ;;  %v2992_v20 = vmul.f32 %v5218_v45, %v2968_v36  ;;  %v10315_v47 = vld [vmem:[#allocation40_spill] sm:$0xff] }
 0x2af   : > { %v2995_v4 = vmul.f32 %v5218_v45, %v2969_v11  ;;  %v2998_v13 = vmul.f32 %v5218_v45, %v2970_v54  ;;  %v3001_v0 = vmul.f32 %v5218_v45, %v2971_v44  ;;  %v3004_v30 = vmul.f32 %v5218_v45, %v2972_v61  ;;  %v10316_v11 = vld [vmem:[#allocation53_spill] sm:$0xff] }
 0x2b0   : > { %v3007_v48 = vmul.f32 %v5218_v45, %v2973_v24  ;;  %v3010_v37 = vmul.f32 %v5218_v45, %v2974_v43  ;;  %v3013_v26 = vmul.f32 %v5218_v45, %v2975_v25  ;;  %v3016_v49 = vmul.f32 %v5218_v45, %v2976_v8  ;;  %v10317_v43 = vld [vmem:[#allocation6_spill] sm:$0xff]  ;;  %v10318_v8 = vld [vmem:[#allocation7_spill] sm:$0xff] }
 0x2b1   : > { %v3019_v52 = vmul.f32 %v5218_v45, %v2977_v29  ;;  %v8418_v16 = vmul.f32 %v5218_v45, %v10313_v42  ;;  %v3022_v2 = vmul.f32 %v5218_v45, %v2978_v58  ;;  %v8421_v57 = vmul.f32 %v5218_v45, %v10314_v41  ;;  %v10319_v41 = vld [vmem:[#allocation14_spill] sm:$0xff] }
 0x2b2   : > { %v3025_v28 = vmul.f32 %v5218_v45, %v2979_v10  ;;  %v8424_v39 = vmul.f32 %v5218_v45, %v10315_v47  ;;  %v3086_v36 = vrot.slane %v2989_v35, 2  ;;  %v3027_v54 = vmul.f32 %v5218_v45, %v10316_v11  ;;  %v10321_v11 = vld [vmem:[#allocation48_spill] sm:$0xff] }
 0x2b3   : > { %v3028_v44 = vmul.f32 %v5218_v45, %v2980_v53  ;;  %v3091_v61 = vrot.slane %v2992_v20, 2  ;;  %v3096_v24 = vrot.slane %v2995_v4, 2  ;;  %v8428_v25 = vmul.f32 %v5218_v45, %v10317_v43  ;;  %v10323_v43 = vld [vmem:[#allocation37_spill] sm:$0xff] }
 0x2b4   : > { %v3030_v29 = vmul.f32 %v5218_v45, %v10318_v8  ;;  %v3101_v42 = vrot.slane %v2998_v13, 2  ;;  %v3106_v58 = vrot.slane %v3001_v0, 2  ;;  %v3031_v15 = vmul.f32 %v5218_v45, %v2981_v18  ;;  %v10325_v13 = vld [vmem:[#allocation63_spill] sm:$0xff] }
 0x2b5   : > { %v8432_v19 = vmul.f32 %v5218_v45, %v10319_v41  ;;  %v3111_v10 = vrot.slane %v3004_v30, 2  ;;  %v3116_v47 = vrot.slane %v3007_v48, 2  ;;  %v3033_v35 = vmul.f32 %v5218_v45, %v10320_v46  ;;  %v10327_v30 = vld [vmem:[#allocation74_spill] sm:$0xff] }
 0x2b6   : > { %v3034_v3 = vmul.f32 %v5218_v45, %v2982_v60  ;;  %v10322_v53 = vrot.slane %v10321_v11, 2  ;;  %v3121_v4 = vrot.slane %v3010_v37, 2  ;;  %v10324_v56 = vrot.slane %v10323_v43, 2  ;;  %v10329_v60 = vld [vmem:[#allocation79_spill] sm:$0xff] }
 0x2b7   : > { %v10326_v0 = vrot.slane %v10325_v13, 2  ;;  %v3126_v41 = vrot.slane %v3013_v26, 2  ;;  %v3131_v34 = vrot.slane %v3016_v49, 2  ;;  %v10328_v48 = vrot.slane %v10327_v30, 2  ;;  %v10335_v26 = vld [vmem:[#allocation168_spill] sm:$0xff]  ;;  %v10336_v30 = vld [vmem:[#allocation83_spill] sm:$0xff] }
 0x2b8   : > { %v3087_v20 = vsel %vm1649_vm3, %v10322_v53, %v3086_v36  ;;  %v3092_v8 = vsel %vm1649_vm3, %v10324_v56, %v3091_v61  ;;  %v10330_v45 = vrot.slane %v10329_v60, 2  ;;  %v3136_v36 = vrot.slane %v3019_v52, 2  ;;  %v10331_v53 = vld [vmem:[#allocation100_spill] sm:$0xff]  ;;  %v10333_v61 = vld [vmem:[#allocation106_spill] sm:$0xff] }
 0x2b9   : > { %v3097_v18 = vsel %vm1649_vm3, %v10326_v0, %v3096_v24  ;;  %v3102_v46 = vsel %vm1649_vm3, %v10328_v48, %v3101_v42  ;;  %v3141_v37 = vrot.slane %v3022_v2, 2  ;;  %v10332_v43 = vrot.slane %v10331_v53, 2  ;;  %v10338_v48 = vld [vmem:[#allocation120_spill] sm:$0xff] }
 0x2ba   : > { %v3107_v11 = vsel %vm1649_vm3, %v10330_v45, %v3106_v58  ;;  %v10334_v13 = vrot.slane %v10333_v61, 2  ;;  %v3144_v49 = vrot.slane %v10335_v26, 2  ;;  %v3146_v0 = vrot.slane %v3025_v28, 2  ;;  %v10340_v58 = vld [vmem:[#allocation23_spill] sm:$0xff] }
 0x2bb   : > { %v3112_v56 = vsel %vm1649_vm3, %v10332_v43, %v3111_v10  ;;  %v10337_v12 = vrot.slane %v10336_v30, 2  ;;  %v10339_v60 = vrot.slane %v10338_v48, 2  ;;  %v10341_v52 = vrot.slane %v10340_v58, 2  ;;  %v10342_v45 = vld [vmem:[#allocation155_spill] sm:$0xff]  ;;  %v10344_v10 = vld [vmem:[#allocation140_spill] sm:$0xff] }
 0x2bc   : > { %v3117_v24 = vsel %vm1649_vm3, %v10334_v13, %v3116_v47  ;;  %v10343_v53 = vrot.slane %v10342_v45, 2  ;;  %v10345_v43 = vrot.slane %v10344_v10, 2  ;;  %v9575_v47 = vrot.slane %v8418_v16, 2  ;;  %v10348_v26 = vld [vmem:[#allocation151_spill] sm:$0xff] }
 0x2bd   : > { %v3122_v42 = vsel %vm1649_vm3, %v10337_v12, %v3121_v4  ;;  %v3125_v2 = vsel %vm1649_vm3, %v10341_v52, %v10339_v60  ;;  %v10346_v28 = vmov %v10339_v60  ;;  %v10349_v30 = vrot.slane %v10348_v26, 2  ;;  %v10350_v60 = vld [vmem:[#allocation24_spill] sm:$0xff] }
 0x2be   : > { %v8470_v61 = vsel %vm1649_vm3, %v10345_v43, %v10343_v53  ;;  %v3127_v13 = vsel %vm1649_vm3, %v10346_v28, %v3126_v41  ;;  %v10347_v12 = vmov %v10343_v53  ;;  %v10351_v52 = vrot.slane %v10350_v60, 2  ;;  %v10353_v41 = vld [vmem:[#allocation171_spill] sm:$0xff] }
 0x2bf   : > { %v8479_v4 = vsel %vm1649_vm3, %v10347_v12, %v3131_v34  ;;  %v9576_v53 = vrot.slane %v8421_v57, 2  ;;  %v10352_v43 = vmov %v10349_v30  ;;  %v10354_v28 = vrot.slane %v10353_v41, 2 }
 0x2c0   : > { %v8486_v21 = vsel %vm1649_vm3, %v10351_v52, %v10349_v30  ;;  %v8492_v48 = vsel %vm1649_vm3, %v10352_v43, %v3136_v36  ;;  %v3149_v30 = vrot.slane %v3027_v54, 2  ;;  %v8512_v36 = vsel %vm1649_vm3, %v3144_v49, %v3146_v0  ;;  %v10360_v0 = vld [vmem:[#allocation39_spill] sm:$0xff] }
 0x2c1   : > { %v8499_v34 = vsel %vm1649_vm3, %v9575_v47, %v10354_v28  ;;  %v10355_v45 = vmov %v10354_v28  ;;  %v8509_v26 = vsel %vm1649_vm3, %v9576_v53, %v3144_v49  ;;  %10356 = vst [vmem:[#allocation115_spill] sm:$0xff] %v8512_v36  ;;  %v8516_v43 = vadd.f32 %v3087_v20, %v8316_v7  ;;  %v10357_v47 = vld [vmem:[#allocation20_spill] sm:$0xff]  ;;  %v10361_v36 = vld [vmem:[#allocation87_spill] sm:$0xff] }
 0x2c2   : > { %v8504_v12 = vsel %vm1649_vm3, %v10355_v45, %v3141_v37  ;;  %v3151_v28 = vrot.slane %v3028_v44, 2  ;;  %v8519_v41 = vadd.f32 %v3092_v8, %v10357_v47  ;;  %v8522_v37 = vadd.f32 %v3097_v18, %v8325_v22  ;;  %v10365_v18 = vld [vmem:[#allocation33_spill] sm:$0xff] }
 0x2c3   : > { %v8525_v54 = vadd.f32 %v3102_v46, %v8329_v23  ;;  %v9577_v45 = vrot.slane %v8428_v25, 2  ;;  %v3154_v53 = vrot.slane %v3030_v29, 2  ;;  %v3156_v49 = vrot.slane %v3031_v15, 2  ;;  %v10366_v15 = vld [vmem:[#allocation110_spill] sm:$0xff]  ;;  %v10367_v29 = vld [vmem:[#allocation25_spill] sm:$0xff] }
 0x2c4   : > { %10358 = vst [vmem:[#allocation111_spill] sm:$0xff] %v8522_v37  ;;  %v8530_v52 = vadd.f32 %v10361_v36, %v10360_v0  ;;  %v10363_v7 = vrot.slane %v8424_v39, 2  ;;  %v3159_v20 = vrot.slane %v3033_v35, 2  ;;  %v3161_v8 = vrot.slane %v3034_v3, 2 }
 0x2c5   : > { %10359 = vst [vmem:[#allocation133_spill] sm:$0xff] %v8525_v54  ;;  %v8538_v22 = vadd.f32 %v3107_v11, %v8333_v5  ;;  %v9580_v23 = vrot.slane %v8432_v19, 2  ;;  %v8542_v46 = vadd.f32 %v3112_v56, %v10365_v18  ;;  %v10368_v47 = vrot.slane %v10367_v29, 2  ;;  %v10369_v18 = vld [vmem:[#allocation114_spill] sm:$0xff] }
 0x2c6   : > { %10362 = vst [vmem:[#allocation124_spill] sm:$0xff] %v8530_v52  ;;  %v8535_v44 = vsel %vm1649_vm3, %v10363_v7, %v3149_v30  ;;  %v3261_v0 = vsub.f32 0.0, %v8516_v43  ;;  %v8551_v7 = vsel %vm1649_vm3, %v3149_v30, %v3151_v28  ;;  %v3264_v3 = vsub.f32 0.0, %v8519_v41 }
 0x2c7   : > { %10364 = vst [vmem:[#allocation90_spill] sm:$0xff] %v8538_v22  ;;  %v8547_v36 = vadd.f32 %v10368_v47, %v10366_v15  ;;  %v3267_v5 = vsub.f32 0.0, %v8522_v37  ;;  %v3270_v35 = vsub.f32 0.0, %v8525_v54  ;;  %v8559_v11 = vsel %vm1649_vm3, %v9577_v45, %v3154_v53  ;;  %v10371_v45 = vld [vmem:[#allocation30_spill] sm:$0xff] }
 0x2c8   : > { %v8562_v56 = vsel %vm1649_vm3, %v3154_v53, %v3156_v49  ;;  %v8566_v15 = vadd.f32 %v10369_v18, %v8341_v17  ;;  %v3272_v30 = vsub.f32 0.0, %v8530_v52  ;;  %v8572_v28 = vsel %vm1649_vm3, %v9580_v23, %v3159_v20  ;;  %v10370_v49 = vld [vmem:[#allocation134_spill] sm:$0xff] }
 0x2c9   : > { %v8575_v29 = vsel %vm1649_vm3, %v3159_v20, %v3161_v8  ;;  %v8578_v47 = vadd.f32 %v3117_v24, %v8345_v40  ;;  %v3273_v53 = vsub.f32 0.0, %v8538_v22  ;;  %v8583_v54 = vadd.f32 %v10371_v45, %v10370_v49 }
 0x2ca   : > { %v3276_v17 = vsub.f32 0.0, %v8542_v46  ;;  %v3277_v18 = vsub.f32 0.0, %v8547_v36  ;;  %v3311_v52 = vmul.f32 1.442695, %v3261_v0  ;;  %v8588_v23 = vadd.f32 %v3122_v42, %v8349_v6 }
 0x2cb   : > { %v3317_v37 = vmul.f32 1.442695, %v3264_v3  ;;  %v3323_v20 = vmul.f32 1.442695, %v3267_v5  ;;  %v3329_v8 = vmul.f32 1.442695, %v3270_v35  ;;  %v8597_v49 = vadd.f32 %v3125_v2, %v8357_v27 }
 0x2cc   : > { %v10372_v40 = vrot.slane %v10340_v58, 2  ;;  %v3278_v22 = vsub.f32 0.0, %v8566_v15  ;;  %5060 = vpow2.f32 %v3311_v52  ;;  %v3333_v45 = vmul.f32 1.442695, %v3272_v30 }
 0x2cd   : > { %v3279_v0 = vsub.f32 0.0, %v8578_v47  ;;  %5062 = vpow2.f32 %v3317_v37  ;;  %v3335_v6 = vmul.f32 1.442695, %v3273_v53  ;;  %v8601_v42 = vadd.f32 %v3127_v13, %v8361_v51 }
 0x2ce   : > { %v8593_v24 = vadd.f32 %v10372_v40, %v8354_v31  ;;  %v3281_v3 = vsub.f32 0.0, %v8583_v54  ;;  %5064 = vpow2.f32 %v3323_v20  ;;  %v3341_v58 = vmul.f32 1.442695, %v3276_v17  ;;  %v10373_v31 = vld [vmem:[#allocation70_spill] sm:$0xff] }
 0x2cf   : > { %v10374_v5 = vrot.slane %v10344_v10, 2  ;;  %v3282_v52 = vsub.f32 0.0, %v8588_v23  ;;  %5066 = vpow2.f32 %v3329_v8  ;;  %v3343_v27 = vmul.f32 1.442695, %v3277_v18 }
 0x2d0   : > { %v8612_v2 = vadd.f32 %v8470_v61, %v8364_v50  ;;  %v3283_v51 = vsub.f32 0.0, %v8593_v24  ;;  %5068 = vpow2.f32 %v3333_v45  ;;  %v3345_v13 = vmul.f32 1.442695, %v3278_v22 }
 0x2d1   : > { %v8607_v35 = vadd.f32 %v10374_v5, %v10373_v31  ;;  %v8617_v37 = vadd.f32 %v8479_v4, %v8368_v32  ;;  %v3284_v10 = vsub.f32 0.0, %v8597_v49  ;;  %5070 = vpow2.f32 %v3335_v6 }
 0x2d2   : > { %v3347_v30 = vmul.f32 1.442695, %v3279_v0  ;;  %v10375_v53 = vrot.slane %v10350_v60, 2  ;;  %v3285_v50 = vsub.f32 0.0, %v8601_v42  ;;  %5072 = vpow2.f32 %v3341_v58 }
 0x2d3   : > { %v3351_v61 = vmul.f32 1.442695, %v3281_v3  ;;  %v8628_v22 = vadd.f32 %v8486_v21, %v8374_v62  ;;  %v3286_v32 = vsub.f32 0.0, %v8607_v35  ;;  %5074 = vpow2.f32 %v3343_v27 }
 0x2d4   : > { %v8623_v17 = vadd.f32 %v10375_v53, %v8372_v38  ;;  %v3353_v4 = vmul.f32 1.442695, %v3282_v52  ;;  %v8633_v18 = vadd.f32 %v8492_v48, %v8378_v63  ;;  %v3287_v60 = vsub.f32 0.0, %v8612_v2 }
 0x2d5   : > { %5076 = vpow2.f32 %v3345_v13  ;;  %v3355_v38 = vmul.f32 1.442695, %v3283_v51  ;;  %v10376_v20 = vrot.slane %v8418_v16, 2  ;;  %v3288_v62 = vsub.f32 0.0, %v8617_v37 }
 0x2d6   : > { %5078 = vpow2.f32 %v3347_v30  ;;  %v3357_v21 = vmul.f32 1.442695, %v3284_v10  ;;  %v8642_v40 = vpop.eup %5060  ;;  %v8646_v45 = vadd.f32 %v8499_v34, %v8384_v14  ;;  %v3289_v63 = vsub.f32 0.0, %v8623_v17  ;;  %v10384_v30 = vld [vmem:[#allocation18_spill] sm:$0xff] }
 0x2d7   : > { %v8639_v8 = vadd.f32 %v10376_v20, %v8382_v33  ;;  %5080 = vpow2.f32 %v3351_v61  ;;  %v3359_v48 = vmul.f32 1.442695, %v3285_v50  ;;  %v8649_v0 = vpop.eup %5062  ;;  %v8653_v33 = vadd.f32 %v8504_v12, %v8388_v1 }
 0x2d8   : > { %10377 = vst [vmem:[#allocation52_spill] sm:$0xff] %v8646_v45  ;;  %v3290_v16 = vsub.f32 0.0, %v8628_v22  ;;  %5082 = vpow2.f32 %v3353_v4  ;;  %v3361_v6 = vmul.f32 1.442695, %v3286_v32  ;;  %v8656_v3 = vpop.eup %5064  ;;  %v10379_v14 = vrot.slane %v8421_v57, 2  ;;  %v10382_v57 = vld [vmem:[#allocation115_spill] sm:$0xff] }
 0x2d9   : > { %10378 = vst [vmem:[#allocation46_spill] sm:$0xff] %v8653_v33  ;;  %v3291_v58 = vsub.f32 0.0, %v8633_v18  ;;  %5084 = vpow2.f32 %v3355_v38  ;;  %v3363_v31 = vmul.f32 1.442695, %v3287_v60  ;;  %v8664_v5 = vpop.eup %5066  ;;  %v8668_v1 = vadd.f32 %v8509_v26, %v8392_v9  ;;  %v10387_v32 = vld [vmem:[#allocation101_spill] sm:$0xff] }
 0x2da   : > { %v8661_v34 = vadd.f32 %v10379_v14, %v8390_v55  ;;  %v3292_v12 = vsub.f32 0.0, %v8639_v8  ;;  %5086 = vpow2.f32 %v3357_v21  ;;  %v3365_v52 = vmul.f32 1.442695, %v3288_v62  ;;  %v8671_v27 = vpop.eup %5068 }
 0x2db   : > { %10381 = vst [vmem:[#allocation68_spill] sm:$0xff] %v8668_v1  ;;  %v8675_v55 = vadd.f32 %v10382_v57, %v8394_v59  ;;  %v3293_v51 = vsub.f32 0.0, %v8646_v45  ;;  %5088 = vpow2.f32 %v3359_v48  ;;  %v3367_v13 = vmul.f32 1.442695, %v3289_v63  ;;  %v8678_v10 = vpop.eup %5070  ;;  %v10391_v48 = vld [vmem:[#allocation11_spill] sm:$0xff] }
 0x2dc   : > { %10380 = vst [vmem:[#allocation71_spill] sm:$0xff] %v8661_v34  ;;  %v10385_v9 = vrot.slane %v8424_v39, 2  ;;  %v3294_v53 = vsub.f32 0.0, %v8653_v33  ;;  %5090 = vpow2.f32 %v3361_v6  ;;  %v3369_v50 = vmul.f32 1.442695, %v3290_v16  ;;  %v8686_v61 = vpop.eup %5072  ;;  %v10389_v39 = vld [vmem:[#allocation127_spill] sm:$0xff] }
 0x2dd   : > { %10383 = vst [vmem:[#allocation88_spill] sm:$0xff] %v8675_v55  ;;  %v8690_v59 = vadd.f32 %v8535_v44, %v10387_v32  ;;  %v3295_v4 = vsub.f32 0.0, %v8661_v34  ;;  %5092 = vpow2.f32 %v3363_v31  ;;  %v3371_v60 = vmul.f32 1.442695, %v3291_v58  ;;  %v8693_v38 = vpop.eup %5074  ;;  %v10394_v31 = vld [vmem:[#allocation50_spill] sm:$0xff]  ;;  %v10398_v32 = vld [vmem:[#allocation67_spill] sm:$0xff] }
 0x2de   : > { %v8683_v26 = vadd.f32 %v10385_v9, %v10384_v30  ;;  %v8697_v20 = vadd.f32 %v8551_v7, %v10389_v39  ;;  %v3296_v62 = vsub.f32 0.0, %v8668_v1  ;;  %5094 = vpow2.f32 %v3365_v52  ;;  %v10396_v30 = vld [vmem:[#allocation28_spill] sm:$0xff]  ;;  %v10416_v1 = vld [vmem:[#allocation82_spill] sm:$0xff] }
 0x2df   : > { %10388 = vst [vmem:[#allocation112_spill] sm:$0xff] %v8690_v59  ;;  %v3373_v21 = vmul.f32 1.442695, %v3292_v12  ;;  %v8700_v63 = vpop.eup %5076  ;;  %v10392_v44 = vrot.slane %v8428_v25, 2  ;;  %v3297_v6 = vsub.f32 0.0, %v8675_v55  ;;  %5096 = vpow2.f32 %v3367_v13  ;;  %v10424_v34 = vld [vmem:[#allocation96_spill] sm:$0xff] }
 0x2e0   : > { %10386 = vst [vmem:[#allocation85_spill] sm:$0xff] %v8683_v26  ;;  %10390 = vst [vmem:[#allocation102_spill] sm:$0xff] %v8697_v20  ;;  %v3375_v14 = vmul.f32 1.442695, %v3293_v51  ;;  %v8708_v58 = vpop.eup %5078  ;;  %v8712_v7 = vadd.f32 %v8559_v11, %v10394_v31  ;;  %v3298_v52 = vsub.f32 0.0, %v8683_v26  ;;  %5098 = vpow2.f32 %v3369_v50 }
 0x2e1   : > { %v8705_v16 = vadd.f32 %v10392_v44, %v10391_v48  ;;  %v3377_v12 = vmul.f32 1.442695, %v3294_v53  ;;  %v8715_v57 = vpop.eup %5080  ;;  %v8719_v25 = vadd.f32 %v8562_v56, %v10396_v30  ;;  %v3299_v9 = vsub.f32 0.0, %v8690_v59  ;;  %v10401_v44 = vld [vmem:[#allocation12_spill] sm:$0xff]  ;;  %v10409_v59 = vld [vmem:[#allocation15_spill] sm:$0xff] }
 0x2e2   : > { %10395 = vst [vmem:[#allocation122_spill] sm:$0xff] %v8712_v7  ;;  %5100 = vpow2.f32 %v3371_v60  ;;  %v3379_v51 = vmul.f32 1.442695, %v3295_v4  ;;  %v8722_v13 = vpop.eup %5082  ;;  %v10399_v11 = vrot.slane %v8432_v19, 2  ;;  %v3300_v50 = vsub.f32 0.0, %v8697_v20  ;;  %v10403_v30 = vld [vmem:[#allocation84_spill] sm:$0xff] }
 0x2e3   : > { %10393 = vst [vmem:[#allocation131_spill] sm:$0xff] %v8705_v16  ;;  %10397 = vst [vmem:[#allocation148_spill] sm:$0xff] %v8719_v25  ;;  %5102 = vpow2.f32 %v3373_v21  ;;  %v3381_v53 = vmul.f32 1.442695, %v3296_v62  ;;  %v8730_v48 = vpop.eup %5084  ;;  %v8734_v56 = vadd.f32 %v8572_v28, %v10401_v44  ;;  %v3301_v60 = vsub.f32 0.0, %v8705_v16  ;;  %v10406_v20 = vld [vmem:[#allocation66_spill] sm:$0xff] }
 0x2e4   : > { %v8727_v39 = vadd.f32 %v10399_v11, %v10398_v32  ;;  %5104 = vpow2.f32 %v3375_v14  ;;  %v3383_v4 = vmul.f32 1.442695, %v3297_v6  ;;  %v8737_v31 = vpop.eup %5086  ;;  %v8741_v19 = vadd.f32 %v8575_v29, %v10403_v30  ;;  %v10405_v11 = vld [vmem:[#allocation45_spill] sm:$0xff] }
 0x2e5   : > { %10402 = vst [vmem:[#allocation49_spill] sm:$0xff] %v8734_v56  ;;  %v3302_v32 = vsub.f32 0.0, %v8712_v7  ;;  %5106 = vpow2.f32 %v3377_v12  ;;  %v3385_v62 = vmul.f32 1.442695, %v3298_v52  ;;  %v8744_v21 = vpop.eup %5088  ;;  %v8748_v28 = vmul.f32 %v10406_v20, %v10405_v11  ;;  %v10408_v16 = vld [vmem:[#allocation57_spill] sm:$0xff]  ;;  %v10411_v7 = vld [vmem:[#allocation31_spill] sm:$0xff] }
 0x2e6   : > { %10400 = vst [vmem:[#allocation158_spill] sm:$0xff] %v8727_v39  ;;  %10404 = vst [vmem:[#allocation32_spill] sm:$0xff] %v8741_v19  ;;  %v3303_v44 = vsub.f32 0.0, %v8719_v25  ;;  %5108 = vpow2.f32 %v3379_v51  ;;  %v3387_v6 = vmul.f32 1.442695, %v3299_v9  ;;  %v8751_v14 = vpop.eup %5090  ;;  %v8755_v29 = vmul.f32 %v10409_v59, %v10408_v16 }
 0x2e7   : > { %10407 = vst [vmem:[#allocation41_spill] sm:$0xff] %v8748_v28  ;;  %v3304_v30 = vsub.f32 0.0, %v8727_v39  ;;  %5110 = vpow2.f32 %v3381_v53  ;;  %v3389_v52 = vmul.f32 1.442695, %v3300_v50  ;;  %v8758_v12 = vpop.eup %5092  ;;  %v3549_v20 = vsel %vm3547_vm8, %v10411_v7, 0.0  ;;  %v10412_v53 = vld [vmem:[#allocation72_spill] sm:$0xff] }
 0x2e8   : > { %10410 = vst [vmem:[#allocation56_spill] sm:$0xff] %v8755_v29  ;;  %v3305_v11 = vsub.f32 0.0, %v8734_v56  ;;  %5112 = vpow2.f32 %v3383_v4  ;;  %v3391_v51 = vmul.f32 1.442695, %v3301_v60  ;;  %v8763_v9 = vpop.eup %5094  ;;  %v3306_v25 = vsub.f32 0.0, %v8741_v19  ;;  %v10413_v39 = vld [vmem:[#allocation89_spill] sm:$0xff] }
 0x2e9   : > { %5114 = vpow2.f32 %v3385_v62  ;;  %v3393_v59 = vmul.f32 1.442695, %v3302_v32  ;;  %v8766_v16 = vpop.eup %5096  ;;  %v3548_v50 = vsel %vm3547_vm8, %v8748_v28, 0.0  ;;  %v8772_v26 = vmul.f32 %v10413_v39, %v10412_v53  ;;  %v10415_v28 = vld [vmem:[#allocation65_spill] sm:$0xff]  ;;  %v10421_v53 = vld [vmem:[#allocation54_spill] sm:$0xff] }
 0x2ea   : > { %5116 = vpow2.f32 %v3387_v6  ;;  %v3395_v7 = vmul.f32 1.442695, %v3303_v44  ;;  %v8774_v56 = vpop.eup %5098  ;;  %v3550_v60 = vadd.f32 %v3549_v20, %v3548_v50  ;;  %v3397_v4 = vmul.f32 1.442695, %v3304_v30  ;;  %v10418_v20 = vld [vmem:[#allocation10_spill] sm:$0xff]  ;;  %v10419_v50 = vld [vmem:[#allocation91_spill] sm:$0xff] }
 0x2eb   : > { %10414 = vst [vmem:[#allocation59_spill] sm:$0xff] %v8772_v26  ;;  %5118 = vpow2.f32 %v3389_v52  ;;  %v3551_v32 = vsel %vm3547_vm8, %v8755_v29, 0.0  ;;  %v3399_v62 = vmul.f32 1.442695, %v3305_v11  ;;  %v8784_v39 = vmul.f32 %v10416_v1, %v10415_v28  ;;  %v10422_v29 = vld [vmem:[#allocation22_spill] sm:$0xff] }
 0x2ec   : > { %v8776_v55 = vpop.eup %5100  ;;  %5120 = vpow2.f32 %v3391_v51  ;;  %v3401_v44 = vmul.f32 1.442695, %v3306_v25  ;;  %v3553_v30 = vsel %vm3547_vm8, %v8772_v26, 0.0  ;;  %v3405_v52 = vadd.f32 1.0, %v8642_v40  ;;  %v10425_v26 = vld [vmem:[#allocation61_spill] sm:$0xff] }
 0x2ed   : > { %v8780_v19 = vpop.eup %5102  ;;  %10417 = vst [vmem:[#allocation75_spill] sm:$0xff] %v8784_v39  ;;  %5122 = vpow2.f32 %v3393_v59  ;;  %v8793_v51 = vmul.f32 %v10419_v50, %v10418_v20  ;;  %v8799_v1 = vmul.f32 %v10422_v29, %v10421_v53  ;;  %v3552_v28 = vadd.f32 %v3551_v32, %v3550_v60  ;;  %v10427_v32 = vld [vmem:[#allocation26_spill] sm:$0xff] }
 0x2ee   : > { %v8786_v6 = vpop.eup %5104  ;;  %5124 = vpow2.f32 %v3395_v7  ;;  %v3408_v25 = vadd.f32 1.0, %v8649_v0  ;;  %v8804_v7 = vmul.f32 %v10425_v26, %v10424_v34  ;;  %v3411_v40 = vadd.f32 1.0, %v8656_v3  ;;  %v10426_v0 = vld [vmem:[#allocation16_spill] sm:$0xff] }
 0x2ef   : > { %10420 = vst [vmem:[#allocation34_spill] sm:$0xff] %v8793_v51  ;;  %v8795_v11 = vpop.eup %5106  ;;  %10423 = vst [vmem:[#allocation98_spill] sm:$0xff] %v8799_v1  ;;  %5126 = vpow2.f32 %v3397_v4  ;;  %v3579_v50 = vadd.f32 %v8784_v39, %v8799_v1  ;;  %v3554_v33 = vadd.f32 %v3553_v30, %v3552_v28  ;;  %v3414_v29 = vadd.f32 1.0, %v8664_v5  ;;  %v10429_v30 = vld [vmem:[#allocation135_spill] sm:$0xff]  ;;  %v10430_v28 = vld [vmem:[#allocation80_spill] sm:$0xff] }
 0x2f0   : > { %v5109_v59 = vpop.eup %5108  ;;  %5128 = vpow2.f32 %v3399_v62  ;;  %v3416_v4 = vadd.f32 1.0, %v8671_v27  ;;  %v8813_v53 = vmul.f32 %v10427_v32, %v10426_v0  ;;  %v3555_v34 = vsel %vm3547_vm8, %v8793_v51, 0.0  ;;  %v10428_v62 = vld [vmem:[#allocation55_spill] sm:$0xff]  ;;  %v10433_v1 = vld [vmem:[#allocation121_spill] sm:$0xff] }
 0x2f1   : > { %v5111_v20 = vpop.eup %5110  ;;  %5130 = vpow2.f32 %v3401_v44  ;;  %v3417_v26 = vadd.f32 1.0, %v8678_v10  ;;  %v8820_v44 = vmul.f32 %v10429_v30, %v10428_v62  ;;  %v10431_v39 = vld [vmem:[#allocation99_spill] sm:$0xff]  ;;  %v3557_v0 = vsel %vm3547_vm8, %v8804_v7, 0.0  ;;  %v10432_v30 = vld [vmem:[#allocation108_spill] sm:$0xff] }
 0x2f2   : > { %v5113_v60 = vpop.eup %5112  ;;  %5132 = vrcp.f32 %v3405_v52  ;;  %v8824_v27 = vmul.f32 %v10431_v39, %v10430_v28  ;;  %v3420_v52 = vadd.f32 1.0, %v8686_v61  ;;  %v3421_v51 = vadd.f32 1.0, %v8693_v38 }
 0x2f3   : > { %v5115_v3 = vpop.eup %5114  ;;  %5134 = vrcp.f32 %v3408_v25  ;;  %v3556_v10 = vadd.f32 %v3555_v34, %v3554_v33  ;;  %v3422_v62 = vadd.f32 1.0, %v8700_v63  ;;  %v8833_v45 = vmul.f32 %v10433_v1, %v10432_v30 }
 0x2f4   : > { %v5117_v5 = vpop.eup %5116  ;;  %5136 = vrcp.f32 %v3411_v40  ;;  %v3580_v39 = vadd.f32 %v3579_v50, %v8813_v53  ;;  %v3423_v40 = vadd.f32 1.0, %v8708_v58  ;;  %v8843_v33 = vsel %vm3547_vm8, %v8820_v44, 0.0 }
 0x2f5   : > { %v5119_v32 = vpop.eup %5118  ;;  %5138 = vrcp.f32 %v3414_v29  ;;  %v8839_v28 = vadd.f32 %v3557_v0, %v3556_v10  ;;  %v3425_v63 = vadd.f32 1.0, %v8715_v57  ;;  %v3426_v1 = vadd.f32 1.0, %v8722_v13 }
 0x2f6   : > { %v5121_v25 = vpop.eup %5120  ;;  %5140 = vrcp.f32 %v3416_v4  ;;  %v3581_v50 = vadd.f32 %v3580_v39, %v8824_v27  ;;  %v3427_v58 = vadd.f32 1.0, %v8730_v48  ;;  %v3428_v4 = vadd.f32 1.0, %v8737_v31 }
 0x2f7   : > { %v8836_v61 = vpop.eup %5122  ;;  %5142 = vrcp.f32 %v3417_v26  ;;  %v3429_v34 = vadd.f32 1.0, %v8744_v21  ;;  %v3430_v0 = vadd.f32 1.0, %v8751_v14  ;;  %v3431_v57 = vadd.f32 1.0, %v8758_v12 }
 0x2f8   : > { %v8845_v38 = vpop.eup %5124  ;;  %5144 = vrcp.f32 %v3420_v52  ;;  %v3432_v13 = vadd.f32 1.0, %v8763_v9  ;;  %v3433_v10 = vadd.f32 1.0, %v8766_v16  ;;  %v3434_v48 = vadd.f32 1.0, %v8774_v56 }
 0x2f9   : > { %v8850_v29 = vpop.eup %5126  ;;  %5146 = vrcp.f32 %v3421_v51  ;;  %v3435_v31 = vadd.f32 1.0, %v8776_v55  ;;  %v3436_v51 = vadd.f32 1.0, %v8780_v19  ;;  %v3437_v30 = vadd.f32 1.0, %v8786_v6 }
 0x2fa   : > { %v8855_v26 = vpop.eup %5128  ;;  %5148 = vrcp.f32 %v3422_v62  ;;  %v3438_v14 = vadd.f32 1.0, %v8795_v11  ;;  %v8868_v9 = vadd.f32 1.0, %v5109_v59  ;;  %v8870_v62 = vadd.f32 1.0, %v5111_v20  ;;  %v10434_v20 = vld [vmem:[#allocation111_spill] sm:$0xff] }
 0x2fb   : > { %v8860_v52 = vpop.eup %5130  ;;  %5150 = vrcp.f32 %v3423_v40  ;;  %v8875_v55 = vadd.f32 1.0, %v5113_v60  ;;  %v8877_v39 = vadd.f32 1.0, %v5115_v3  ;;  %v8882_v11 = vadd.f32 1.0, %v5117_v5  ;;  %v10436_v5 = vld [vmem:[#allocation124_spill] sm:$0xff] }
 0x2fc   : > { %v5133_v21 = vpop.eup %5132  ;;  %5152 = vrcp.f32 %v3425_v63  ;;  %v8884_v59 = vadd.f32 1.0, %v5119_v32  ;;  %v10435_v63 = vld [vmem:[#allocation133_spill] sm:$0xff] }
 0x2fd   : > { %v5135_v12 = vpop.eup %5134  ;;  %5154 = vrcp.f32 %v3426_v1  ;;  %v8873_v16 = vmul.f32 %v5133_v21, %v8516_v43 }
 0x2fe   : > { %v5137_v56 = vpop.eup %5136  ;;  %5156 = vrcp.f32 %v3427_v58  ;;  %v8880_v19 = vmul.f32 %v5135_v12, %v8519_v41  ;;  %v10437_v12 = vld [vmem:[#allocation90_spill] sm:$0xff] }
 0x2ff   : > { %v5139_v6 = vpop.eup %5138  ;;  %5158 = vrcp.f32 %v3428_v4  ;;  %v8887_v40 = vmul.f32 %v5137_v56, %v10434_v20  ;;  %v3594_v3 = vsel %vm1372_vm2, %v8873_v16, 0.0 }
 0x300   : > { %v5141_v43 = vpop.eup %5140  ;;  %5160 = vrcp.f32 %v3429_v34  ;;  %v8890_v60 = vmul.f32 %v5139_v6, %v10435_v63  ;;  %v3595_v41 = vsel %vm1372_vm2, %v8880_v19, 0.0  ;;  %v8901_v34 = vadd.f32 1.0, %v5121_v25 }
 0x301   : > { %v5143_v1 = vpop.eup %5142  ;;  %5162 = vrcp.f32 %v3430_v0  ;;  %v8897_v32 = vmul.f32 %v5141_v43, %v10436_v5  ;;  %v3596_v58 = vadd.f32 %v3595_v41, %v3594_v3  ;;  %v3597_v4 = vsel %vm1372_vm2, %v8887_v40, 0.0 }
 0x302   : > { %v5145_v21 = vpop.eup %5144  ;;  %5164 = vrcp.f32 %v3431_v57  ;;  %v8904_v56 = vmul.f32 %v5143_v1, %v10437_v12  ;;  %v3599_v6 = vsel %vm1372_vm2, %v8890_v60, 0.0  ;;  %v8913_v41 = vadd.f32 1.0, %v8836_v61 }
 0x303   : > { %v5147_v20 = vpop.eup %5146  ;;  %5166 = vrcp.f32 %v3432_v13  ;;  %v8909_v0 = vmul.f32 %v5145_v21, %v8542_v46  ;;  %v3582_v43 = vadd.f32 %v3581_v50, %v8897_v32  ;;  %v3598_v63 = vadd.f32 %v3597_v4, %v3596_v58 }
 0x304   : > { %v5149_v3 = vpop.eup %5148  ;;  %5168 = vrcp.f32 %v3433_v10  ;;  %v8916_v25 = vmul.f32 %v5147_v20, %v8547_v36  ;;  %v3601_v57 = vsel %vm1372_vm2, %v8904_v56, 0.0 }
 0x305   : > { %v5151_v1 = vpop.eup %5150  ;;  %5170 = vrcp.f32 %v3434_v48  ;;  %v8921_v13 = vmul.f32 %v5149_v3, %v8566_v15  ;;  %v3583_v46 = vadd.f32 %v3582_v43, %v8833_v45  ;;  %v3600_v50 = vadd.f32 %v3599_v6, %v3598_v63 }
 0x306   : > { %v5153_v5 = vpop.eup %5152  ;;  %5172 = vrcp.f32 %v3435_v31  ;;  %v8925_v61 = vmul.f32 %v5151_v1, %v8578_v47  ;;  %v3559_v36 = vsel %vm3547_vm8, %v8916_v25, 0.0  ;;  %v3603_v10 = vsel %vm1372_vm2, %v8909_v0, 0.0 }
 0x307   : > { %v5155_v58 = vpop.eup %5154  ;;  %5174 = vrcp.f32 %v3436_v51  ;;  %v8932_v48 = vmul.f32 %v5153_v5, %v8583_v54  ;;  %v3560_v15 = vadd.f32 %v3559_v36, %v8839_v28  ;;  %v3584_v4 = vadd.f32 %v3583_v46, %v8921_v13 }
 0x308   : > { %v5157_v21 = vpop.eup %5156  ;;  %v3447_v31 = vadd.f32 1.0, %v8845_v38  ;;  %5176 = vrcp.f32 %v3437_v30  ;;  %v8938_v47 = vmul.f32 %v5155_v58, %v8588_v23  ;;  %v3602_v12 = vadd.f32 %v3601_v57, %v3600_v50 }
 0x309   : > { %v5159_v6 = vpop.eup %5158  ;;  %5178 = vrcp.f32 %v3438_v14  ;;  %v8941_v20 = vmul.f32 %v5157_v21, %v8593_v24  ;;  %v3562_v54 = vadd.f32 %v8843_v33, %v3560_v15  ;;  %v3585_v51 = vadd.f32 %v3584_v4, %v8932_v48 }
 0x30a   : > { %v5161_v28 = vpop.eup %5160  ;;  %v3448_v43 = vadd.f32 1.0, %v8850_v29  ;;  %5180 = vrcp.f32 %v8868_v9  ;;  %v8948_v38 = vmul.f32 %v5159_v6, %v8597_v49  ;;  %v3604_v23 = vadd.f32 %v3603_v10, %v3602_v12 }
 0x30b   : > { %v5163_v30 = vpop.eup %5162  ;;  %v3449_v63 = vadd.f32 1.0, %v8855_v26  ;;  %5182 = vrcp.f32 %v8870_v62  ;;  %v3563_v24 = vsel %vm3547_vm8, %v8941_v20, 0.0  ;;  %v3605_v33 = vsel %vm1372_vm2, %v8925_v61, 0.0 }
 0x30c   : > { %v5165_v14 = vpop.eup %5164  ;;  %5184 = vrcp.f32 %v8875_v55  ;;  %v8958_v29 = vmul.f32 %v5161_v28, %v8601_v42  ;;  %v8961_v49 = vmul.f32 %v5163_v30, %v8607_v35  ;;  %v3607_v26 = vsel %vm1372_vm2, %v8938_v47, 0.0 }
 0x30d   : > { %v5167_v9 = vpop.eup %5166  ;;  %5186 = vrcp.f32 %v8877_v39  ;;  %v8967_v62 = vmul.f32 %v5165_v14, %v8612_v2  ;;  %v3564_v3 = vadd.f32 %v3563_v24, %v3562_v54  ;;  %v3586_v57 = vadd.f32 %v3585_v51, %v8948_v38  ;;  %v10439_v54 = vld [vmem:[#allocation46_spill] sm:$0xff]  ;;  %v10441_v14 = vld [vmem:[#allocation68_spill] sm:$0xff] }
 0x30e   : > { %v5169_v1 = vpop.eup %5168  ;;  %5188 = vrcp.f32 %v8882_v11  ;;  %v8972_v42 = vmul.f32 %v5167_v9, %v8617_v37  ;;  %v3565_v35 = vsel %vm3547_vm8, %v8961_v49, 0.0  ;;  %v3606_v55 = vadd.f32 %v3605_v33, %v3604_v23 }
 0x30f   : > { %v5171_v46 = vpop.eup %5170  ;;  %5190 = vrcp.f32 %v8884_v59  ;;  %v8978_v39 = vmul.f32 %v5169_v1, %v8623_v17  ;;  %v3566_v2 = vadd.f32 %v3565_v35, %v3564_v3  ;;  %v3587_v50 = vadd.f32 %v3586_v57, %v8967_v62  ;;  %v10442_v3 = vld [vmem:[#allocation88_spill] sm:$0xff] }
 0x310   : > { %v5173_v5 = vpop.eup %5172  ;;  %5192 = vrcp.f32 %v8901_v34  ;;  %v8983_v11 = vmul.f32 %v5171_v46, %v8628_v22  ;;  %v3608_v37 = vadd.f32 %v3607_v26, %v3606_v55  ;;  %v3609_v36 = vsel %vm1372_vm2, %v8958_v29, 0.0  ;;  %v10443_v46 = vld [vmem:[#allocation85_spill] sm:$0xff] }
 0x311   : > { %v5175_v10 = vpop.eup %5174  ;;  %v3450_v58 = vadd.f32 1.0, %v8860_v52  ;;  %5194 = vrcp.f32 %v8913_v41  ;;  %v8990_v17 = vmul.f32 %v5173_v5, %v8633_v18  ;;  %v3567_v59 = vsel %vm3547_vm8, %v8978_v39, 0.0  ;;  %v10438_v52 = vld [vmem:[#allocation52_spill] sm:$0xff] }
 0x312   : > { %v5177_v15 = vpop.eup %5176  ;;  %5196 = vrcp.f32 %v3447_v31  ;;  %v8995_v22 = vmul.f32 %v5175_v10, %v8639_v8  ;;  %v3568_v34 = vadd.f32 %v3567_v59, %v3566_v2  ;;  %v3611_v4 = vsel %vm1372_vm2, %v8972_v42, 0.0 }
 0x313   : > { %v5179_v21 = vpop.eup %5178  ;;  %5198 = vrcp.f32 %v3448_v43  ;;  %v9000_v12 = vmul.f32 %v5177_v15, %v10438_v52  ;;  %v3588_v18 = vadd.f32 %v3587_v50, %v8983_v11  ;;  %v3610_v41 = vadd.f32 %v3609_v36, %v3608_v37  ;;  %v10440_v43 = vld [vmem:[#allocation71_spill] sm:$0xff]  ;;  %v10444_v37 = vld [vmem:[#allocation112_spill] sm:$0xff] }
 0x314   : > { %v5181_v6 = vpop.eup %5180  ;;  %5200 = vrcp.f32 %v3449_v63  ;;  %v9004_v51 = vmul.f32 %v5179_v21, %v10439_v54  ;;  %v3569_v8 = vsel %vm3547_vm8, %v8995_v22, 0.0  ;;  %v3613_v31 = vsel %vm1372_vm2, %v8990_v17, 0.0 }
 0x315   : > { %v5183_v28 = vpop.eup %5182  ;;  %5202 = vrcp.f32 %v3450_v58  ;;  %v9011_v23 = vmul.f32 %v5181_v6, %v10440_v43  ;;  %v3570_v30 = vadd.f32 %v3569_v8, %v3568_v34  ;;  %v3589_v24 = vadd.f32 %v3588_v18, %v9000_v12  ;;  %v10445_v34 = vld [vmem:[#allocation102_spill] sm:$0xff] }
 0x316   : > { %v5185_v33 = vpop.eup %5184  ;;  %v9015_v63 = vmul.f32 %v5183_v28, %v10441_v14  ;;  %v3612_v26 = vadd.f32 %v3611_v4, %v3610_v41  ;;  %v3615_v35 = vsel %vm1372_vm2, %v9004_v51, 0.0  ;;  %v10446_v41 = vld [vmem:[#allocation131_spill] sm:$0xff]  ;;  %v10447_v28 = vld [vmem:[#allocation122_spill] sm:$0xff]  ;;  %v10448_v14 = vld [vmem:[#allocation148_spill] sm:$0xff] }
 0x317   : > { %v5187_v9 = vpop.eup %5186  ;;  %v9018_v57 = vmul.f32 %v5185_v33, %v10442_v3  ;;  %v3571_v1 = vsel %vm3547_vm8, %v9011_v23, 0.0 }
 0x318   : > { %v5189_v55 = vpop.eup %5188  ;;  %v9025_v2 = vmul.f32 %v5187_v9, %v10443_v46  ;;  %v3614_v50 = vadd.f32 %v3613_v31, %v3612_v26  ;;  %v3572_v10 = vadd.f32 %v3571_v1, %v3570_v30  ;;  %v3590_v58 = vadd.f32 %v3589_v24, %v9015_v63  ;;  %v10449_v1 = vld [vmem:[#allocation158_spill] sm:$0xff] }
 0x319   : > { %v5191_v5 = vpop.eup %5190  ;;  %v9028_v36 = vmul.f32 %v5189_v55, %v10444_v37  ;;  %v3617_v59 = vsel %vm1372_vm2, %v9018_v57, 0.0 }
 0x31a   : > { %v5193_v15 = vpop.eup %5192  ;;  %v9034_v4 = vmul.f32 %v5191_v5, %v10445_v34  ;;  %v3573_v21 = vsel %vm3547_vm8, %v9025_v2, 0.0  ;;  %v3616_v52 = vadd.f32 %v3615_v35, %v3614_v50  ;;  %v10451_v50 = vld [vmem:[#allocation49_spill] sm:$0xff] }
 0x31b   : > { %v5195_v18 = vpop.eup %5194  ;;  %v9039_v6 = vmul.f32 %v5193_v15, %v10446_v41  ;;  %v3574_v54 = vadd.f32 %v3573_v21, %v3572_v10  ;;  %v3591_v8 = vadd.f32 %v3590_v58, %v9028_v36 }
 0x31c   : > { %v5197_v31 = vpop.eup %5196  ;;  %v9043_v43 = vmul.f32 %v5195_v18, %v10447_v28  ;;  %v3618_v30 = vadd.f32 %v3617_v59, %v3616_v52  ;;  %v3619_v24 = vsel %vm1372_vm2, %v9034_v4, 0.0  ;;  %v10453_v59 = vld [vmem:[#allocation32_spill] sm:$0xff] }
 0x31d   : > { %v5199_v33 = vpop.eup %5198  ;;  %v9048_v26 = vmul.f32 %v5197_v31, %v10448_v14  ;;  %v3575_v9 = vsel %vm3547_vm8, %v9039_v6, 0.0 }
 0x31e   : > { %v5201_v3 = vpop.eup %5200  ;;  %v9053_v35 = vmul.f32 %v5199_v33, %v10449_v1  ;;  %v3620_v55 = vadd.f32 %v3619_v24, %v3618_v30  ;;  %v3576_v37 = vadd.f32 %v3575_v9, %v3574_v54  ;;  %v3592_v10 = vadd.f32 %v3591_v8, %v9043_v43 }
 0x31f   : > { %v5203_v46 = vpop.eup %5202  ;;  %v9056_v5 = vmul.f32 %v5201_v3, %v10451_v50  ;;  %v3621_v58 = vsel %vm1372_vm2, %v9048_v26, 0.0 }
 0x320   : > { %10450 = vst [vmem:[#allocation103_spill] sm:$0xff] %v9053_v35  ;;  %v9062_v15 = vmul.f32 %v5203_v46, %v10453_v59  ;;  %v3577_v34 = vsel %vm3547_vm8, %v9053_v35, 0.0  ;;  %v3622_v18 = vadd.f32 %v3621_v58, %v3620_v55  ;;  %v10455_v55 = vmov 0.0   ;;  %v3660_v58 = vld [vmem:[%s9371_s6] sm:$0x1] }
 0x321   : > { %10452 = vst [vmem:[#allocation126_spill] sm:$0xff] %v9056_v5  ;;  %v3578_v21 = vadd.f32 %v3577_v34, %v3576_v37  ;;  %v3593_v52 = vadd.f32 %v3592_v10, %v9056_v5  ;;  %v3738_v10 = vld [vmem:[%s9372_s7] sm:$0x3] }
 0x322   : > { %10454 = vst [vmem:[#allocation73_spill] sm:$0xff] %v9062_v15  ;;  %v3623_v41 = vsel %vm1372_vm2, %v9062_v15, 0.0 }
 0x323   : > { %v3624_v31 = vadd.f32 %v3623_v41, %v3622_v18  ;;  %v3629_v54 = vrot.slane %v3578_v21, 7  ;;  %v3630_v28 = vrot.slane %v3593_v52, 7 }
 0x325   : > { %v3631_v8 = vsel %vm391_vm4, %v3629_v54, %v3630_v28  ;;  %v3632_v30 = vrot.slane %v3624_v31, 7 }
 0x327   : > { %v3633_v24 = vsel %vm391_vm4, %v3630_v28, %v3632_v30  ;;  %v4876_v28 = vld [vmem:[%s9374_s9] sm:$0xff]   ;;  %v4878_v30 = vld [vmem:[%s9374_s9 + $0x10] sm:$0xff]  }
 0x328   : > { %v3636_v33 = vadd.f32 %v3633_v24, %v3631_v8  ;;  %v4877_v8 = vld [vmem:[%s9374_s9 + $0x8] sm:$0xff]   ;;  %4791 = vmatprep.subr.bf16.mxu0 %v4876_v28  ;;  %v4879_v24 = vld [vmem:[%s9374_s9 + $0x18] sm:$0xff]  }
 0x329   : > { %4792 = vmatpush3.bf16.msra.mxu0 %v4876_v28 }
 0x32a   : > { %v3637_v14 = vrot.slane %v3636_v33, 4  ;;  %4793 = vmatprep.subr.bf16.mxu0 %v4877_v8 }
 0x32c   : > { %v3638_v9 = vadd.f32 %v3637_v14, %v3636_v33  ;;  %v4880_v33 = vld [vmem:[%s9374_s9 + $0x20] sm:$0xff]   ;;  %v4881_v14 = vld [vmem:[%s9374_s9 + $0x28] sm:$0xff]  }
 0x32d   : > { %4794 = vmatpush3.bf16.msra.mxu0 %v4877_v8  ;;  %v10460_v8 = vld [vmem:[#allocation31_spill] sm:$0xff] }
 0x32e   : > { %v3639_v3 = vrot.slane %v3638_v9, 2  ;;  %4795 = vmatprep.subr.bf16.mxu0 %v4878_v30 }
 0x330   : > { %v3640_v1 = vadd.f32 %v3639_v3, %v3638_v9  ;;  %v4882_v9 = vld [vmem:[%s9374_s9 + $0x30] sm:$0xff]   ;;  %v4883_v3 = vld [vmem:[%s9374_s9 + $0x38] sm:$0xff]  }
 0x331   : > { %4796 = vmatpush3.bf16.msra.mxu0 %v4878_v30 }
 0x332   : > { %v3641_v46 = vrot.slane %v3640_v1, 1  ;;  %4797 = vmatprep.subr.bf16.mxu0 %v4879_v24 }
 0x334   : > { %v3642_v50 = vadd.f32 %v3641_v46, %v3640_v1  ;;  %v3739_v1 = vld [vmem:[%s9373_s8] sm:$0x1] }
 0x335   : > { %4798 = vmatpush3.bf16.msra.mxu0 %v4879_v24  ;;  %v10461_v24 = vld [vmem:[#allocation75_spill] sm:$0xff] }
 0x336   : > { %v3643_v37 = vmul.f32 0.00390625, %v3642_v50  ;;  %4799 = vmatprep.subr.bf16.mxu0 %v4880_v33 }
 0x338   : > { %4784 = vmatmul.mubr.f32.vlgmr.msra.gmra.mrb[32].mxu1 %v3643_v37 }
 0x339   : > { %4788 = vmatprep.mubr.msk.f32.mxu1 %vm5261_vm5, %v10455_v55  ;;  %4787 = vmatpush3.msk.msra.mxu1 %vm3744_vm9, %v3738_v10 }
 0x33a   : > { %4800 = vmatpush3.bf16.msra.mxu0 %v4880_v33 }
 0x33b   : > { %4801 = vmatprep.subr.bf16.mxu0 %v4881_v14 }
 0x33e   : > { %4802 = vmatpush3.bf16.msra.mxu0 %v4881_v14 }
 0x33f   : > { %4803 = vmatprep.subr.bf16.mxu0 %v4882_v9 }
 0x342   : > { %4804 = vmatpush3.bf16.msra.mxu0 %v4882_v9  ;;  %v10462_v9 = vld [vmem:[#allocation56_spill] sm:$0xff] }
 0x343   : > { %4805 = vmatprep.subr.bf16.mxu0 %v4883_v3 }
 0x346   : > { %4806 = vmatpush3.bf16.msra.mxu0 %v4883_v3 }
 0x40b   : > { %v3727_v59 = vpop.f32.mrb[32].mxu1 }
 0x40c   : > { %v3728_v34 = vadd.f32 %v3727_v59, %v3660_v58  ;;  %v4785_v21 = vpop.f32.mrb[33].mxu1 }
 0x40e   : > { %v4608_v52 = vmul.f32 -1.442695, %v3728_v34 }
 0x410   : > { %5204 = vpow2.f32 %v4608_v52 }
 0x41a   : > { %v5205_v18 = vpop.eup %5204 }
 0x41b   : > { %v3734_v41 = vadd.f32 1.0, %v5205_v18  ;;  %v10458_v18 = vld [vmem:[#allocation41_spill] sm:$0xff] }
 0x41d   : > { %5206 = vrcp.f32 %v3734_v41 }
 0x427   : > { %v5207_v31 = vpop.eup %5206 }
 0x428   : > { %v3737_v54 = vmul.f32 %v5207_v31, %v3728_v34  ;;  %v10456_v34 = vld [vmem:[#allocation3_spill] sm:$0xff]  ;;  %v10459_v31 = vld [vmem:[#allocation98_spill] sm:$0xff] }
 0x429   : > { %v10457_v21 = vsub.s32 0, %v10456_v34 }
 0x42a   : > { %4789 = vmatmul.mubr.msk.f32.vlgmr.msra.gmra.mrb[34].mxu1 %vm3740_vm10, %v3737_v54 }
 0x4fd   : > { %v3814_v46 = vpop.f32.mrb[34].mxu1 }
 0x4fe   : > { %v3815_v50 = vadd.f32 %v3814_v46, %v3739_v1  ;;  %v4790_v37 = vpop.f32.mrb[35].mxu1 }
 0x4ff   : > { %v10463_v37 = vld [vmem:[#allocation59_spill] sm:$0xff] }
 0x500   : > { %v4611_v55 = vmul.f32 -1.442695, %v3815_v50 }
 0x502   : > { %5208 = vpow2.f32 %v4611_v55 }
 0x50c   : > { %v5209_v10 = vpop.eup %5208 }
 0x50d   : > { %v3821_v58 = vadd.f32 1.0, %v5209_v10 }
 0x50f   : > { %5210 = vrcp.f32 %v3821_v58 }
 0x519   : > { %v5211_v59 = vpop.eup %5210 }
 0x51a   : > { %v9108_v52 = vrot.slane %v5211_v59, %v10457_v21 }
 0x51c   : > { %v3828_v41 = vmul.f32 %v9108_v52, %v10458_v18  ;;  %v3829_v54 = vmul.f32 %v9108_v52, %v10459_v31  ;;  %v3830_v28 = vmul.f32 %v9108_v52, %v8873_v16  ;;  %v3831_v30 = vmul.f32 %v9108_v52, %v10460_v8 }
 0x51d   : > { %v3832_v33 = vmul.f32 %v9108_v52, %v10461_v24  ;;  %v3833_v14 = vmul.f32 %v9108_v52, %v8880_v19  ;;  %v3834_v3 = vmul.f32 %v9108_v52, %v10462_v9  ;;  %v3835_v1 = vmul.f32 %v9108_v52, %v8813_v53 }
 0x51e   : > { %v3876_v46 = vpack.c.bf16 %v3829_v54, %v3828_v41  ;;  %v3877_v50 = vpack.c.bf16 %v3830_v28, %v3830_v28  ;;  %v3836_v16 = vmul.f32 %v9108_v52, %v8887_v40  ;;  %v3837_v55 = vmul.f32 %v9108_v52, %v10463_v37 }
 0x51f   : > { %v3878_v10 = vpack.c.bf16 %v3832_v33, %v3831_v30  ;;  %v3879_v58 = vpack.c.bf16 %v3833_v14, %v3833_v14  ;;  %v3880_v59 = vpack.c.bf16 %v3835_v1, %v3834_v3  ;;  %v3838_v19 = vmul.f32 %v9108_v52, %v8824_v27 }
 0x520   : > { %v3910_v34 = vshrl.u32 %v3876_v46, 16  ;;  %v3913_v21 = vshll.u32 %v3876_v46, 16  ;;  %v3918_v18 = vshrl.u32 %v3877_v50, 16  ;;  %v3921_v31 = vshll.u32 %v3877_v50, 16 }
 0x521   : > { %v3927_v8 = vshrl.u32 %v3878_v10, 16  ;;  %v3930_v53 = vshll.u32 %v3878_v10, 16  ;;  %v3935_v41 = vshrl.u32 %v3879_v58, 16  ;;  %v3938_v54 = vshll.u32 %v3879_v58, 16 }
 0x522   : > { %v3912_v28 = vrot.slane %v3910_v34, 3  ;;  %v3915_v24 = vrot.slane %v3913_v21, 4  ;;  %v3920_v40 = vrot.slane %v3918_v18, 3  ;;  %v3923_v9 = vrot.slane %v3921_v31, 4 }
 0x523   : > { %v3929_v15 = vrot.slane %v3927_v8, 3  ;;  %v3932_v37 = vrot.slane %v3930_v53, 4  ;;  %v3937_v30 = vrot.slane %v3935_v41, 3  ;;  %v3940_v33 = vrot.slane %v3938_v54, 4 }
 0x524   : > { %v3916_v14 = vor.u32 %v3915_v24, %v3912_v28  ;;  %v3924_v3 = vor.u32 %v3923_v9, %v3920_v40  ;;  %v3881_v1 = vpack.c.bf16 %v3836_v16, %v3836_v16  ;;  %v3944_v27 = vshrl.u32 %v3880_v59, 16 }
 0x525   : > { %v3933_v5 = vor.u32 %v3932_v37, %v3929_v15  ;;  %v3941_v46 = vor.u32 %v3940_v33, %v3937_v30  ;;  %v3947_v35 = vshll.u32 %v3880_v59, 16  ;;  %v3839_v50 = vmul.f32 %v9108_v52, %v8890_v60  ;;  %v10464_v15 = vld [vmem:[#allocation34_spill] sm:$0xff] }
 0x526   : > { %v3925_v10 = vsel %vm3908_vm11, %v3916_v14, %v3924_v3  ;;  %v3946_v58 = vrot.slane %v3944_v27, 3  ;;  %v3952_v34 = vshrl.u32 %v3881_v1, 16  ;;  %v3955_v21 = vshll.u32 %v3881_v1, 16 }
 0x527   : > { %4807 = vmatprep.mubr.bf16.mxu0 %v3925_v10  ;;  %v3942_v18 = vsel %vm3908_vm11, %v3933_v5, %v3941_v46  ;;  %v3949_v31 = vrot.slane %v3947_v35, 4  ;;  %v3882_v8 = vpack.c.bf16 %v3838_v19, %v3837_v55  ;;  %v3883_v53 = vpack.c.bf16 %v3839_v50, %v3839_v50 }
 0x528   : > { %4808 = vmatmul.mubr.bf16.vlgmr.msra.gmra.mrb[0].mxu0 %v3942_v18  ;;  %v3954_v16 = vrot.slane %v3952_v34, 3  ;;  %v3957_v41 = vrot.slane %v3955_v21, 4  ;;  %v3840_v59 = vmul.f32 %v9108_v52, %v10464_v15  ;;  %v3841_v60 = vmul.f32 %v9108_v52, %v8897_v32 }
 0x529   : > { %v3950_v54 = vor.u32 %v3949_v31, %v3946_v58  ;;  %v3961_v28 = vshrl.u32 %v3882_v8, 16  ;;  %v3964_v24 = vshll.u32 %v3882_v8, 16  ;;  %v3969_v40 = vshrl.u32 %v3883_v53, 16 }
 0x52a   : > { %v3958_v9 = vor.u32 %v3957_v41, %v3954_v16  ;;  %v3972_v37 = vshll.u32 %v3883_v53, 16  ;;  %v3842_v35 = vmul.f32 %v9108_v52, %v8904_v56  ;;  %v3884_v5 = vpack.c.bf16 %v3841_v60, %v3840_v59 }
 0x52b   : > { %v3963_v55 = vrot.slane %v3961_v28, 3  ;;  %v3966_v19 = vrot.slane %v3964_v24, 4  ;;  %v3971_v30 = vrot.slane %v3969_v40, 3  ;;  %v3843_v33 = vmul.f32 %v9108_v52, %v8804_v7 }
 0x52c   : > { %v3959_v14 = vsel %vm3908_vm11, %v3950_v54, %v3958_v9  ;;  %v3974_v3 = vrot.slane %v3972_v37, 4  ;;  %v3885_v32 = vpack.c.bf16 %v3842_v35, %v3842_v35  ;;  %v3978_v1 = vshrl.u32 %v3884_v5, 16 }
 0x52d   : > { %4811 = vmatprep.mubr.bf16.mxu0 %v3959_v14  ;;  %v3967_v27 = vor.u32 %v3966_v19, %v3963_v55  ;;  %v3981_v46 = vshll.u32 %v3884_v5, 16  ;;  %v3844_v50 = vmul.f32 %v9108_v52, %v8833_v45  ;;  %v3845_v56 = vmul.f32 %v9108_v52, %v8909_v0 }
 0x52e   : > { %v3975_v10 = vor.u32 %v3974_v3, %v3971_v30  ;;  %v3980_v58 = vrot.slane %v3978_v1, 3  ;;  %v3986_v34 = vshrl.u32 %v3885_v32, 16  ;;  %v3989_v21 = vshll.u32 %v3885_v32, 16 }
 0x52f   : > { %v3983_v18 = vrot.slane %v3981_v46, 4  ;;  %v3886_v7 = vpack.c.bf16 %v3844_v50, %v3843_v33  ;;  %v3887_v31 = vpack.c.bf16 %v3845_v56, %v3845_v56  ;;  %v3846_v8 = vmul.f32 %v9108_v52, %v8916_v25 }
 0x530   : > { %v3976_v53 = vsel %vm3908_vm11, %v3967_v27, %v3975_v10  ;;  %v3988_v16 = vrot.slane %v3986_v34, 3  ;;  %v3991_v41 = vrot.slane %v3989_v21, 4  ;;  %v3847_v45 = vmul.f32 %v9108_v52, %v8921_v13 }
 0x531   : > { %4812 = vmatmul.mubr.bf16.gmra.mrb[4].mxu0 %v3976_v53  ;;  %v3984_v15 = vor.u32 %v3983_v18, %v3980_v58  ;;  %v3995_v0 = vshrl.u32 %v3886_v7, 16  ;;  %v3998_v59 = vshll.u32 %v3886_v7, 16  ;;  %v4003_v60 = vshrl.u32 %v3887_v31, 16 }
 0x532   : > { %v3992_v54 = vor.u32 %v3991_v41, %v3988_v16  ;;  %v4006_v28 = vshll.u32 %v3887_v31, 16  ;;  %v3848_v24 = vmul.f32 %v9108_v52, %v8925_v61  ;;  %v3888_v40 = vpack.c.bf16 %v3847_v45, %v3846_v8 }
 0x533   : > { %v3997_v9 = vrot.slane %v3995_v0, 3  ;;  %v4000_v25 = vrot.slane %v3998_v59, 4  ;;  %v4005_v37 = vrot.slane %v4003_v60, 3  ;;  %v3849_v35 = vmul.f32 %v9108_v52, %v8820_v44 }
 0x534   : > { %v3993_v5 = vsel %vm3908_vm11, %v3984_v15, %v3992_v54  ;;  %v4008_v13 = vrot.slane %v4006_v28, 4  ;;  %v3889_v55 = vpack.c.bf16 %v3848_v24, %v3848_v24  ;;  %v4012_v19 = vshrl.u32 %v3888_v40, 16 }
 0x535   : > { %4815 = vmatprep.mubr.bf16.mxu0 %v3993_v5  ;;  %v4001_v30 = vor.u32 %v4000_v25, %v3997_v9  ;;  %v4015_v33 = vshll.u32 %v3888_v40, 16  ;;  %v3850_v14 = vmul.f32 %v9108_v52, %v8932_v48  ;;  %v3851_v61 = vmul.f32 %v9108_v52, %v8938_v47 }
 0x536   : > { %v4009_v3 = vor.u32 %v4008_v13, %v4005_v37  ;;  %v4014_v32 = vrot.slane %v4012_v19, 3  ;;  %v4020_v1 = vshrl.u32 %v3889_v55, 16  ;;  %v4023_v27 = vshll.u32 %v3889_v55, 16 }
 0x537   : > { %v4017_v46 = vrot.slane %v4015_v33, 4  ;;  %v3890_v44 = vpack.c.bf16 %v3850_v14, %v3849_v35  ;;  %v3891_v50 = vpack.c.bf16 %v3851_v61, %v3851_v61  ;;  %v3852_v56 = vmul.f32 %v9108_v52, %v8941_v20 }
 0x538   : > { %v4010_v10 = vsel %vm3908_vm11, %v4001_v30, %v4009_v3  ;;  %v4022_v58 = vrot.slane %v4020_v1, 3  ;;  %v4025_v34 = vrot.slane %v4023_v27, 4  ;;  %v3853_v48 = vmul.f32 %v9108_v52, %v8948_v38 }
 0x539   : > { %4816 = vmatmul.mubr.bf16.gmra.mrb[8].mxu0 %v4010_v10  ;;  %v4018_v21 = vor.u32 %v4017_v46, %v4014_v32  ;;  %v4029_v47 = vshrl.u32 %v3890_v44, 16  ;;  %v4032_v18 = vshll.u32 %v3890_v44, 16  ;;  %v4037_v7 = vshrl.u32 %v3891_v50, 16 }
 0x53a   : > { %v4026_v31 = vor.u32 %v4025_v34, %v4022_v58  ;;  %v4040_v8 = vshll.u32 %v3891_v50, 16  ;;  %v3854_v53 = vmul.f32 %v9108_v52, %v8958_v29  ;;  %v3892_v16 = vpack.c.bf16 %v3853_v48, %v3852_v56 }
 0x53b   : > { %v4031_v41 = vrot.slane %v4029_v47, 3  ;;  %v4034_v20 = vrot.slane %v4032_v18, 4  ;;  %v4039_v45 = vrot.slane %v4037_v7, 3  ;;  %v3855_v15 = vmul.f32 %v9108_v52, %v8961_v49 }
 0x53c   : > { %v4027_v0 = vsel %vm3908_vm11, %v4018_v21, %v4026_v31  ;;  %v4042_v38 = vrot.slane %v4040_v8, 4  ;;  %v3893_v59 = vpack.c.bf16 %v3854_v53, %v3854_v53  ;;  %v4046_v60 = vshrl.u32 %v3892_v16, 16 }
 0x53d   : > { %4819 = vmatprep.mubr.bf16.mxu0 %v4027_v0  ;;  %v4035_v54 = vor.u32 %v4034_v20, %v4031_v41  ;;  %v4049_v28 = vshll.u32 %v3892_v16, 16  ;;  %v3856_v24 = vmul.f32 %v9108_v52, %v8967_v62  ;;  %v3857_v29 = vmul.f32 %v9108_v52, %v8972_v42 }
 0x53e   : > { %v4043_v40 = vor.u32 %v4042_v38, %v4039_v45  ;;  %v4048_v9 = vrot.slane %v4046_v60, 3  ;;  %v4054_v25 = vshrl.u32 %v3893_v59, 16  ;;  %v4057_v37 = vshll.u32 %v3893_v59, 16 }
 0x53f   : > { %v4051_v35 = vrot.slane %v4049_v28, 4  ;;  %v3894_v49 = vpack.c.bf16 %v3856_v24, %v3855_v15  ;;  %v3895_v5 = vpack.c.bf16 %v3857_v29, %v3857_v29  ;;  %v3858_v13 = vmul.f32 %v9108_v52, %v8978_v39 }
 0x540   : > { %v4044_v55 = vsel %vm3908_vm11, %v4035_v54, %v4043_v40  ;;  %v4056_v19 = vrot.slane %v4054_v25, 3  ;;  %v4059_v30 = vrot.slane %v4057_v37, 4  ;;  %v3859_v62 = vmul.f32 %v9108_v52, %v8983_v11 }
 0x541   : > { %4820 = vmatmul.mubr.bf16.gmra.mrb[12].mxu0 %v4044_v55  ;;  %v4052_v33 = vor.u32 %v4051_v35, %v4048_v9  ;;  %v4063_v42 = vshrl.u32 %v3894_v49, 16  ;;  %v4066_v14 = vshll.u32 %v3894_v49, 16  ;;  %v4071_v61 = vshrl.u32 %v3895_v5, 16 }
 0x542   : > { %v4060_v3 = vor.u32 %v4059_v30, %v4056_v19  ;;  %v4074_v32 = vshll.u32 %v3895_v5, 16  ;;  %v3860_v1 = vmul.f32 %v9108_v52, %v8990_v17  ;;  %v3896_v27 = vpack.c.bf16 %v3859_v62, %v3858_v13 }
 0x543   : > { %v4065_v46 = vrot.slane %v4063_v42, 3  ;;  %v4068_v39 = vrot.slane %v4066_v14, 4  ;;  %v4073_v44 = vrot.slane %v4071_v61, 3  ;;  %v3861_v50 = vmul.f32 %v9108_v52, %v8995_v22 }
 0x544   : > { %v4061_v56 = vsel %vm3908_vm11, %v4052_v33, %v4060_v3  ;;  %v4076_v11 = vrot.slane %v4074_v32, 4  ;;  %v3897_v10 = vpack.c.bf16 %v3860_v1, %v3860_v1  ;;  %v4080_v58 = vshrl.u32 %v3896_v27, 16 }
 0x545   : > { %4823 = vmatprep.mubr.bf16.mxu0 %v4061_v56  ;;  %v4069_v34 = vor.u32 %v4068_v39, %v4065_v46  ;;  %v4083_v48 = vshll.u32 %v3896_v27, 16  ;;  %v3862_v21 = vmul.f32 %v9108_v52, %v9000_v12  ;;  %v3863_v17 = vmul.f32 %v9108_v52, %v9004_v51 }
 0x546   : > { %v4077_v47 = vor.u32 %v4076_v11, %v4073_v44  ;;  %v4082_v18 = vrot.slane %v4080_v58, 3  ;;  %v4088_v7 = vshrl.u32 %v3897_v10, 16  ;;  %v4091_v31 = vshll.u32 %v3897_v10, 16  ;;  %v10465_v10 = vld [vmem:[#allocation103_spill] sm:$0xff] }
 0x547   : > { %v4085_v8 = vrot.slane %v4083_v48, 4  ;;  %v3898_v22 = vpack.c.bf16 %v3862_v21, %v3861_v50  ;;  %v3899_v53 = vpack.c.bf16 %v3863_v17, %v3863_v17  ;;  %v3864_v16 = vmul.f32 %v9108_v52, %v9011_v23 }
 0x548   : > { %v4078_v41 = vsel %vm3908_vm11, %v4069_v34, %v4077_v47  ;;  %v4090_v20 = vrot.slane %v4088_v7, 3  ;;  %v4093_v45 = vrot.slane %v4091_v31, 4  ;;  %v3865_v12 = vmul.f32 %v9108_v52, %v9015_v63  ;;  %v10467_v31 = vld [vmem:[#allocation73_spill] sm:$0xff] }
 0x549   : > { %4824 = vmatmul.mubr.bf16.gmra.mrb[16].mxu0 %v4078_v41  ;;  %v4086_v15 = vor.u32 %v4085_v8, %v4082_v18  ;;  %v4097_v51 = vshrl.u32 %v3898_v22, 16  ;;  %v4100_v0 = vshll.u32 %v3898_v22, 16  ;;  %v4105_v38 = vshrl.u32 %v3899_v53, 16  ;;  %v10466_v18 = vld [vmem:[#allocation126_spill] sm:$0xff] }
 0x54a   : > { %v4094_v59 = vor.u32 %v4093_v45, %v4090_v20  ;;  %v4108_v60 = vshll.u32 %v3899_v53, 16  ;;  %v3866_v54 = vmul.f32 %v9108_v52, %v9018_v57  ;;  %v3900_v28 = vpack.c.bf16 %v3865_v12, %v3864_v16 }
 0x54b   : > { %v4099_v24 = vrot.slane %v4097_v51, 3  ;;  %v4102_v23 = vrot.slane %v4100_v0, 4  ;;  %v4107_v29 = vrot.slane %v4105_v38, 3  ;;  %v3867_v40 = vmul.f32 %v9108_v52, %v9025_v2 }
 0x54c   : > { %v4095_v9 = vsel %vm3908_vm11, %v4086_v15, %v4094_v59  ;;  %v4110_v63 = vrot.slane %v4108_v60, 4  ;;  %v3901_v25 = vpack.c.bf16 %v3866_v54, %v3866_v54  ;;  %v4114_v37 = vshrl.u32 %v3900_v28, 16 }
 0x54d   : > { %4827 = vmatprep.mubr.bf16.mxu0 %v4095_v9  ;;  %v4103_v35 = vor.u32 %v4102_v23, %v4099_v24  ;;  %v4117_v49 = vshll.u32 %v3900_v28, 16  ;;  %v3868_v5 = vmul.f32 %v9108_v52, %v9028_v36  ;;  %v3869_v57 = vmul.f32 %v9108_v52, %v9034_v4 }
 0x54e   : > { %v4111_v13 = vor.u32 %v4110_v63, %v4107_v29  ;;  %v4116_v55 = vrot.slane %v4114_v37, 3  ;;  %v4122_v19 = vshrl.u32 %v3901_v25, 16  ;;  %v4125_v30 = vshll.u32 %v3901_v25, 16  ;;  %v9225_v37 = vld [vmem:[%s9375_s10] ss:$0 sm:$0xff] }
 0x54f   : > { %v4119_v62 = vrot.slane %v4117_v49, 4  ;;  %v3902_v2 = vpack.c.bf16 %v3868_v5, %v3867_v40  ;;  %v3903_v33 = vpack.c.bf16 %v3869_v57, %v3869_v57  ;;  %v3870_v42 = vmul.f32 %v9108_v52, %v9039_v6 }
 0x550   : > { %v4112_v14 = vsel %vm3908_vm11, %v4103_v35, %v4111_v13  ;;  %v4124_v61 = vrot.slane %v4122_v19, 3  ;;  %v4127_v3 = vrot.slane %v4125_v30, 4  ;;  %v3871_v36 = vmul.f32 %v9108_v52, %v9043_v43 }
 0x551   : > { %4828 = vmatmul.mubr.bf16.gmra.mrb[20].mxu0 %v4112_v14  ;;  %v4120_v32 = vor.u32 %v4119_v62, %v4116_v55  ;;  %v4131_v4 = vshrl.u32 %v3902_v2, 16  ;;  %v4134_v1 = vshll.u32 %v3902_v2, 16  ;;  %v4139_v27 = vshrl.u32 %v3903_v33, 16  ;;  %v5219_v55 = vld [vmem:[%s5352_s25 + $0x10] sm:$0xff]  ;;  %v5220_v2 = vld [vmem:[%s5352_s25] sm:$0xff]  ;;  %v5221_v14 = vld [vmem:[%s5352_s25 + $0x18] sm:$0xff] }
 0x552   : > { %v4128_v46 = vor.u32 %v4127_v3, %v4124_v61  ;;  %v4142_v39 = vshll.u32 %v3903_v33, 16  ;;  %v3872_v44 = vmul.f32 %v9108_v52, %v9048_v26  ;;  %v3904_v50 = vpack.c.bf16 %v3871_v36, %v3870_v42  ;;  %v5222_v3 = vld [vmem:[%s5352_s25 + $0x8] sm:$0xff] }
 0x553   : > { %v4133_v56 = vrot.slane %v4131_v4, 3  ;;  %v4136_v6 = vrot.slane %v4134_v1, 4  ;;  %v4141_v11 = vrot.slane %v4139_v27, 3  ;;  %v3873_v58 = vmul.f32 %v9108_v52, %v10465_v10 }
 0x554   : > { %v4129_v34 = vsel %vm3908_vm11, %v4120_v32, %v4128_v46  ;;  %v4144_v43 = vrot.slane %v4142_v39, 4  ;;  %v3905_v48 = vpack.c.bf16 %v3872_v44, %v3872_v44  ;;  %v4148_v21 = vshrl.u32 %v3904_v50, 16  ;;  %v5223_v39 = vld [vmem:[%s5352_s25 + $0x30] sm:$0xff] }
 0x555   : > { %4831 = vmatprep.mubr.bf16.mxu0 %v4129_v34  ;;  %v4137_v17 = vor.u32 %v4136_v6, %v4133_v56  ;;  %v4151_v47 = vshll.u32 %v3904_v50, 16  ;;  %v3874_v7 = vmul.f32 %v9108_v52, %v10466_v18  ;;  %v3875_v26 = vmul.f32 %v9108_v52, %v10467_v31  ;;  %v5224_v6 = vld [vmem:[%s5352_s25 + $0x20] sm:$0xff]  ;;  %v5227_v31 = vld [vmem:[%s5352_s25 + $0x50] sm:$0xff] }
 0x556   : > { %v4145_v8 = vor.u32 %v4144_v43, %v4141_v11  ;;  %v4150_v22 = vrot.slane %v4148_v21, 3  ;;  %v4156_v53 = vshrl.u32 %v3905_v48, 16  ;;  %v4159_v16 = vshll.u32 %v3905_v48, 16  ;;  %v5226_v43 = vld [vmem:[%s5352_s25 + $0x28] sm:$0xff] }
 0x557   : > { %v4153_v41 = vrot.slane %v4151_v47, 4  ;;  %v3906_v20 = vpack.c.bf16 %v3874_v7, %v3873_v58  ;;  %v3907_v45 = vpack.c.bf16 %v3875_v26, %v3875_v26  ;;  %v5225_v58 = vld [vmem:[%s5352_s25 + $0x38] sm:$0xff] }
 0x558   : > { %v4146_v12 = vsel %vm3908_vm11, %v4137_v17, %v4145_v8  ;;  %v4158_v15 = vrot.slane %v4156_v53, 3  ;;  %v4161_v51 = vrot.slane %v4159_v16, 4  ;;  %v5228_v53 = vld [vmem:[%s5352_s25 + $0x40] sm:$0xff] }
 0x559   : > { %4832 = vmatmul.mubr.bf16.gmra.mrb[24].mxu0 %v4146_v12  ;;  %v4154_v0 = vor.u32 %v4153_v41, %v4150_v22  ;;  %v4165_v38 = vshrl.u32 %v3906_v20, 16  ;;  %v4168_v59 = vshll.u32 %v3906_v20, 16  ;;  %v4173_v60 = vshrl.u32 %v3907_v45, 16  ;;  %v5229_v20 = vld [vmem:[%s5352_s25 + $0x58] sm:$0xff]  ;;  %v5230_v12 = vld [vmem:[%s5352_s25 + $0x48] sm:$0xff] }
 0x55a   : > { %v4162_v54 = vor.u32 %v4161_v51, %v4158_v15  ;;  %v4176_v28 = vshll.u32 %v3907_v45, 16 }
 0x55b   : > { %v4167_v52 = vrot.slane %v4165_v38, 3  ;;  %v4170_v24 = vrot.slane %v4168_v59, 4  ;;  %v4175_v23 = vrot.slane %v4173_v60, 3 }
 0x55c   : > { %v4163_v29 = vsel %vm3908_vm11, %v4154_v0, %v4162_v54  ;;  %v4178_v40 = vrot.slane %v4176_v28, 4  ;;  %v5231_v54 = vld [vmem:[%s5352_s25 + $0x70] sm:$0xff] }
 0x55d   : > { %4835 = vmatprep.mubr.bf16.mxu0 %v4163_v29  ;;  %v4171_v9 = vor.u32 %v4170_v24, %v4167_v52 }
 0x55e   : > { %v4179_v63 = vor.u32 %v4178_v40, %v4175_v23  ;;  %v5232_v23 = vld [vmem:[%s5352_s25 + $0x60] sm:$0xff] }
 0x560   : > { %v4180_v25 = vsel %vm3908_vm11, %v4171_v9, %v4179_v63  ;;  %v5233_v9 = vld [vmem:[%s5352_s25 + $0x78] sm:$0xff] }
 0x561   : > { %4836 = vmatmul.mubr.bf16.gmra.mrb[28].mxu0 %v4180_v25  ;;  %v5234_v25 = vld [vmem:[%s5352_s25 + $0x68] sm:$0xff] }
 0x5fb   : > { %v4809_v35 = vpop.f32.mrb[0].mxu0 }
 0x5fc   : > { %v4311_v49 = vadd.f32 %v4809_v35, %v9225_v37  ;;  %v4302_v5 = vpop.f32.mrb[1].mxu0 }
 0x5fd   : > { %v4303_v57 = vadd.f32 %v9225_v37, %v4302_v5  ;;  %v4810_v13 = vpop.f32.mrb[2].mxu0 }
 0x5fe   : > { %v4431_v19 = vadd.f32 %v5219_v55, %v4311_v49  ;;  %v4314_v30 = vadd.f32 %v4810_v13, %v9225_v37  ;;  %v4305_v62 = vpop.f32.mrb[3].mxu0 }
 0x5ff   : > { %v4429_v33 = vadd.f32 %v5220_v2, %v4303_v57  ;;  %v4306_v42 = vadd.f32 %v9225_v37, %v4305_v62 }
 0x600   : > { %4463 = vst.msk [vmem:[%s9233_s12 + $0x10] sm:$0xff] %vm532_vm1, %v4431_v19  ;;  %v4432_v61 = vadd.f32 %v5221_v14, %v4314_v30  ;;  %v5235_v19 = vld [vmem:[%s5352_s25 + $0x90] sm:$0xff] }
 0x601   : > { %4461 = vst.msk [vmem:[%s9233_s12] sm:$0xff] %vm532_vm1, %v4429_v33  ;;  %v4430_v36 = vadd.f32 %v5222_v3, %v4306_v42  ;;  %v5236_v33 = vld [vmem:[%s5352_s25 + $0x80] sm:$0xff] }
 0x602   : > { %4464 = vst.msk [vmem:[%s9233_s12 + $0x18] sm:$0xff] %vm532_vm1, %v4432_v61  ;;  %v5237_v61 = vld [vmem:[%s5352_s25 + $0x98] sm:$0xff] }
 0x603   : > { %4462 = vst.msk [vmem:[%s9233_s12 + $0x8] sm:$0xff] %vm532_vm1, %v4430_v36  ;;  %v5238_v36 = vld [vmem:[%s5352_s25 + $0x88] sm:$0xff] }
 0x604   : > { %v4813_v32 = vpop.f32.mrb[4].mxu0 }
 0x605   : > { %v4327_v4 = vadd.f32 %v4813_v32, %v9225_v37  ;;  %v4318_v1 = vpop.f32.mrb[5].mxu0 }
 0x606   : > { %v4319_v27 = vadd.f32 %v9225_v37, %v4318_v1  ;;  %v4814_v46 = vpop.f32.mrb[6].mxu0 }
 0x607   : > { %v4435_v44 = vadd.f32 %v5223_v39, %v4327_v4  ;;  %v4330_v50 = vadd.f32 %v4814_v46, %v9225_v37  ;;  %v4321_v56 = vpop.f32.mrb[7].mxu0 }
 0x608   : > { %v4433_v11 = vadd.f32 %v5224_v6, %v4319_v27  ;;  %v4322_v10 = vadd.f32 %v9225_v37, %v4321_v56 }
 0x609   : > { %4467 = vst.msk [vmem:[%s9233_s12 + $0x30] sm:$0xff] %vm532_vm1, %v4435_v44  ;;  %v4436_v34 = vadd.f32 %v5225_v58, %v4330_v50  ;;  %v5239_v44 = vld [vmem:[%s5352_s25 + $0xb0] sm:$0xff] }
 0x60a   : > { %4465 = vst.msk [vmem:[%s9233_s12 + $0x20] sm:$0xff] %vm532_vm1, %v4433_v11  ;;  %v4434_v48 = vadd.f32 %v5226_v43, %v4322_v10  ;;  %v5240_v11 = vld [vmem:[%s5352_s25 + $0xa0] sm:$0xff] }
 0x60b   : > { %4468 = vst.msk [vmem:[%s9233_s12 + $0x38] sm:$0xff] %vm532_vm1, %v4436_v34  ;;  %v5241_v34 = vld [vmem:[%s5352_s25 + $0xb8] sm:$0xff] }
 0x60c   : > { %4466 = vst.msk [vmem:[%s9233_s12 + $0x28] sm:$0xff] %vm532_vm1, %v4434_v48  ;;  %v4817_v21 = vpop.f32.mrb[8].mxu0  ;;  %v5242_v48 = vld [vmem:[%s5352_s25 + $0xa8] sm:$0xff] }
 0x60d   : > { %v4343_v17 = vadd.f32 %v4817_v21, %v9225_v37  ;;  %v4334_v47 = vpop.f32.mrb[9].mxu0 }
 0x60e   : > { %v4335_v18 = vadd.f32 %v9225_v37, %v4334_v47  ;;  %v4818_v7 = vpop.f32.mrb[10].mxu0 }
 0x60f   : > { %v4439_v26 = vadd.f32 %v5227_v31, %v4343_v17  ;;  %v4346_v8 = vadd.f32 %v4818_v7, %v9225_v37  ;;  %v4337_v22 = vpop.f32.mrb[11].mxu0 }
 0x610   : > { %v4437_v16 = vadd.f32 %v5228_v53, %v4335_v18  ;;  %v4338_v41 = vadd.f32 %v9225_v37, %v4337_v22 }
 0x611   : > { %4471 = vst.msk [vmem:[%s9233_s12 + $0x50] sm:$0xff] %vm532_vm1, %v4439_v26  ;;  %v4440_v45 = vadd.f32 %v5229_v20, %v4346_v8  ;;  %v5243_v26 = vld [vmem:[%s5352_s25 + $0xd0] sm:$0xff] }
 0x612   : > { %4469 = vst.msk [vmem:[%s9233_s12 + $0x40] sm:$0xff] %vm532_vm1, %v4437_v16  ;;  %v4438_v15 = vadd.f32 %v5230_v12, %v4338_v41  ;;  %v5244_v16 = vld [vmem:[%s5352_s25 + $0xc0] sm:$0xff] }
 0x613   : > { %4472 = vst.msk [vmem:[%s9233_s12 + $0x58] sm:$0xff] %vm532_vm1, %v4440_v45  ;;  %v5245_v45 = vld [vmem:[%s5352_s25 + $0xd8] sm:$0xff] }
 0x614   : > { %4470 = vst.msk [vmem:[%s9233_s12 + $0x48] sm:$0xff] %vm532_vm1, %v4438_v15  ;;  %v4821_v51 = vpop.f32.mrb[12].mxu0  ;;  %v5246_v15 = vld [vmem:[%s5352_s25 + $0xc8] sm:$0xff] }
 0x615   : > { %v4359_v0 = vadd.f32 %v4821_v51, %v9225_v37  ;;  %v4350_v38 = vpop.f32.mrb[13].mxu0 }
 0x616   : > { %v4351_v59 = vadd.f32 %v9225_v37, %v4350_v38  ;;  %v4822_v60 = vpop.f32.mrb[14].mxu0 }
 0x617   : > { %v4443_v28 = vadd.f32 %v5231_v54, %v4359_v0  ;;  %v4362_v52 = vadd.f32 %v4822_v60, %v9225_v37  ;;  %v4353_v24 = vpop.f32.mrb[15].mxu0 }
 0x618   : > { %v4441_v29 = vadd.f32 %v5232_v23, %v4351_v59  ;;  %v4354_v40 = vadd.f32 %v9225_v37, %v4353_v24 }
 0x619   : > { %4475 = vst.msk [vmem:[%s9233_s12 + $0x70] sm:$0xff] %vm532_vm1, %v4443_v28  ;;  %v4444_v63 = vadd.f32 %v5233_v9, %v4362_v52  ;;  %v5247_v28 = vld [vmem:[%s5352_s25 + $0xf0] sm:$0xff] }
 0x61a   : > { %4473 = vst.msk [vmem:[%s9233_s12 + $0x60] sm:$0xff] %vm532_vm1, %v4441_v29  ;;  %v4442_v35 = vadd.f32 %v5234_v25, %v4354_v40  ;;  %v5248_v29 = vld [vmem:[%s5352_s25 + $0xe0] sm:$0xff] }
 0x61b   : > { %4476 = vst.msk [vmem:[%s9233_s12 + $0x78] sm:$0xff] %vm532_vm1, %v4444_v63  ;;  %v5249_v63 = vld [vmem:[%s5352_s25 + $0xf8] sm:$0xff] }
 0x61c   : > { %4474 = vst.msk [vmem:[%s9233_s12 + $0x68] sm:$0xff] %vm532_vm1, %v4442_v35  ;;  %v4825_v49 = vpop.f32.mrb[16].mxu0  ;;  %v5250_v35 = vld [vmem:[%s5352_s25 + $0xe8] sm:$0xff] }
 0x61d   : > { %v4375_v5 = vadd.f32 %v4825_v49, %v9225_v37  ;;  %v4366_v57 = vpop.f32.mrb[17].mxu0 }
 0x61e   : > { %v4367_v13 = vadd.f32 %v9225_v37, %v4366_v57  ;;  %v4826_v55 = vpop.f32.mrb[18].mxu0 }
 0x61f   : > { %v4447_v30 = vadd.f32 %v5235_v19, %v4375_v5  ;;  %v4378_v62 = vadd.f32 %v4826_v55, %v9225_v37  ;;  %v4369_v2 = vpop.f32.mrb[19].mxu0 }
 0x620   : > { %v4445_v42 = vadd.f32 %v5236_v33, %v4367_v13  ;;  %v4370_v14 = vadd.f32 %v9225_v37, %v4369_v2 }
 0x621   : > { %4479 = vst.msk [vmem:[%s9233_s12 + $0x90] sm:$0xff] %vm532_vm1, %v4447_v30  ;;  %v4448_v3 = vadd.f32 %v5237_v61, %v4378_v62 }
 0x622   : > { %4477 = vst.msk [vmem:[%s9233_s12 + $0x80] sm:$0xff] %vm532_vm1, %v4445_v42  ;;  %v4446_v32 = vadd.f32 %v5238_v36, %v4370_v14 }
 0x623   : > { %4480 = vst.msk [vmem:[%s9233_s12 + $0x98] sm:$0xff] %vm532_vm1, %v4448_v3 }
 0x624   : > { %4478 = vst.msk [vmem:[%s9233_s12 + $0x88] sm:$0xff] %vm532_vm1, %v4446_v32  ;;  %v4829_v4 = vpop.f32.mrb[20].mxu0 }
 0x625   : > { %v4391_v1 = vadd.f32 %v4829_v4, %v9225_v37  ;;  %v4382_v27 = vpop.f32.mrb[21].mxu0 }
 0x626   : > { %v4383_v46 = vadd.f32 %v9225_v37, %v4382_v27  ;;  %v4830_v39 = vpop.f32.mrb[22].mxu0 }
 0x627   : > { %v4451_v50 = vadd.f32 %v5239_v44, %v4391_v1  ;;  %v4394_v56 = vadd.f32 %v4830_v39, %v9225_v37  ;;  %v4385_v6 = vpop.f32.mrb[23].mxu0 }
 0x628   : > { %v4449_v10 = vadd.f32 %v5240_v11, %v4383_v46  ;;  %v4386_v58 = vadd.f32 %v9225_v37, %v4385_v6 }
 0x629   : > { %4483 = vst.msk [vmem:[%s9233_s12 + $0xb0] sm:$0xff] %vm532_vm1, %v4451_v50  ;;  %v4452_v43 = vadd.f32 %v5241_v34, %v4394_v56 }
 0x62a   : > { %4481 = vst.msk [vmem:[%s9233_s12 + $0xa0] sm:$0xff] %vm532_vm1, %v4449_v10  ;;  %v4450_v21 = vadd.f32 %v5242_v48, %v4386_v58 }
 0x62b   : > { %4484 = vst.msk [vmem:[%s9233_s12 + $0xb8] sm:$0xff] %vm532_vm1, %v4452_v43 }
 0x62c   : > { %4482 = vst.msk [vmem:[%s9233_s12 + $0xa8] sm:$0xff] %vm532_vm1, %v4450_v21  ;;  %v4833_v17 = vpop.f32.mrb[24].mxu0 }
 0x62d   : > { %v4407_v47 = vadd.f32 %v4833_v17, %v9225_v37  ;;  %v4398_v18 = vpop.f32.mrb[25].mxu0 }
 0x62e   : > { %v4399_v7 = vadd.f32 %v9225_v37, %v4398_v18  ;;  %v4834_v31 = vpop.f32.mrb[26].mxu0 }
 0x62f   : > { %v4455_v8 = vadd.f32 %v5243_v26, %v4407_v47  ;;  %v4410_v22 = vadd.f32 %v4834_v31, %v9225_v37  ;;  %v4401_v53 = vpop.f32.mrb[27].mxu0 }
 0x630   : > { %v4453_v41 = vadd.f32 %v5244_v16, %v4399_v7  ;;  %v4402_v20 = vadd.f32 %v9225_v37, %v4401_v53 }
 0x631   : > { %4487 = vst.msk [vmem:[%s9233_s12 + $0xd0] sm:$0xff] %vm532_vm1, %v4455_v8  ;;  %v4456_v12 = vadd.f32 %v5245_v45, %v4410_v22 }
 0x632   : > { %4485 = vst.msk [vmem:[%s9233_s12 + $0xc0] sm:$0xff] %vm532_vm1, %v4453_v41  ;;  %v4454_v51 = vadd.f32 %v5246_v15, %v4402_v20 }
 0x633   : > { %4488 = vst.msk [vmem:[%s9233_s12 + $0xd8] sm:$0xff] %vm532_vm1, %v4456_v12 }
 0x634   : > { %4486 = vst.msk [vmem:[%s9233_s12 + $0xc8] sm:$0xff] %vm532_vm1, %v4454_v51  ;;  %v4837_v0 = vpop.f32.mrb[28].mxu0 }
 0x635   : > { %v4423_v38 = vadd.f32 %v4837_v0, %v9225_v37  ;;  %v4414_v59 = vpop.f32.mrb[29].mxu0 }
 0x636   : > { %v4415_v60 = vadd.f32 %v9225_v37, %v4414_v59  ;;  %v4838_v54 = vpop.f32.mrb[30].mxu0 }
 0x637   : > { %v4459_v52 = vadd.f32 %v5247_v28, %v4423_v38  ;;  %v4426_v24 = vadd.f32 %v4838_v54, %v9225_v37  ;;  %v4417_v23 = vpop.f32.mrb[31].mxu0 }
 0x638   : > { %v4457_v40 = vadd.f32 %v5248_v29, %v4415_v60  ;;  %v4418_v9 = vadd.f32 %v9225_v37, %v4417_v23 }
 0x639   : > { %4491 = vst.msk [vmem:[%s9233_s12 + $0xf0] sm:$0xff] %vm532_vm1, %v4459_v52  ;;  %v4460_v25 = vadd.f32 %v5249_v63, %v4426_v24 }
 0x63a   : > { %4489 = vst.msk [vmem:[%s9233_s12 + $0xe0] sm:$0xff] %vm532_vm1, %v4457_v40  ;;  %v4458_v49 = vadd.f32 %v5250_v35, %v4418_v9 }
 0x63b   : > { %4492 = vst.msk [vmem:[%s9233_s12 + $0xf8] sm:$0xff] %vm532_vm1, %v4460_v25 }
 0x63c   : > { %4490 = vst.msk [vmem:[%s9233_s12 + $0xe8] sm:$0xff] %vm532_vm1, %v4458_v49 }
 0x63d PF: > { %s21_s17 = sadd.s32 1, %s5257_s17  }
 0x63e   : > { %p18_p4 = scmp.ge.s32.totalorder %s21_s17, 4  }
 0x640   :  { %20 = sbr.rel (!%p18_p4) target bundleno = 1 (0x1), region = 97 }

</bundles_post_ra>
